<compile_context>
chip_gen: v5e
topology: v5e:2x2
jax: 0.10.0
libtpu: 0.0.40
codegen_flags: <defaults>
</compile_context>

<pallas_src>
import functools

import jax
import jax.numpy as jnp
from jax import lax
from jax.experimental import pallas as pl
from jax.experimental.pallas import tpu as pltpu

EPS = 1e-5  # PyTorch BatchNorm default eps


# ---------------------------------------------------------------------------
# Fused Pallas kernel: BN1+ReLU+conv1 + BN2+ReLU+conv2(3x3).  Operates on a
# zero-padded (Hp x Wp) spatial grid flattened to Mp rows; padding pixels are
# masked to zero so conv2's zero padding is exact and BN stats are unskewed.
# ---------------------------------------------------------------------------
def _bottleneck_kernel(x_ref, mask_ref, g1_ref, b1_ref, grp1_ref, w1_ref,
                       g2_ref, b2_ref, grp2_ref, w2_ref, out_ref,
                       *, n_valid, n_in, Wp, halo, eps):
    f32 = jnp.float32
    bf16 = jnp.bfloat16

    Mp, K1 = x_ref.shape          # Mp = B*Hp*Wp (padded grid), K1 = ch_in*n_in
    N1 = w1_ref.shape[1]          # bottleneck width = 4*ch_out*n_in
    K2 = N1
    N2 = out_ref.shape[1]         # ch_out * n_out

    x = x_ref[...]                # (Mp, K1) f32, exactly zero on padding rows
    mask = mask_ref[...]          # (Mp, 1)  f32, 1.0 on valid pixels

    inv_cnt = 1.0 / (n_valid * n_in)   # BN count = B*H*W*n_in (valid pixels only)

    # ---- BN1 batch stats: reduce rows first, then group capsule columns -----
    s1 = jnp.sum(x, axis=0, keepdims=True)                     # (1, K1)
    q1 = jnp.sum(x * x, axis=0, keepdims=True)                 # (1, K1)
    mean1 = jnp.dot(s1, grp1_ref[...], preferred_element_type=f32) * inv_cnt
    ex2_1 = jnp.dot(q1, grp1_ref[...], preferred_element_type=f32) * inv_cnt
    var1 = jnp.maximum(ex2_1 - mean1 * mean1, 0.0)             # clamp cancellation
    scale1 = g1_ref[...] * lax.rsqrt(var1 + eps)
    shift1 = b1_ref[...] - mean1 * scale1

    # ---- BN1 + ReLU + pad-mask, conv1 (1x1 capsule conv) in bf16 on the MXU --
    a1 = mask * jnp.maximum(x * scale1 + shift1, 0.0)          # zero on padding
    y1 = jnp.dot(a1.astype(bf16), w1_ref[...],
                 preferred_element_type=f32)                   # (Mp, N1) f32

    # ---- BN2 batch stats (y1 is zero on padding rows) ------------------------
    s2 = jnp.sum(y1, axis=0, keepdims=True)
    q2 = jnp.sum(y1 * y1, axis=0, keepdims=True)
    mean2 = jnp.dot(s2, grp2_ref[...], preferred_element_type=f32) * inv_cnt
    ex2_2 = jnp.dot(q2, grp2_ref[...], preferred_element_type=f32) * inv_cnt
    var2 = jnp.maximum(ex2_2 - mean2 * mean2, 0.0)
    scale2 = g2_ref[...] * lax.rsqrt(var2 + eps)
    shift2 = b2_ref[...] - mean2 * scale2

    # ---- BN2 + ReLU; padding pixels forced to zero (true zero padding) -------
    a2 = mask * jnp.maximum(y1 * scale2 + shift2, 0.0)         # (Mp, K2) f32

    # Zero only the top/bottom halo row slices (halo, Wp are multiples of 16).
    zhalo = jnp.zeros((halo, K2), f32)
    bufh = jnp.concatenate([zhalo, a2, zhalo], axis=0)         # (R, K2)
    R = 2 * halo + Mp

    # dx-packed im2col: packed[r] = [bufh[r-1], bufh[r], bufh[r+1]].
    # The +-1 row shifts go through the (otherwise idle) XLU via pltpu.roll;
    # wrapped rows land on halo zeros.  Cast to bf16 once.
    packed = jnp.concatenate(
        [pltpu.roll(bufh, 1, 0), bufh, pltpu.roll(bufh, R - 1, 0)],
        axis=1).astype(bf16)                                   # (R, 3*K2)

    # conv2 (3x3, pad=1, stride=1): three K=3*K2 matmuls, one per dy, reading
    # sublane-aligned slices (bases are multiples of Wp, itself a multiple of 16).
    acc = jnp.zeros((Mp, N2), f32)
    for dy in range(3):
        base = halo + (dy - 1) * Wp
        acc = acc + jnp.dot(packed[base:base + Mp, :], w2_ref[dy],
                            preferred_element_type=f32)        # (Mp, N2)

    out_ref[...] = acc


# ---------------------------------------------------------------------------
# VMEM bookkeeping helpers
# ---------------------------------------------------------------------------
def _vmem_capacity_bytes():
    try:
        info = pltpu.get_tpu_info()
        cap = getattr(info, "vmem_capacity_bytes", None)
        if cap:
            return int(cap)
    except Exception:
        pass
    return 64 * 1024 * 1024          # conservative: v7x per-TensorCore VMEM


def _vmem_estimate(Mp, K1, N1, N2, R):
    def tile(r, c, itemsize):        # (8,128) native tiling padding
        rr = -(-r // 8) * 8
        cc = -(-c // 128) * 128
        return rr * cc * itemsize
    K2 = N1
    est = 0
    # pallas_call operands resident in VMEM
    est += tile(Mp, K1, 4)                       # x_pad
    est += tile(Mp, 1, 4)                        # validity mask
    est += 2 * tile(1, K1, 4) + 2 * tile(1, N1, 4)
    est += tile(K1, K1, 4) + tile(N1, N1, 4)     # grouping matrices
    est += tile(K1, N1, 2)                       # w1 (bf16)
    est += 3 * tile(3 * K2, N2, 2)               # w2 (bf16, dx-packed)
    est += tile(Mp, N2, 4)                       # out
    # generous accounting of in-kernel intermediates
    est += 2 * tile(Mp, K1, 4)                   # x*x, a1
    est += 3 * tile(Mp, N1, 4)                   # y1, y1*y1, a2
    est += tile(R, K2, 4)                        # zero-haloed activations
    est += tile(R, 3 * K2, 4) + tile(R, 3 * K2, 2)   # packed (f32 temp + bf16)
    est += 2 * tile(Mp, N2, 4)                   # conv2 accumulator
    return est


# ---------------------------------------------------------------------------
# BottleneckBlock forward (NCDHW in / NCDHW out)
# ---------------------------------------------------------------------------
def bottleneck_block_forward(x, params, ch_out, n_out, drop_rate=0.0):
    """x: (B, ch_in, n_in, H, W) float32 -> (B, ch_in + ch_out, n_out, H, W)."""
    assert drop_rate == 0.0, "TODO(synk): dropout not implemented"
    B, C_in, n_in, H, W = x.shape
    assert n_out == n_in, "channel concat requires n_out == n_in"
    C2 = params["bn2_gamma"].shape[0]            # bottleneck channels = 4*ch_out
    K1 = C_in * n_in
    N1 = C2 * n_in
    K2 = N1
    N2 = ch_out * n_out
    M = B * H * W
    f32 = jnp.float32

    # Padded spatial grid: Hp = H+2; Wp rounded to a multiple of 16 so dy row
    # shifts (multiples of Wp) and the bf16 tap slices stay sublane-aligned.
    Hp = H + 2
    Wp = -((W + 2) // -16) * 16
    halo = Wp
    Mp = B * Hp * Wp
    R = Mp + 2 * halo

    # Channels-last, spatially zero-padded input (padding pixels are exactly 0).
    x_cl = jnp.transpose(x, (0, 3, 4, 1, 2)).reshape(B, H, W, K1)
    x_pad = jnp.pad(x_cl, ((0, 0), (1, 1), (1, Wp - W - 1), (0, 0))).reshape(Mp, K1)

    # Validity mask of the padded grid (1 = real pixel).
    ph_ok = (jnp.arange(Hp) >= 1) & (jnp.arange(Hp) <= H)
    pw_ok = (jnp.arange(Wp) >= 1) & (jnp.arange(Wp) <= W)
    mask = (ph_ok[:, None] & pw_ok[None, :]).astype(f32)
    mask = jnp.broadcast_to(mask[None], (B, Hp, Wp)).reshape(Mp, 1)

    # Per-flattened-column BN affine params (repeat per capsule).
    g1 = jnp.repeat(params["bn1_gamma"], n_in).reshape(1, K1)
    b1 = jnp.repeat(params["bn1_beta"], n_in).reshape(1, K1)
    g2 = jnp.repeat(params["bn2_gamma"], n_in).reshape(1, N1)
    b2 = jnp.repeat(params["bn2_beta"], n_in).reshape(1, N1)

    # Constant capsule-column -> channel grouping matrices (built once, here).
    def group_matrix(k, n):
        cid = jnp.arange(k) // n
        return (cid[:, None] == cid[None, :]).astype(f32)
    grp1 = group_matrix(K1, n_in)
    grp2 = group_matrix(N1, n_in)

    # Conv weights in bf16 (f32 MXU accumulation in-kernel); w2 dy-major with
    # the three dx taps packed along its K axis.
    w1 = params["w1"].astype(jnp.bfloat16)                          # (K1, N1)
    w2 = params["w2"].reshape(3, 3 * K2, N2).astype(jnp.bfloat16)   # (3, 3*K2, N2)

    # Per-generation VMEM budget + explicit scoped limit.
    est = _vmem_estimate(Mp, K1, N1, N2, R)
    cap = _vmem_capacity_bytes()
    assert est < 0.7 * cap, (
        "TODO(synk): tiled two-pass (stats kernel, then apply+conv kernel with "
        "the M axis 'parallel') path needed for this size")
    vmem_limit = int(min(max(2 * est, 32 * 1024 * 1024), int(0.9 * cap)))

    kernel = functools.partial(_bottleneck_kernel, n_valid=M, n_in=n_in,
                               Wp=Wp, halo=halo, eps=EPS)
    vmem = pl.BlockSpec(memory_space=pltpu.MemorySpace.VMEM)
    y_pad = pl.pallas_call(
        kernel,
        out_shape=jax.ShapeDtypeStruct((Mp, N2), f32),
        in_specs=[vmem] * 10,
        out_specs=vmem,
        compiler_params=pltpu.CompilerParams(vmem_limit_bytes=vmem_limit),
    )(x_pad, mask, g1, b1, grp1, w1, g2, b2, grp2, w2)

    # Crop the interior, restore (B, ch, n, H, W), and do the DenseNet concat.
    y = y_pad.reshape(B, Hp, Wp, ch_out, n_out)[:, 1:H + 1, 1:W + 1]
    y = jnp.transpose(y, (0, 3, 4, 1, 2))
    return jnp.concatenate([x, y], axis=1)


# ---------------------------------------------------------------------------
# Pure-JAX reference (ground truth for the sanity check)
# ---------------------------------------------------------------------------
def reference_forward(x, params, ch_out, n_out):
    B, C_in, n_in, H, W = x.shape
    C2 = params["bn2_gamma"].shape[0]
    hp = lax.Precision.HIGHEST

    mean1 = x.mean(axis=(0, 2, 3, 4), keepdims=True)
    var1 = x.var(axis=(0, 2, 3, 4), keepdims=True)
    g1 = params["bn1_gamma"].reshape(1, -1, 1, 1, 1)
    b1 = params["bn1_beta"].reshape(1, -1, 1, 1, 1)
    a1 = jnp.maximum(g1 * (x - mean1) / jnp.sqrt(var1 + EPS) + b1, 0.0)
    a1_cl = jnp.transpose(a1, (0, 3, 4, 1, 2)).reshape(B, H, W, C_in * n_in)
    y1 = jnp.einsum("bhwk,kn->bhwn", a1_cl, params["w1"], precision=hp)

    y1_caps = y1.reshape(B, H, W, C2, n_in)
    mean2 = y1_caps.mean(axis=(0, 1, 2, 4)).reshape(1, 1, 1, C2, 1)
    var2 = y1_caps.var(axis=(0, 1, 2, 4)).reshape(1, 1, 1, C2, 1)
    g2 = params["bn2_gamma"].reshape(1, 1, 1, C2, 1)
    b2 = params["bn2_beta"].reshape(1, 1, 1, C2, 1)
    a2 = jnp.maximum(g2 * (y1_caps - mean2) / jnp.sqrt(var2 + EPS) + b2, 0.0)
    a2 = a2.reshape(B, H, W, C2 * n_in)

    w2 = params["w2"].reshape(3, 3, C2 * n_in, ch_out * n_out)
    y2 = lax.conv_general_dilated(
        a2, w2, window_strides=(1, 1), padding="SAME",
        dimension_numbers=("NHWC", "HWIO", "NHWC"), precision=hp)
    y = y2.reshape(B, H, W, ch_out, n_out).transpose(0, 3, 4, 1, 2)
    return jnp.concatenate([x, y], axis=1)


# ---------------------------------------------------------------------------
# Parameter init
# ---------------------------------------------------------------------------
def init_params(key, ch_in, n_in, ch_out, n_out):
    c2 = ch_out * 4
    k_g1, k_b1, k_w1, k_g2, k_b2, k_w2 = jax.random.split(key, 6)
    return {
        "bn1_gamma": 1.0 + 0.1 * jax.random.normal(k_g1, (ch_in,), jnp.float32),
        "bn1_beta": 0.1 * jax.random.normal(k_b1, (ch_in,), jnp.float32),
        "w1": 0.1 * jax.random.normal(k_w1, (ch_in * n_in, c2 * n_in), jnp.float32),
        "bn2_gamma": 1.0 + 0.1 * jax.random.normal(k_g2, (c2,), jnp.float32),
        "bn2_beta": 0.1 * jax.random.normal(k_b2, (c2,), jnp.float32),
        "w2": 0.1 * jax.random.normal(k_w2, (9 * c2 * n_in, ch_out * n_out), jnp.float32),
    }


if __name__ == "__main__":
    B, ch_in, n_in, H, W = 2, 4, 4, 8, 8
    ch_out, n_out = 4, 4            # n_out must equal n_in for the channel concat
    drop_rate = 0.0

    key = jax.random.PRNGKey(0)
    k_x, k_p = jax.random.split(key)
    x = jax.random.normal(k_x, (B, ch_in, n_in, H, W), jnp.float32)
    params = init_params(k_p, ch_in, n_in, ch_out, n_out)

    fwd = jax.jit(functools.partial(bottleneck_block_forward,
                                    ch_out=ch_out, n_out=n_out, drop_rate=drop_rate))
    out = jax.block_until_ready(fwd(x, params))

    assert out.shape == (B, ch_in + ch_out, n_out, H, W), out.shape

    ref = jax.block_until_ready(reference_forward(x, params, ch_out, n_out))
    max_err = float(jnp.max(jnp.abs(out - ref)))
    assert max_err < 5e-2, f"mismatch vs reference: {max_err}"

    print("KERNEL_OK")
</pallas_src>

<mosaic_0001>
module attributes {stable_mosaic.version = 11 : i64} {
  func.func @_bottleneck_kernel(%arg0: memref<320x16xf32, #tpu.memory_space<vmem>>, %arg1: memref<320x1xf32, #tpu.memory_space<vmem>>, %arg2: memref<1x16xf32, #tpu.memory_space<vmem>>, %arg3: memref<1x16xf32, #tpu.memory_space<vmem>>, %arg4: memref<16x16xf32, #tpu.memory_space<vmem>>, %arg5: memref<16x64xbf16, #tpu.memory_space<vmem>>, %arg6: memref<1x64xf32, #tpu.memory_space<vmem>>, %arg7: memref<1x64xf32, #tpu.memory_space<vmem>>, %arg8: memref<64x64xf32, #tpu.memory_space<vmem>>, %arg9: memref<3x192x16xbf16, #tpu.memory_space<vmem>>, %arg10: memref<320x16xf32, #tpu.memory_space<vmem>>) attributes {dimension_semantics = [], scalar_prefetch = 0 : i64, scratch_operands = 0 : i64, tpu.core_type = #tpu.core_type<tc>} {
    %c0 = arith.constant 0 : index
    %c0_0 = arith.constant 0 : index
    %0 = vector.load %arg0[%c0, %c0_0] : memref<320x16xf32, #tpu.memory_space<vmem>>, vector<320x16xf32>
    %c0_1 = arith.constant 0 : index
    %c0_2 = arith.constant 0 : index
    %1 = vector.load %arg1[%c0_1, %c0_2] : memref<320x1xf32, #tpu.memory_space<vmem>>, vector<320x1xf32>
    %cst = arith.constant dense<0.000000e+00> : vector<16xf32>
    %2 = vector.multi_reduction <add>, %0, %cst [0] : vector<320x16xf32> to vector<16xf32>
    %3 = vector.shape_cast %2 : vector<16xf32> to vector<1x16xf32>
    %4 = arith.mulf %0, %0 : vector<320x16xf32>
    %cst_3 = arith.constant dense<0.000000e+00> : vector<16xf32>
    %5 = vector.multi_reduction <add>, %4, %cst_3 [0] : vector<320x16xf32> to vector<16xf32>
    %6 = vector.shape_cast %5 : vector<16xf32> to vector<1x16xf32>
    %c0_4 = arith.constant 0 : index
    %c0_5 = arith.constant 0 : index
    %7 = vector.load %arg4[%c0_4, %c0_5] : memref<16x16xf32, #tpu.memory_space<vmem>>, vector<16x16xf32>
    %cst_6 = arith.constant dense<0.000000e+00> : vector<1x16xf32>
    %8 = tpu.matmul %3, %7, %cst_6 {dimension_numbers = #tpu.dot_dimension_numbers<[1], [0], [0], [1], [0, 0, 1, 1], [], []>} : vector<1x16xf32>, vector<16x16xf32>, vector<1x16xf32> -> vector<1x16xf32>
    %cst_7 = arith.constant 0.001953125 : f32
    %9 = vector.broadcast %cst_7 : f32 to vector<1x16xf32>
    %10 = arith.mulf %8, %9 : vector<1x16xf32>
    %c0_8 = arith.constant 0 : index
    %c0_9 = arith.constant 0 : index
    %11 = vector.load %arg4[%c0_8, %c0_9] : memref<16x16xf32, #tpu.memory_space<vmem>>, vector<16x16xf32>
    %cst_10 = arith.constant dense<0.000000e+00> : vector<1x16xf32>
    %12 = tpu.matmul %6, %11, %cst_10 {dimension_numbers = #tpu.dot_dimension_numbers<[1], [0], [0], [1], [0, 0, 1, 1], [], []>} : vector<1x16xf32>, vector<16x16xf32>, vector<1x16xf32> -> vector<1x16xf32>
    %cst_11 = arith.constant 0.001953125 : f32
    %13 = vector.broadcast %cst_11 : f32 to vector<1x16xf32>
    %14 = arith.mulf %12, %13 : vector<1x16xf32>
    %15 = arith.mulf %10, %10 : vector<1x16xf32>
    %16 = arith.subf %14, %15 : vector<1x16xf32>
    %cst_12 = arith.constant 0.000000e+00 : f32
    %17 = vector.broadcast %cst_12 : f32 to vector<1x16xf32>
    %18 = arith.maximumf %16, %17 : vector<1x16xf32>
    %c0_13 = arith.constant 0 : index
    %c0_14 = arith.constant 0 : index
    %19 = vector.load %arg2[%c0_13, %c0_14] : memref<1x16xf32, #tpu.memory_space<vmem>>, vector<1x16xf32>
    %cst_15 = arith.constant 9.99999974E-6 : f32
    %20 = vector.broadcast %cst_15 : f32 to vector<1x16xf32>
    %21 = arith.addf %18, %20 : vector<1x16xf32>
    %22 = math.rsqrt %21 : vector<1x16xf32>
    %23 = arith.mulf %19, %22 : vector<1x16xf32>
    %c0_16 = arith.constant 0 : index
    %c0_17 = arith.constant 0 : index
    %24 = vector.load %arg3[%c0_16, %c0_17] : memref<1x16xf32, #tpu.memory_space<vmem>>, vector<1x16xf32>
    %25 = arith.mulf %10, %23 : vector<1x16xf32>
    %26 = arith.subf %24, %25 : vector<1x16xf32>
    %27 = vector.broadcast %23 : vector<1x16xf32> to vector<320x16xf32>
    %28 = arith.mulf %0, %27 : vector<320x16xf32>
    %29 = vector.broadcast %26 : vector<1x16xf32> to vector<320x16xf32>
    %30 = arith.addf %28, %29 : vector<320x16xf32>
    %cst_18 = arith.constant 0.000000e+00 : f32
    %31 = vector.broadcast %cst_18 : f32 to vector<320x16xf32>
    %32 = arith.maximumf %30, %31 : vector<320x16xf32>
    %33 = vector.broadcast %1 : vector<320x1xf32> to vector<320x16xf32>
    %34 = arith.mulf %33, %32 : vector<320x16xf32>
    %35 = arith.truncf %34 : vector<320x16xf32> to vector<320x16xbf16>
    %c0_19 = arith.constant 0 : index
    %c0_20 = arith.constant 0 : index
    %36 = vector.load %arg5[%c0_19, %c0_20] : memref<16x64xbf16, #tpu.memory_space<vmem>>, vector<16x64xbf16>
    %cst_21 = arith.constant dense<0.000000e+00> : vector<320x64xf32>
    %37 = tpu.matmul %35, %36, %cst_21 {dimension_numbers = #tpu.dot_dimension_numbers<[1], [0], [0], [1], [0, 0, 1, 1], [], []>} : vector<320x16xbf16>, vector<16x64xbf16>, vector<320x64xf32> -> vector<320x64xf32>
    %cst_22 = arith.constant dense<0.000000e+00> : vector<64xf32>
    %38 = vector.multi_reduction <add>, %37, %cst_22 [0] : vector<320x64xf32> to vector<64xf32>
    %39 = vector.shape_cast %38 : vector<64xf32> to vector<1x64xf32>
    %40 = arith.mulf %37, %37 : vector<320x64xf32>
    %cst_23 = arith.constant dense<0.000000e+00> : vector<64xf32>
    %41 = vector.multi_reduction <add>, %40, %cst_23 [0] : vector<320x64xf32> to vector<64xf32>
    %42 = vector.shape_cast %41 : vector<64xf32> to vector<1x64xf32>
    %c0_24 = arith.constant 0 : index
    %c0_25 = arith.constant 0 : index
    %43 = vector.load %arg8[%c0_24, %c0_25] : memref<64x64xf32, #tpu.memory_space<vmem>>, vector<64x64xf32>
    %cst_26 = arith.constant dense<0.000000e+00> : vector<1x64xf32>
    %44 = tpu.matmul %39, %43, %cst_26 {dimension_numbers = #tpu.dot_dimension_numbers<[1], [0], [0], [1], [0, 0, 1, 1], [], []>} : vector<1x64xf32>, vector<64x64xf32>, vector<1x64xf32> -> vector<1x64xf32>
    %cst_27 = arith.constant 0.001953125 : f32
    %45 = vector.broadcast %cst_27 : f32 to vector<1x64xf32>
    %46 = arith.mulf %44, %45 : vector<1x64xf32>
    %c0_28 = arith.constant 0 : index
    %c0_29 = arith.constant 0 : index
    %47 = vector.load %arg8[%c0_28, %c0_29] : memref<64x64xf32, #tpu.memory_space<vmem>>, vector<64x64xf32>
    %cst_30 = arith.constant dense<0.000000e+00> : vector<1x64xf32>
    %48 = tpu.matmul %42, %47, %cst_30 {dimension_numbers = #tpu.dot_dimension_numbers<[1], [0], [0], [1], [0, 0, 1, 1], [], []>} : vector<1x64xf32>, vector<64x64xf32>, vector<1x64xf32> -> vector<1x64xf32>
    %cst_31 = arith.constant 0.001953125 : f32
    %49 = vector.broadcast %cst_31 : f32 to vector<1x64xf32>
    %50 = arith.mulf %48, %49 : vector<1x64xf32>
    %51 = arith.mulf %46, %46 : vector<1x64xf32>
    %52 = arith.subf %50, %51 : vector<1x64xf32>
    %cst_32 = arith.constant 0.000000e+00 : f32
    %53 = vector.broadcast %cst_32 : f32 to vector<1x64xf32>
    %54 = arith.maximumf %52, %53 : vector<1x64xf32>
    %c0_33 = arith.constant 0 : index
    %c0_34 = arith.constant 0 : index
    %55 = vector.load %arg6[%c0_33, %c0_34] : memref<1x64xf32, #tpu.memory_space<vmem>>, vector<1x64xf32>
    %cst_35 = arith.constant 9.99999974E-6 : f32
    %56 = vector.broadcast %cst_35 : f32 to vector<1x64xf32>
    %57 = arith.addf %54, %56 : vector<1x64xf32>
    %58 = math.rsqrt %57 : vector<1x64xf32>
    %59 = arith.mulf %55, %58 : vector<1x64xf32>
    %c0_36 = arith.constant 0 : index
    %c0_37 = arith.constant 0 : index
    %60 = vector.load %arg7[%c0_36, %c0_37] : memref<1x64xf32, #tpu.memory_space<vmem>>, vector<1x64xf32>
    %61 = arith.mulf %46, %59 : vector<1x64xf32>
    %62 = arith.subf %60, %61 : vector<1x64xf32>
    %63 = vector.broadcast %59 : vector<1x64xf32> to vector<320x64xf32>
    %64 = arith.mulf %37, %63 : vector<320x64xf32>
    %65 = vector.broadcast %62 : vector<1x64xf32> to vector<320x64xf32>
    %66 = arith.addf %64, %65 : vector<320x64xf32>
    %cst_38 = arith.constant 0.000000e+00 : f32
    %67 = vector.broadcast %cst_38 : f32 to vector<320x64xf32>
    %68 = arith.maximumf %66, %67 : vector<320x64xf32>
    %69 = vector.broadcast %1 : vector<320x1xf32> to vector<320x64xf32>
    %70 = arith.mulf %69, %68 : vector<320x64xf32>
    %cst_39 = arith.constant 0.000000e+00 : f32
    %71 = vector.broadcast %cst_39 : f32 to vector<16x64xf32>
    %72 = tpu.concatenate %71, %70, %71 in 0 : vector<16x64xf32>, vector<320x64xf32>, vector<16x64xf32> -> vector<352x64xf32>
    %c1_i32 = arith.constant 1 : i32
    %73 = tpu.dynamic_rotate %72 by %c1_i32 dim 0 : vector<352x64xf32>, i32 -> vector<352x64xf32>
    %c351_i32 = arith.constant 351 : i32
    %74 = tpu.dynamic_rotate %72 by %c351_i32 dim 0 : vector<352x64xf32>, i32 -> vector<352x64xf32>
    %75 = tpu.concatenate %73, %72, %74 in 1 : vector<352x64xf32>, vector<352x64xf32>, vector<352x64xf32> -> vector<352x192xf32>
    %76 = arith.truncf %75 : vector<352x192xf32> to vector<352x192xbf16>
    %cst_40 = arith.constant 0.000000e+00 : f32
    %77 = vector.broadcast %cst_40 : f32 to vector<320x16xf32>
    %78 = vector.extract_strided_slice %76 {offsets = [0, 0], sizes = [320, 192], strides = [1, 1]} : vector<352x192xbf16> to vector<320x192xbf16>
    %c0_41 = arith.constant 0 : index
    %c0_42 = arith.constant 0 : index
    %c0_43 = arith.constant 0 : index
    %79 = vector.load %arg9[%c0_41, %c0_42, %c0_43] : memref<3x192x16xbf16, #tpu.memory_space<vmem>>, vector<1x192x16xbf16>
    %80 = vector.shape_cast %79 : vector<1x192x16xbf16> to vector<192x16xbf16>
    %cst_44 = arith.constant dense<0.000000e+00> : vector<320x16xf32>
    %81 = tpu.matmul %78, %80, %cst_44 {dimension_numbers = #tpu.dot_dimension_numbers<[1], [0], [0], [1], [0, 0, 1, 1], [], []>} : vector<320x192xbf16>, vector<192x16xbf16>, vector<320x16xf32> -> vector<320x16xf32>
    %82 = arith.addf %77, %81 : vector<320x16xf32>
    %83 = vector.extract_strided_slice %76 {offsets = [16, 0], sizes = [320, 192], strides = [1, 1]} : vector<352x192xbf16> to vector<320x192xbf16>
    %c1 = arith.constant 1 : index
    %c0_45 = arith.constant 0 : index
    %c0_46 = arith.constant 0 : index
    %84 = vector.load %arg9[%c1, %c0_45, %c0_46] : memref<3x192x16xbf16, #tpu.memory_space<vmem>>, vector<1x192x16xbf16>
    %85 = vector.shape_cast %84 : vector<1x192x16xbf16> to vector<192x16xbf16>
    %cst_47 = arith.constant dense<0.000000e+00> : vector<320x16xf32>
    %86 = tpu.matmul %83, %85, %cst_47 {dimension_numbers = #tpu.dot_dimension_numbers<[1], [0], [0], [1], [0, 0, 1, 1], [], []>} : vector<320x192xbf16>, vector<192x16xbf16>, vector<320x16xf32> -> vector<320x16xf32>
    %87 = arith.addf %82, %86 : vector<320x16xf32>
    %88 = vector.extract_strided_slice %76 {offsets = [32, 0], sizes = [320, 192], strides = [1, 1]} : vector<352x192xbf16> to vector<320x192xbf16>
    %c2 = arith.constant 2 : index
    %c0_48 = arith.constant 0 : index
    %c0_49 = arith.constant 0 : index
    %89 = vector.load %arg9[%c2, %c0_48, %c0_49] : memref<3x192x16xbf16, #tpu.memory_space<vmem>>, vector<1x192x16xbf16>
    %90 = vector.shape_cast %89 : vector<1x192x16xbf16> to vector<192x16xbf16>
    %cst_50 = arith.constant dense<0.000000e+00> : vector<320x16xf32>
    %91 = tpu.matmul %88, %90, %cst_50 {dimension_numbers = #tpu.dot_dimension_numbers<[1], [0], [0], [1], [0, 0, 1, 1], [], []>} : vector<320x192xbf16>, vector<192x16xbf16>, vector<320x16xf32> -> vector<320x16xf32>
    %92 = arith.addf %87, %91 : vector<320x16xf32>
    %c0_51 = arith.constant 0 : index
    %c0_52 = arith.constant 0 : index
    %93 = vector.load %arg10[%c0_51, %c0_52] : memref<320x16xf32, #tpu.memory_space<vmem>>, vector<320x16xf32>
    tpu.vector_store %arg10[%c0_51, %c0_52], %92 {strides = array<i32>} : memref<320x16xf32, #tpu.memory_space<vmem>>, vector<320x16xf32>,
    return
  }
}

</mosaic_0001>

<bundles_post_ra>
// kernel: bottleneck_block_forward.1
= control target key start
LH: loop header
LB: loop body
LE: loop exit
PB: predicated region body
PF: predicated region fallthrough
CT: control target
= control target key end

     0   :  { %v3560_v0 = vmov 0   ;;  %vm116_vm0 = vcmask 130048   ;;  %vm959_vm4 = vcmask 523264   ;;  %s6907_s1 = inlined_call_operand.vmem [shape: f32[320,1], index: 1, kind: input, shape index: {}]   ;;  %s6908_s0 = inlined_call_operand.vmem [shape: f32[320,16], index: 0, kind: input, shape index: {}]   ;;  %s6909_s4 = inlined_call_operand.vmem [shape: f32[16,16], index: 4, kind: input, shape index: {}]   ;;  %s6910_s2 = inlined_call_operand.vmem [shape: f32[1,16], index: 2, kind: input, shape index: {}]   ;;  %s6911_s3 = inlined_call_operand.vmem [shape: f32[1,16], index: 3, kind: input, shape index: {}]   ;;  %s6912_s5 = inlined_call_operand.vmem [shape: bf16[16,64], index: 5, kind: input, shape index: {}]   ;;  %s6913_s8 = inlined_call_operand.vmem [shape: f32[64,64], index: 8, kind: input, shape index: {}]   ;;  %s6914_s6 = inlined_call_operand.vmem [shape: f32[1,64], index: 6, kind: input, shape index: {}]   ;;  %s6915_s7 = inlined_call_operand.vmem [shape: f32[1,64], index: 7, kind: input, shape index: {}]   ;;  %s6916_s9 = inlined_call_operand.vmem [shape: bf16[3,192,16], index: 9, kind: input, shape index: {}]   ;;  %s6917_s10 = inlined_call_operand.vmem [shape: f32[320,16], index: 10, kind: output, shape index: {}]  }
   0x1   :  { %3448 = vset.pattern.permute.xlu0 %v3560_v0  ;;  %v82_v1 = vld [vmem:[%s6907_s1 + $0x30] sm:$0xff]  ;;  %3449 = vset.pattern.permute.xlu1 %v3560_v0  ;;  %v84_v2 = vld [vmem:[%s6907_s1 + $0x40] sm:$0xff]  ;;  %v3635_v5 = vld [vmem:[%s6908_s0 + $0x8] sm:$0xff] }
   0x2   :  { %554 = vperm.xlu0 %3448, %v82_v1   ;;  %564 = vperm.xlu1 %3449, %v84_v2   ;;  %v86_v3 = vld [vmem:[%s6907_s1 + $0x50] sm:$0xff]  ;;  %v3630_v4 = vld [vmem:[%s6908_s0] sm:$0xff]  ;;  %v3645_v7 = vld [vmem:[%s6908_s0 + $0x18] sm:$0xff]  ;;  %v118_v9 = vsel %vm116_vm0, %v3635_v5, 0.0  ;;  %v203_v27 = vmul.f32 %v3635_v5, %v3635_v5 }
   0x3   :  { %3450 = vset.pattern.permute.xlu2 %v3560_v0  ;;  %v3640_v6 = vld [vmem:[%s6908_s0 + $0x10] sm:$0xff]  ;;  %v117_v8 = vsel %vm116_vm0, %v3630_v4, 0.0  ;;  %v83_v11 = vld [vmem:[%s6907_s1 + $0x38] sm:$0xff]  ;;  %v85_v12 = vld [vmem:[%s6907_s1 + $0x48] sm:$0xff]  ;;  %v122_v15 = vsel %vm116_vm0, %v3645_v7, 0.0  ;;  %v202_v25 = vmul.f32 %v3630_v4, %v3630_v4  ;;  %v205_v34 = vmul.f32 %v3645_v7, %v3645_v7 }
   0x4   :  { %574 = vperm.xlu2 %3450, %v86_v3   ;;  %v120_v10 = vsel %vm116_vm0, %v3640_v6, 0.0  ;;  %v40_v13 = vld [vmem:[%s6908_s0 + $0x20] sm:$0xff]  ;;  %v119_v14 = vadd.f32 %v118_v9, %v117_v8  ;;  %v41_v16 = vld [vmem:[%s6908_s0 + $0x28] sm:$0xff]  ;;  %v87_v18 = vld [vmem:[%s6907_s1 + $0x58] sm:$0xff]  ;;  %v204_v28 = vmul.f32 %v3640_v6, %v3640_v6  ;;  %v243_v42 = vsel %vm116_vm0, %v203_v27, 0.0 }
   0x5   :  { %v124_v19 = vsel %vm116_vm0, %v40_v13, 0.0  ;;  %v3674_v20 = vld [vmem:[%s6908_s0 + $0x30] sm:$0xff]  ;;  %v126_v22 = vsel %vm116_vm0, %v41_v16, 0.0  ;;  %v3680_v23 = vld [vmem:[%s6908_s0 + $0x38] sm:$0xff]  ;;  %v88_v29 = vld [vmem:[%s6907_s1 + $0x60] sm:$0xff]  ;;  %v242_v37 = vsel %vm116_vm0, %v202_v25, 0.0  ;;  %v206_v41 = vmul.f32 %v40_v13, %v40_v13 }
   0x6   :  { %v121_v17 = vadd.f32 %v120_v10, %v119_v14  ;;  %v128_v26 = vsel %vm116_vm0, %v3674_v20, 0.0  ;;  %v89_v30 = vld [vmem:[%s6907_s1 + $0x68] sm:$0xff]  ;;  %v3699_v31 = vld [vmem:[%s6908_s0 + $0x40] sm:$0xff]  ;;  %v130_v33 = vsel %vm116_vm0, %v3680_v23, 0.0  ;;  %v245_v43 = vsel %vm116_vm0, %v204_v28, 0.0  ;;  %v46_v44 = vld [vmem:[%s6908_s0 + $0x50] sm:$0xff] }
   0x7   :  { %v3708_v35 = vld [vmem:[%s6908_s0 + $0x48] sm:$0xff]  ;;  %v327_v39 = vld [vmem:[%s6909_s4] sm:$0xff]  ;;  %v132_v40 = vsel %vm116_vm0, %v3699_v31, 0.0  ;;  %v244_v46 = vadd.f32 %v243_v42, %v242_v37  ;;  %v207_v48 = vmul.f32 %v41_v16, %v41_v16  ;;  %v247_v49 = vsel %vm116_vm0, %v205_v34, 0.0  ;;  %v3730_v50 = vld [vmem:[%s6908_s0 + $0x58] sm:$0xff] }
   0x8   :  { %v123_v21 = vadd.f32 %v122_v15, %v121_v17  ;;  %v328_v38 = vld [vmem:[%s6909_s4 + $0x8] sm:$0xff]  ;;  %v134_v47 = vsel %vm116_vm0, %v3708_v35, 0.0  ;;  %6989 = vst [vmem:[#allocation2_spill] sm:$0xff] %v3730_v50  ;;  %v136_v53 = vsel %vm116_vm0, %v46_v44, 0.0  ;;  %v208_v54 = vmul.f32 %v3674_v20, %v3674_v20  ;;  %v91_v56 = vld [vmem:[%s6907_s1 + $0x78] sm:$0xff]  ;;  %v92_v57 = vld [vmem:[%s6907_s1 + $0x80] sm:$0xff] }
   0x9   :  { %346 = vmatpush.msra.mxu0 %v328_v38  ;;  %v246_v52 = vadd.f32 %v245_v43, %v244_v46  ;;  %v249_v55 = vsel %vm116_vm0, %v206_v41, 0.0  ;;  %v48_v58 = vld [vmem:[%s6908_s0 + $0x60] sm:$0xff]  ;;  %v138_v61 = vsel %vm116_vm0, %v3730_v50, 0.0  ;;  %v209_v62 = vmul.f32 %v3680_v23, %v3680_v23  ;;  %v49_v0 = vld [vmem:[%s6908_s0 + $0x68] sm:$0xff]  ;;  %v3760_v10 = vld [vmem:[%s6908_s0 + $0x70] sm:$0xff] }
   0xa   :  { %559 = vperm.xlu0 %3448, %v83_v11   ;;  %569 = vperm.xlu1 %3449, %v85_v12   ;;  %v125_v24 = vadd.f32 %v124_v19, %v123_v21  ;;  %v251_v63 = vsel %vm116_vm0, %v207_v48, 0.0  ;;  %v140_v3 = vsel %vm116_vm0, %v48_v58, 0.0  ;;  %v210_v8 = vmul.f32 %v3699_v31, %v3699_v31  ;;  %v3769_v16 = vld [vmem:[%s6908_s0 + $0x78] sm:$0xff] }
   0xb   :  { %347 = vmatpush.msra.mxu0 %v327_v39  ;;  %v248_v60 = vadd.f32 %v247_v49, %v246_v52  ;;  %v253_v9 = vsel %vm116_vm0, %v208_v54, 0.0  ;;  %v142_v13 = vsel %vm116_vm0, %v49_v0, 0.0  ;;  %v211_v14 = vmul.f32 %v3708_v35, %v3708_v35  ;;  %v95_v25 = vld [vmem:[%s6907_s1 + $0x98] sm:$0xff]  ;;  %v3822_v54 = vld [vmem:[%s6908_s0 + $0xa0] sm:$0xff] }
   0xc   :  { %579 = vperm.xlu2 %3450, %v87_v18   ;;  %v127_v32 = vadd.f32 %v126_v22, %v125_v24  ;;  %v255_v15 = vsel %vm116_vm0, %v209_v62, 0.0  ;;  %v144_v19 = vsel %vm116_vm0, %v3760_v10, 0.0  ;;  %v212_v21 = vmul.f32 %v46_v44, %v46_v44  ;;  %v94_v24 = vld [vmem:[%s6907_s1 + $0x90] sm:$0xff]  ;;  %v3809_v46 = vld [vmem:[%s6908_s0 + $0x98] sm:$0xff] }
   0xd   :  { %370 = vmatpush.msrb.mxu0 %v328_v38  ;;  %v250_v2 = vadd.f32 %v249_v55, %v248_v60  ;;  %v257_v22 = vsel %vm116_vm0, %v210_v8, 0.0  ;;  %v214_v38 = vmul.f32 %v48_v58, %v48_v58  ;;  %v215_v44 = vmul.f32 %v49_v0, %v49_v0  ;;  %v3832_v60 = vld [vmem:[%s6908_s0 + $0xa8] sm:$0xff] }
   0xe   :  { %v129_v36 = vadd.f32 %v128_v26, %v127_v32  ;;  %v3783_v26 = vld [vmem:[%s6908_s0 + $0x80] sm:$0xff]  ;;  %v259_v32 = vsel %vm116_vm0, %v211_v14, 0.0  ;;  %v217_v58 = vmul.f32 %v3769_v16, %v3769_v16 }
   0xf   :  { %371 = vmatpush.msrb.mxu0 %v327_v39  ;;  %v252_v12 = vadd.f32 %v251_v63, %v250_v2  ;;  %v148_v37 = vsel %vm116_vm0, %v3783_v26, 0.0  ;;  %v261_v39 = vsel %vm116_vm0, %v212_v21, 0.0  ;;  %v265_v52 = vsel %vm116_vm0, %v214_v38, 0.0  ;;  %v3842_v2 = vld [vmem:[%s6908_s0 + $0xb0] sm:$0xff]  ;;  %v100_v21 = vld [vmem:[%s6907_s1 + $0xc0] sm:$0xff] }
  0x10   :  { %v131_v45 = vadd.f32 %v130_v33, %v129_v36  ;;  %v3793_v33 = vld [vmem:[%s6908_s0 + $0x88] sm:$0xff]  ;;  %v156_v63 = vsel %vm116_vm0, %v3822_v54, 0.0  ;;  %v218_v0 = vmul.f32 %v3783_v26, %v3783_v26 }
  0x11   :  { %v254_v18 = vadd.f32 %v253_v9, %v252_v12  ;;  %v150_v43 = vsel %vm116_vm0, %v3793_v33, 0.0  ;;  %v158_v9 = vsel %vm116_vm0, %v3832_v60, 0.0  ;;  %v271_v12 = vsel %vm116_vm0, %v217_v58, 0.0 }
  0x12   :  { %584 = vperm.xlu0 %3448, %v88_v29   ;;  %589 = vperm.xlu1 %3449, %v89_v30   ;;  %v133_v51 = vadd.f32 %v132_v40, %v131_v45  ;;  %v146_v29 = vsel %vm116_vm0, %v3769_v16, 0.0  ;;  %v213_v30 = vmul.f32 %v3730_v50, %v3730_v50  ;;  %v3801_v40 = vld [vmem:[%s6908_s0 + $0x90] sm:$0xff] }
  0x13   :  { %v256_v28 = vadd.f32 %v255_v15, %v254_v18  ;;  %v152_v49 = vsel %vm116_vm0, %v3801_v40, 0.0  ;;  %v220_v18 = vmul.f32 %v3801_v40, %v3801_v40 }
  0x14   :  { %v135_v59 = vadd.f32 %v134_v47, %v133_v51  ;;  %v263_v45 = vsel %vm116_vm0, %v213_v30, 0.0  ;;  %v216_v51 = vmul.f32 %v3760_v10, %v3760_v10  ;;  %v3875_v30 = vld [vmem:[%s6908_s0 + $0xc8] sm:$0xff] }
  0x15   :  { %v258_v36 = vadd.f32 %v257_v22, %v256_v28  ;;  %v3865_v22 = vld [vmem:[%s6908_s0 + $0xc0] sm:$0xff]  ;;  %v221_v28 = vmul.f32 %v3809_v46, %v3809_v46  ;;  %v277_v38 = vsel %vm116_vm0, %v220_v18, 0.0  ;;  %v3935_v18 = vld [vmem:[%s6908_s0 + $0xf8] sm:$0xff] }
  0x16   :  { %v137_v1 = vadd.f32 %v136_v53, %v135_v59  ;;  %v97_v53 = vld [vmem:[%s6907_s1 + $0xa8] sm:$0xff]  ;;  %v267_v59 = vsel %vm116_vm0, %v215_v44, 0.0  ;;  %v223_v44 = vmul.f32 %v3832_v60, %v3832_v60 }
  0x17   :  { %v260_v42 = vadd.f32 %v259_v32, %v258_v36  ;;  %v164_v36 = vsel %vm116_vm0, %v3865_v22, 0.0 }
  0x18   :  { %v139_v11 = vadd.f32 %v138_v61, %v137_v1  ;;  %v269_v1 = vsel %vm116_vm0, %v216_v51, 0.0 }
  0x19   :  { %v262_v48 = vadd.f32 %v261_v39, %v260_v42  ;;  %v3885_v39 = vld [vmem:[%s6908_s0 + $0xd0] sm:$0xff] }
  0x1a   :  { %599 = vperm.xlu0 %3448, %v91_v56   ;;  %604 = vperm.xlu1 %3449, %v92_v57   ;;  %v141_v17 = vadd.f32 %v140_v3, %v139_v11  ;;  %v154_v57 = vsel %vm116_vm0, %v3809_v46, 0.0  ;;  %v219_v11 = vmul.f32 %v3793_v33, %v3793_v33  ;;  %v168_v51 = vsel %vm116_vm0, %v3885_v39, 0.0 }
  0x1b   :  { %v264_v56 = vadd.f32 %v263_v45, %v262_v48  ;;  %v279_v45 = vsel %vm116_vm0, %v221_v28, 0.0  ;;  %v3945_v28 = vld [vmem:[%s6908_s0 + $0x100] sm:$0xff] }
  0x1c   :  { %v143_v27 = vadd.f32 %v142_v13, %v141_v17  ;;  %v3852_v13 = vld [vmem:[%s6908_s0 + $0xb8] sm:$0xff]  ;;  %v160_v17 = vsel %vm116_vm0, %v3842_v2, 0.0 }
  0x1d   :  { %v266_v62 = vadd.f32 %v265_v52, %v264_v56  ;;  %v224_v52 = vmul.f32 %v3842_v2, %v3842_v2 }
  0x1e   :  { %v145_v34 = vadd.f32 %v144_v19, %v143_v27  ;;  %v273_v19 = vsel %vm116_vm0, %v218_v0, 0.0  ;;  %v162_v27 = vsel %vm116_vm0, %v3852_v13, 0.0 }
  0x1f   :  { %v268_v8 = vadd.f32 %v267_v59, %v266_v62  ;;  %v225_v59 = vmul.f32 %v3852_v13, %v3852_v13  ;;  %v3915_v62 = vld [vmem:[%s6908_s0 + $0xe8] sm:$0xff] }
  0x20   :  { %v147_v41 = vadd.f32 %v146_v29, %v145_v34  ;;  %v275_v29 = vsel %vm116_vm0, %v219_v11, 0.0 }
  0x21   :  { %v270_v15 = vadd.f32 %v269_v1, %v268_v8  ;;  %v285_v8 = vsel %vm116_vm0, %v224_v52, 0.0  ;;  %v3974_v52 = vld [vmem:[%s6908_s0 + $0x110] sm:$0xff] }
  0x22   :  { %614 = vperm.xlu0 %3448, %v94_v24   ;;  %619 = vperm.xlu1 %3449, %v95_v25   ;;  %v149_v47 = vadd.f32 %v148_v37, %v147_v41  ;;  %v222_v37 = vmul.f32 %v3822_v54, %v3822_v54  ;;  %6990 = vst [vmem:[#allocation3_spill] sm:$0xff] %v3974_v52 }
  0x23   :  { %v272_v25 = vadd.f32 %v271_v12, %v270_v15  ;;  %v227_v15 = vmul.f32 %v3875_v30, %v3875_v30 }
  0x24   :  { %v151_v55 = vadd.f32 %v150_v43, %v149_v47  ;;  %v166_v43 = vsel %vm116_vm0, %v3875_v30, 0.0  ;;  %v3895_v47 = vld [vmem:[%s6908_s0 + $0xd8] sm:$0xff] }
  0x25   :  { %v274_v34 = vadd.f32 %v273_v19, %v272_v25  ;;  %v170_v58 = vsel %vm116_vm0, %v3895_v47, 0.0  ;;  %v228_v25 = vmul.f32 %v3885_v39, %v3885_v39 }
  0x26   :  { %v153_v61 = vadd.f32 %v152_v49, %v151_v55  ;;  %v3905_v55 = vld [vmem:[%s6908_s0 + $0xe0] sm:$0xff] }
  0x27   :  { %v276_v42 = vadd.f32 %v275_v29, %v274_v34  ;;  %v172_v1 = vsel %vm116_vm0, %v3905_v55, 0.0  ;;  %v3950_v34 = vld [vmem:[%s6908_s0 + $0x108] sm:$0xff] }
  0x28   :  { %v155_v3 = vadd.f32 %v154_v57, %v153_v61  ;;  %v283_v61 = vsel %vm116_vm0, %v223_v44, 0.0  ;;  %v103_v44 = vld [vmem:[%s6907_s1 + $0xd8] sm:$0xff] }
  0x29   :  { %v278_v49 = vadd.f32 %v277_v38, %v276_v42  ;;  %v291_v38 = vsel %vm116_vm0, %v227_v15, 0.0  ;;  %v90_v42 = vld [vmem:[%s6907_s1 + $0x70] sm:$0xff] }
  0x2a   :  { %629 = vperm.xlu0 %3448, %v97_v53   ;;  %v157_v14 = vadd.f32 %v156_v63, %v155_v3  ;;  %v281_v53 = vsel %vm116_vm0, %v222_v37, 0.0  ;;  %v226_v3 = vmul.f32 %v3865_v22, %v3865_v22  ;;  %v229_v37 = vmul.f32 %v3895_v47, %v3895_v47  ;;  %594 = vperm.xlu2 %3450, %v90_v42  }
  0x2b   :  { %v280_v57 = vadd.f32 %v279_v45, %v278_v49  ;;  %v230_v49 = vmul.f32 %v3905_v55, %v3905_v55 }
  0x2c   :  { %v159_v24 = vadd.f32 %v158_v9, %v157_v14  ;;  %v3925_v9 = vld [vmem:[%s6908_s0 + $0xf0] sm:$0xff]  ;;  %v174_v14 = vsel %vm116_vm0, %v3915_v62, 0.0 }
  0x2d   :  { %v282_v0 = vadd.f32 %v281_v53, %v280_v57  ;;  %v182_v57 = vsel %vm116_vm0, %v3950_v34, 0.0 }
  0x2e   :  { %v161_v32 = vadd.f32 %v160_v17, %v159_v24  ;;  %v287_v17 = vsel %vm116_vm0, %v225_v59, 0.0  ;;  %v176_v24 = vsel %vm116_vm0, %v3925_v9, 0.0  ;;  %v295_v59 = vsel %vm116_vm0, %v229_v37, 0.0 }
  0x2f   :  { %v284_v12 = vadd.f32 %v283_v61, %v282_v0  ;;  %v3984_v61 = vld [vmem:[%s6908_s0 + $0x118] sm:$0xff] }
  0x30   :  { %v163_v41 = vadd.f32 %v162_v27, %v161_v32  ;;  %v289_v27 = vsel %vm116_vm0, %v226_v3, 0.0  ;;  %6991 = vst [vmem:[#allocation4_spill] sm:$0xff] %v3984_v61  ;;  %v232_v3 = vmul.f32 %v3925_v9, %v3925_v9  ;;  %v186_v15 = vsel %vm116_vm0, %v3984_v61, 0.0 }
  0x32   :  { %644 = vperm.xlu0 %3448, %v100_v21   ;;  %v165_v48 = vadd.f32 %v164_v36, %v163_v41  ;;  %v286_v21 = vadd.f32 %v285_v8, %v284_v12  ;;  %v178_v36 = vsel %vm116_vm0, %v3935_v18, 0.0  ;;  %v297_v8 = vsel %vm116_vm0, %v230_v49, 0.0  ;;  %v93_v49 = vld [vmem:[%s6907_s1 + $0x88] sm:$0xff] }
  0x33   :  { %609 = vperm.xlu2 %3450, %v93_v49  }
  0x34   :  { %v167_v56 = vadd.f32 %v166_v43, %v165_v48  ;;  %v288_v32 = vadd.f32 %v287_v17, %v286_v21  ;;  %v98_v43 = vld [vmem:[%s6907_s1 + $0xb0] sm:$0xff]  ;;  %v180_v48 = vsel %vm116_vm0, %v3945_v28, 0.0  ;;  %v233_v17 = vmul.f32 %v3935_v18, %v3935_v18  ;;  %v4004_v21 = vld [vmem:[%s6908_s0 + $0x128] sm:$0xff] }
  0x35   :  { %634 = vperm.xlu1 %3449, %v98_v43   ;;  %6992 = vst [vmem:[#allocation5_spill] sm:$0xff] %v4004_v21  ;;  %v190_v42 = vsel %vm116_vm0, %v4004_v21, 0.0  ;;  %v235_v43 = vmul.f32 %v3950_v34, %v3950_v34 }
  0x36   :  { %v169_v63 = vadd.f32 %v168_v51, %v167_v56  ;;  %v290_v45 = vadd.f32 %v289_v27, %v288_v32  ;;  %v293_v51 = vsel %vm116_vm0, %v228_v25, 0.0  ;;  %v301_v32 = vsel %vm116_vm0, %v232_v3, 0.0 }
  0x37   :  { %v307_v3 = vsel %vm116_vm0, %v235_v43, 0.0 }
  0x38   :  { %v171_v11 = vadd.f32 %v170_v58, %v169_v63  ;;  %v292_v56 = vadd.f32 %v291_v38, %v290_v45  ;;  %v231_v58 = vmul.f32 %v3915_v62, %v3915_v62 }
  0x3a   :  { %v173_v19 = vadd.f32 %v172_v1, %v171_v11  ;;  %659 = vperm.xlu0 %3448, %v103_v44   ;;  %v294_v0 = vadd.f32 %v293_v51, %v292_v56  ;;  %v184_v1 = vsel %vm116_vm0, %v3974_v52, 0.0  ;;  %v3994_v11 = vld [vmem:[%s6908_s0 + $0x120] sm:$0xff]  ;;  %v303_v44 = vsel %vm116_vm0, %v233_v17, 0.0  ;;  %v101_v51 = vld [vmem:[%s6907_s1 + $0xc8] sm:$0xff] }
  0x3b   :  { %v188_v27 = vsel %vm116_vm0, %v3994_v11, 0.0 }
  0x3c   :  { %v175_v29 = vadd.f32 %v174_v14, %v173_v19  ;;  %v296_v14 = vadd.f32 %v295_v59, %v294_v0  ;;  %v299_v19 = vsel %vm116_vm0, %v231_v58, 0.0 }
  0x3d   :  { %649 = vperm.xlu1 %3449, %v101_v51  }
  0x3e   :  { %v177_v41 = vadd.f32 %v176_v24, %v175_v29  ;;  %v298_v25 = vadd.f32 %v297_v8, %v296_v14  ;;  %v234_v29 = vmul.f32 %v3945_v28, %v3945_v28  ;;  %v238_v14 = vmul.f32 %v3994_v11, %v3994_v11 }
  0x40   :  { %v179_v53 = vadd.f32 %v178_v36, %v177_v41  ;;  %v4014_v36 = vld [vmem:[%s6908_s0 + $0x130] sm:$0xff]  ;;  %v300_v38 = vadd.f32 %v299_v19, %v298_v25  ;;  %v4019_v41 = vld [vmem:[%s6908_s0 + $0x138] sm:$0xff]  ;;  %v305_v58 = vsel %vm116_vm0, %v234_v29, 0.0  ;;  %v76_v25 = vld [vmem:[%s6907_s1] sm:$0xff]  ;;  %v313_v43 = vsel %vm116_vm0, %v238_v14, 0.0 }
  0x41   :  { %6993 = vst [vmem:[#allocation6_spill] sm:$0xff] %v4014_v36  ;;  %v192_v56 = vsel %vm116_vm0, %v4014_v36, 0.0  ;;  %v194_v0 = vsel %vm116_vm0, %v4019_v41, 0.0 }
  0x42   :  { %v181_v63 = vadd.f32 %v180_v48, %v179_v53  ;;  %6994 = vst [vmem:[#allocation7_spill] sm:$0xff] %v4019_v41  ;;  %v302_v48 = vadd.f32 %v301_v32, %v300_v38  ;;  %v104_v53 = vld [vmem:[%s6907_s1 + $0xe0] sm:$0xff]  ;;  %v79_v32 = vld [vmem:[%s6907_s1 + $0x18] sm:$0xff] }
  0x43   :  { %664 = vperm.xlu0 %3448, %v104_v53  }
  0x44   :  { %v183_v12 = vadd.f32 %v182_v57, %v181_v63  ;;  %v236_v57 = vmul.f32 %v3974_v52, %v3974_v52  ;;  %v304_v63 = vadd.f32 %v303_v44, %v302_v48  ;;  %v241_v48 = vmul.f32 %v4019_v41, %v4019_v41 }
  0x45   :  { %524 = vperm.xlu1 %3449, %v76_v25   ;;  %v109_v25 = vld [vmem:[%s6907_s1 + $0x108] sm:$0xff] }
  0x46   :  { %v185_v24 = vadd.f32 %v184_v1, %v183_v12  ;;  %v237_v1 = vmul.f32 %v3984_v61, %v3984_v61  ;;  %v306_v12 = vadd.f32 %v305_v58, %v304_v63  ;;  %v105_v63 = vld [vmem:[%s6907_s1 + $0xe8] sm:$0xff] }
  0x48   :  { %v187_v37 = vadd.f32 %v186_v15, %v185_v24  ;;  %v309_v15 = vsel %vm116_vm0, %v236_v57, 0.0  ;;  %v308_v19 = vadd.f32 %v307_v3, %v306_v12  ;;  %v96_v24 = vld [vmem:[%s6907_s1 + $0xa0] sm:$0xff]  ;;  %v311_v29 = vsel %vm116_vm0, %v237_v1, 0.0 }
  0x49   :  { %624 = vperm.xlu2 %3450, %v96_v24   ;;  %v80_v1 = vld [vmem:[%s6907_s1 + $0x20] sm:$0xff]  ;;  %v106_v24 = vld [vmem:[%s6907_s1 + $0xf0] sm:$0xff] }
  0x4a   :  { %v189_v45 = vadd.f32 %v188_v27, %v187_v37  ;;  %v239_v27 = vmul.f32 %v4004_v21, %v4004_v21  ;;  %v310_v38 = vadd.f32 %v309_v15, %v308_v19  ;;  %v102_v19 = vld [vmem:[%s6907_s1 + $0xd0] sm:$0xff] }
  0x4b   :  { %539 = vperm.xlu0 %3448, %v79_v32  }
  0x4c   :  { %v191_v59 = vadd.f32 %v190_v42, %v189_v45  ;;  %v240_v42 = vmul.f32 %v4014_v36, %v4014_v36  ;;  %v312_v45 = vadd.f32 %v311_v29, %v310_v38  ;;  %v315_v49 = vsel %vm116_vm0, %v239_v27, 0.0  ;;  %v77_v38 = vld [vmem:[%s6907_s1 + $0x8] sm:$0xff] }
  0x4d   :  { %669 = vperm.xlu1 %3449, %v105_v63  }
  0x4e   :  { %v193_v8 = vadd.f32 %v192_v56, %v191_v59  ;;  %v314_v53 = vadd.f32 %v313_v43, %v312_v45  ;;  %v317_v56 = vsel %vm116_vm0, %v240_v42, 0.0  ;;  %v99_v59 = vld [vmem:[%s6907_s1 + $0xb8] sm:$0xff]  ;;  %v81_v42 = vld [vmem:[%s6907_s1 + $0x28] sm:$0xff]  ;;  %v112_v43 = vld [vmem:[%s6907_s1 + $0x120] sm:$0xff] }
  0x4f   :  { %v110_v45 = vld [vmem:[%s6907_s1 + $0x110] sm:$0xff] }
  0x50   :  { %v195_v17 = vadd.f32 %v194_v0, %v193_v8  ;;  %v316_v58 = vadd.f32 %v315_v49, %v314_v53  ;;  %v319_v0 = vsel %vm116_vm0, %v241_v48, 0.0  ;;  %v115_v48 = vld [vmem:[%s6907_s1 + $0x138] sm:$0xff]  ;;  %v108_v53 = vld [vmem:[%s6907_s1 + $0x100] sm:$0xff] }
  0x51   :  { %639 = vperm.xlu2 %3450, %v99_v59   ;;  %v107_v49 = vld [vmem:[%s6907_s1 + $0xf8] sm:$0xff] }
  0x52   :  { %v196_v37 = vrot.slane %v195_v17, 4  ;;  %v318_v8 = vadd.f32 %v317_v56, %v316_v58  ;;  %v111_v56 = vld [vmem:[%s6907_s1 + $0x118] sm:$0xff] }
  0x53   :  { %544 = vperm.xlu0 %3448, %v80_v1  }
  0x54   :  { %v197_v44 = vadd.f32 %v196_v37, %v195_v17  ;;  %v320_v14 = vadd.f32 %v319_v0, %v318_v8 }
  0x55   :  { %674 = vperm.xlu1 %3449, %v106_v24  }
  0x56   :  { %v198_v51 = vrot.slane %v197_v44, 2  ;;  %v321_v15 = vrot.slane %v320_v14, 4 }
  0x58   :  { %v199_v57 = vadd.f32 %v198_v51, %v197_v44  ;;  %v322_v17 = vadd.f32 %v321_v15, %v320_v14  ;;  %v78_v44 = vld [vmem:[%s6907_s1 + $0x10] sm:$0xff]  ;;  %v113_v51 = vld [vmem:[%s6907_s1 + $0x128] sm:$0xff] }
  0x59   :  { %654 = vperm.xlu2 %3450, %v102_v19  }
  0x5a   :  { %v200_v3 = vrot.slane %v199_v57, 1  ;;  %v323_v27 = vrot.slane %v322_v17, 2 }
  0x5b   :  { %689 = vperm.xlu0 %3448, %v109_v25  }
  0x5c   :  { %v201_v12 = vadd.f32 %v200_v3, %v199_v57  ;;  %v324_v29 = vadd.f32 %v323_v27, %v322_v17  ;;  %v114_v57 = vld [vmem:[%s6907_s1 + $0x130] sm:$0xff] }
  0x5d   :  { %549 = vperm.xlu1 %3449, %v81_v42  }
  0x5e   :  { %3115 = vmatmul.msk.f32.vlgmr.msra.gmra.mxu0 %vm116_vm0, %v201_v12  ;;  %v325_v32 = vrot.slane %v324_v29, 1  ;;  %v4125_v63 = vpop.permute.xlu2 %574 }
  0x5f   :  { %6997 = vst [vmem:[#allocation10_spill] sm:$0xff] %v4125_v63 }
  0x60   :  { %v326_v37 = vadd.f32 %v325_v32, %v324_v29 }
  0x61   :  { %529 = vperm.xlu2 %3450, %v77_v38  }
  0x63   :  { %704 = vperm.xlu0 %3448, %v112_v43  }
  0x65   :  { %694 = vperm.xlu1 %3449, %v110_v45  }
  0x66   :  { %3116 = vmatmul.msk.f32.vlgmr.msrb.gmra.mxu0 %vm116_vm0, %v326_v37  ;;  %v4131_v3 = vpop.permute.xlu2 %579 }
  0x67   :  { %7000 = vst [vmem:[#allocation13_spill] sm:$0xff] %v4131_v3 }
  0x69   :  { %534 = vperm.xlu2 %3450, %v78_v44  }
  0x6b   :  { %719 = vperm.xlu0 %3448, %v115_v48  }
  0x6d   :  { %709 = vperm.xlu1 %3449, %v113_v51  }
  0x71   :  { %679 = vperm.xlu2 %3450, %v107_v49  }
  0x74   :  { %v4121_v58 = vpop.permute.xlu0 %554  ;;  %v4127_v0 = vpop.permute.xlu1 %564 }
  0x75   :  { %6995 = vst [vmem:[#allocation8_spill] sm:$0xff] %v4121_v58 }
  0x76   :  { %6998 = vst [vmem:[#allocation11_spill] sm:$0xff] %v4127_v0 }
  0x79   :  { %684 = vperm.xlu2 %3450, %v108_v53  }
  0x7c   :  { %v4123_v59 = vpop.permute.xlu0 %559  ;;  %v4133_v8 = vpop.permute.xlu1 %569 }
  0x7d   :  { %6996 = vst [vmem:[#allocation9_spill] sm:$0xff] %v4123_v59 }
  0x7e   :  { %7001 = vst [vmem:[#allocation14_spill] sm:$0xff] %v4133_v8 }
  0x81   :  { %699 = vperm.xlu2 %3450, %v111_v56  }
  0x84   :  { %v4129_v1 = vpop.permute.xlu0 %584  ;;  %v4137_v14 = vpop.permute.xlu2 %594 }
  0x85   :  { %6999 = vst [vmem:[#allocation12_spill] sm:$0xff] %v4129_v1  ;;  %v4139_v15 = vpop.permute.xlu1 %589 }
  0x86   :  { %7002 = vst [vmem:[#allocation15_spill] sm:$0xff] %v4139_v15 }
  0x89   :  { %714 = vperm.xlu2 %3450, %v114_v57  }
  0x8c   :  { %v4135_v12 = vpop.permute.xlu0 %599 }
  0x8d   :  { %v4143_v19 = vpop.permute.xlu2 %609  ;;  %v4145_v24 = vpop.permute.xlu1 %604 }
  0x8e   :  { %7004 = vst [vmem:[#allocation17_spill] sm:$0xff] %v4143_v19 }
  0x8f   :  { %7005 = vst [vmem:[#allocation18_spill] sm:$0xff] %v4145_v24 }
  0x94   :  { %v4141_v17 = vpop.permute.xlu0 %614 }
  0x95   :  { %7003 = vst [vmem:[#allocation16_spill] sm:$0xff] %v4141_v17  ;;  %v4151_v32 = vpop.permute.xlu1 %619 }
  0x96   :  { %7008 = vst [vmem:[#allocation21_spill] sm:$0xff] %v4151_v32 }
  0x9c   :  { %v4147_v27 = vpop.permute.xlu0 %629 }
  0x9d   :  { %7006 = vst [vmem:[#allocation19_spill] sm:$0xff] %v4147_v27 }
  0xa3   :  { %v4149_v29 = vpop.permute.xlu2 %624 }
  0xa4   :  { %7007 = vst [vmem:[#allocation20_spill] sm:$0xff] %v4149_v29  ;;  %v4153_v45 = vpop.permute.xlu0 %644 }
  0xa5   :  { %7009 = vst [vmem:[#allocation22_spill] sm:$0xff] %v4153_v45 }
  0xa7   :  { %v4157_v51 = vpop.permute.xlu1 %634 }
  0xa8   :  { %7011 = vst [vmem:[#allocation24_spill] sm:$0xff] %v4157_v51 }
  0xab   :  { %v4155_v48 = vpop.permute.xlu2 %639 }
  0xac   :  { %7010 = vst [vmem:[#allocation23_spill] sm:$0xff] %v4155_v48  ;;  %v4159_v57 = vpop.permute.xlu0 %659 }
  0xad   :  { %7012 = vst [vmem:[#allocation25_spill] sm:$0xff] %v4159_v57 }
  0xaf   :  { %v4163_v1 = vpop.permute.xlu1 %649 }
  0xb0   :  { %7014 = vst [vmem:[#allocation27_spill] sm:$0xff] %v4163_v1 }
  0xb3   :  { %v4161_v15 = vpop.permute.xlu2 %654 }
  0xb4   :  { %7013 = vst [vmem:[#allocation26_spill] sm:$0xff] %v4161_v15 }
  0xb7   :  { %v4172_v50 = vpop.permute.xlu1 %524 }
  0xb8   :  { %7017 = vst [vmem:[#allocation30_spill] sm:$0xff] %v4172_v50 }
  0xbb   :  { %v4170_v63 = vpop.permute.xlu2 %529 }
  0xbc   :  { %7016 = vst [vmem:[#allocation29_spill] sm:$0xff] %v4170_v63 }
  0xdb   :  { %v349_v25 = vpop.f32.mrf.mxu0 }
  0xdc   :  { %v352_v37 = vmul.f32 0.001953125, %v349_v25 }
  0xde   :  { %v377_v42 = vmul.f32 %v352_v37, %v352_v37 }
  0xe3   :  { %v373_v38 = vpop.f32.mrf.mxu0 }
  0xe4   :  { %v376_v43 = vmul.f32 0.001953125, %v373_v38 }
  0xe6   :  { %v378_v44 = vsub.f32 %v376_v43, %v377_v42  ;;  %v380_v43 = vld [vmem:[%s6910_s2] sm:$0x1] }
  0xe8   :  { %v379_v49 = vmax.f32 %v378_v44, 0.0 }
  0xea   :  { %v381_v53 = vadd.f32 1e-05, %v379_v49  ;;  %v4168_v49 = vpop.permute.xlu0 %664 }
  0xeb   :  { %7015 = vst [vmem:[#allocation28_spill] sm:$0xff] %v4168_v49 }
  0xec   :  { %3551 = vrsqrt.f32 %v381_v53  ;;  %vm388_vm2 = vweird.f32 %v381_v53 }
  0xf2   :  { %v3552_v56 = vpop.eup %3551  ;;  %v4179_v36 = vpop.permute.xlu0 %539 }
  0xf3   :  { %v383_v25 = vmul.f32 %v3552_v56, %v381_v53  ;;  %vm389_vm1 = vweird.f32 %v3552_v56  ;;  %7018 = vst [vmem:[#allocation31_spill] sm:$0xff] %v4179_v36  ;;  %v4181_v53 = vpop.permute.xlu2 %534 }
  0xf4   :  { %vm390_vm3 = vmor %vm388_vm2, %vm389_vm1  ;;  %7019 = vst [vmem:[#allocation32_spill] sm:$0xff] %v4181_v53 }
  0xf5   :  { %v384_v3 = vmul.f32 %v3552_v56, %v383_v25 }
  0xf7   :  { %v385_v38 = vmul.f32 0.5, %v384_v3  ;;  %v393_v3 = vld [vmem:[%s6911_s3] sm:$0x1] }
  0xf9   :  { %v386_v42 = vsub.f32 1.5, %v385_v38 }
  0xfb   :  { %v387_v44 = vmul.f32 %v3552_v56, %v386_v42  ;;  %v4183_v42 = vpop.permute.xlu1 %669 }
  0xfc   :  { %7020 = vst [vmem:[#allocation33_spill] sm:$0xff] %v4183_v42 }
  0xfd   :  { %v391_v8 = vsel %vm390_vm3, %v3552_v56, %v387_v44 }
  0xfe   :  { %v392_v0 = vmul.f32 %v391_v8, %v380_v43 }
 0x100   :  { %v394_v21 = vmul.f32 %v392_v0, %v352_v37  ;;  %v4177_v38 = vperm.slane %v392_v0, 0 }
 0x102   :  { %v395_v25 = vsub.f32 %v393_v3, %v394_v21  ;;  %v399_v56 = vmul.f32 %v4177_v38, %v3630_v4  ;;  %v400_v8 = vmul.f32 %v4177_v38, %v3635_v5  ;;  %v413_v37 = vmul.f32 %v4177_v38, %v3760_v10 }
 0x103   :  { %v414_v21 = vmul.f32 %v4177_v38, %v3769_v16  ;;  %v415_v0 = vmul.f32 %v4177_v38, %v3783_v26  ;;  %v416_v43 = vmul.f32 %v4177_v38, %v3793_v33  ;;  %v417_v44 = vmul.f32 %v4177_v38, %v3801_v40  ;;  %v4271_v36 = vpop.permute.xlu1 %674 }
 0x104   :  { %v4185_v52 = vperm.slane %v395_v25, 0  ;;  %v418_v4 = vmul.f32 %v4177_v38, %v3809_v46  ;;  %v419_v5 = vmul.f32 %v4177_v38, %v3822_v54  ;;  %v420_v10 = vmul.f32 %v4177_v38, %v3832_v60  ;;  %7023 = vst [vmem:[#allocation36_spill] sm:$0xff] %v4271_v36 }
 0x105   :  { %v421_v16 = vmul.f32 %v4177_v38, %v3842_v2  ;;  %v422_v26 = vmul.f32 %v4177_v38, %v3852_v13  ;;  %v423_v33 = vmul.f32 %v4177_v38, %v3865_v22  ;;  %v424_v40 = vmul.f32 %v4177_v38, %v3875_v30 }
 0x106   :  { %v425_v46 = vmul.f32 %v4177_v38, %v3885_v39  ;;  %v426_v54 = vmul.f32 %v4177_v38, %v3895_v47  ;;  %v456_v60 = vadd.f32 %v4185_v52, %v413_v37  ;;  %v4221_v3 = vadd.f32 %v4185_v52, %v414_v21 }
 0x107   :  { %v4224_v2 = vadd.f32 %v4185_v52, %v415_v0  ;;  %v427_v13 = vmul.f32 %v4177_v38, %v3905_v55  ;;  %v4229_v22 = vadd.f32 %v4185_v52, %v416_v43  ;;  %v4232_v30 = vadd.f32 %v4185_v52, %v417_v44 }
 0x108   :  { %v4235_v39 = vadd.f32 %v4185_v52, %v418_v4  ;;  %v4238_v47 = vadd.f32 %v4185_v52, %v419_v5  ;;  %v4241_v25 = vadd.f32 %v4185_v52, %v420_v10  ;;  %v4244_v37 = vadd.f32 %v4185_v52, %v421_v16  ;;  %v4262_v5 = vpop.permute.xlu0 %544 }
 0x109   :  { %v4247_v55 = vadd.f32 %v4185_v52, %v422_v26  ;;  %v405_v21 = vmul.f32 %v4177_v38, %v3674_v20  ;;  %v4252_v0 = vadd.f32 %v4185_v52, %v423_v33  ;;  %v4255_v43 = vadd.f32 %v4185_v52, %v424_v40  ;;  %7021 = vst [vmem:[#allocation34_spill] sm:$0xff] %v4262_v5  ;;  %v4266_v26 = vpop.permute.xlu2 %679 }
 0x10a   :  { %v4258_v44 = vadd.f32 %v4185_v52, %v425_v46  ;;  %v406_v4 = vmul.f32 %v4177_v38, %v3680_v23  ;;  %v469_v10 = vadd.f32 %v4185_v52, %v426_v54  ;;  %v470_v16 = vadd.f32 %v4185_v52, %v427_v13  ;;  %7022 = vst [vmem:[#allocation35_spill] sm:$0xff] %v4266_v26  ;;  %v3395_v23 = vld [vmem:[%s6912_s5] sm:$0xff] }
 0x10b   :  { %v442_v20 = vadd.f32 %v4185_v52, %v399_v56  ;;  %v443_v33 = vadd.f32 %v4185_v52, %v400_v8  ;;  %v448_v40 = vadd.f32 %v4185_v52, %v405_v21  ;;  %v402_v54 = vmul.f32 %v4177_v38, %v3645_v7  ;;  %857 = vmatpush.bf16.msra.mxu0 %v3395_v23 }
 0x10c   :  { %v449_v46 = vadd.f32 %v4185_v52, %v406_v4  ;;  %v407_v13 = vmul.f32 %v4177_v38, %v3699_v31  ;;  %v4283_v56 = vmul.f32 %v4177_v38, %v3708_v35  ;;  %v401_v8 = vmul.f32 %v4177_v38, %v3640_v6  ;;  %3432 = vmatpush.bf16.msra.mxu2 %v3395_v23 }
 0x10d   :  { %v482_v21 = vmax.f32 %v442_v20, 0.0  ;;  %v483_v5 = vmax.f32 %v443_v33, 0.0  ;;  %v488_v4 = vmax.f32 %v448_v40, 0.0  ;;  %v496_v53 = vmax.f32 %v456_v60, 0.0 }
 0x10e   :  { %v489_v36 = vmax.f32 %v449_v46, 0.0  ;;  %v497_v26 = vmax.f32 %v4221_v3, 0.0  ;;  %v498_v7 = vmax.f32 %v4224_v2, 0.0  ;;  %v499_v31 = vmax.f32 %v4229_v22, 0.0 }
 0x10f   :  { %v500_v61 = vmax.f32 %v4232_v30, 0.0  ;;  %v501_v35 = vmax.f32 %v4235_v39, 0.0  ;;  %v502_v41 = vmax.f32 %v4238_v47, 0.0  ;;  %v503_v6 = vmax.f32 %v4241_v25, 0.0 }
 0x110   :  { %v504_v20 = vmax.f32 %v4244_v37, 0.0  ;;  %v510_v33 = vmax.f32 %v470_v16, 0.0  ;;  %v428_v60 = vmul.f32 %v4177_v38, %v3915_v62  ;;  %v505_v3 = vmax.f32 %v4247_v55, 0.0  ;;  %v4304_v37 = vpop.permute.xlu0 %689 }
 0x111   :  { %v506_v2 = vmax.f32 %v4252_v0, 0.0  ;;  %v507_v22 = vmax.f32 %v4255_v43, 0.0  ;;  %v508_v30 = vmax.f32 %v4258_v44, 0.0  ;;  %v509_v40 = vmax.f32 %v469_v10, 0.0  ;;  %7024 = vst [vmem:[#allocation37_spill] sm:$0xff] %v4304_v37  ;;  %v4306_v16 = vpop.permute.xlu2 %684  ;;  %v4316_v44 = vpop.permute.xlu1 %549 }
 0x112   :  { %v471_v39 = vadd.f32 %v4185_v52, %v428_v60  ;;  %v722_v47 = vmul.f32 %v4172_v50, %v482_v21  ;;  %v723_v25 = vmul.f32 %v4170_v63, %v483_v5  ;;  %7025 = vst [vmem:[#allocation38_spill] sm:$0xff] %v4306_v16  ;;  %v4309_v62 = vmul.f32 %v4168_v49, %v510_v33 }
 0x113   :  { %v728_v55 = vmul.f32 %v4121_v58, %v488_v4  ;;  %v729_v0 = vmul.f32 %v4123_v59, %v489_v36  ;;  %v4314_v43 = vmul.f32 %v4137_v14, %v496_v53  ;;  %7026 = vst [vmem:[#allocation39_spill] sm:$0xff] %v4316_v44  ;;  %v4319_v46 = vmul.f32 %v4135_v12, %v497_v26  ;;  %v7032_v59 = vld [vmem:[#allocation3_spill] sm:$0xff] }
 0x114   :  { %v511_v10 = vmax.f32 %v471_v39, 0.0  ;;  %v4322_v5 = vmul.f32 %v4145_v24, %v498_v7  ;;  %v4325_v23 = vmul.f32 %v4143_v19, %v499_v31  ;;  %v4328_v21 = vmul.f32 %v4141_v17, %v500_v61  ;;  %v7036_v19 = vld [vmem:[#allocation36_spill] sm:$0xff] }
 0x115   :  { %v4331_v36 = vmul.f32 %v4151_v32, %v501_v35  ;;  %v4334_v53 = vmul.f32 %v4149_v29, %v502_v41  ;;  %v4337_v4 = vmul.f32 %v4147_v27, %v503_v6  ;;  %v4343_v7 = vmul.f32 %v4157_v51, %v504_v20 }
 0x116   :  { %v4340_v26 = vmul.f32 %v4183_v42, %v511_v10  ;;  %v4346_v31 = vmul.f32 %v4155_v48, %v505_v3  ;;  %v4349_v61 = vmul.f32 %v4153_v45, %v506_v2  ;;  %v4352_v35 = vmul.f32 %v4163_v1, %v507_v22  ;;  %v7035_v48 = vld [vmem:[#allocation31_spill] sm:$0xff] }
 0x117   :  { %v4355_v41 = vmul.f32 %v4161_v15, %v508_v30  ;;  %v4358_v6 = vmul.f32 %v4159_v57, %v509_v40  ;;  %v432_v33 = vmul.f32 %v4177_v38, %v3950_v34  ;;  %v445_v20 = vadd.f32 %v4185_v52, %v402_v54 }
 0x118   :  { %v762_v3 = vpack.c.bf16 %v723_v25, %v722_v47  ;;  %v765_v2 = vpack.c.bf16 %v729_v0, %v728_v55  ;;  %v450_v39 = vadd.f32 %v4185_v52, %v407_v13  ;;  %v444_v22 = vadd.f32 %v4185_v52, %v401_v8  ;;  %v4390_v60 = vpop.permute.xlu0 %704 }
 0x119   :  { %v475_v30 = vadd.f32 %v4185_v52, %v432_v33  ;;  %v451_v13 = vadd.f32 %v4185_v52, %v4283_v56  ;;  %v430_v55 = vmul.f32 %v4177_v38, %v3935_v18  ;;  %v429_v33 = vmul.f32 %v4177_v38, %v3925_v9  ;;  %7027 = vst [vmem:[#allocation40_spill] sm:$0xff] %v4390_v60  ;;  %v4396_v8 = vpop.permute.xlu2 %699  ;;  %v7029_v18 = vld [vmem:[#allocation7_spill] sm:$0xff]  ;;  %v4403_v9 = vpop.permute.xlu1 %694 }
 0x11a   :  { %3121 = vmatmul.msk.bf16.vlgmr.msra.gmra.mxu0 %vm116_vm0, %v762_v3  ;;  %3124 = vmatmul.msk.bf16.vlgmr.msra.gmra.mxu2 %vm116_vm0, %v765_v2  ;;  %v435_v56 = vmul.f32 %v4177_v38, %v3994_v11  ;;  %v431_v3 = vmul.f32 %v4177_v38, %v3945_v28  ;;  %7028 = vst [vmem:[#allocation41_spill] sm:$0xff] %v4396_v8  ;;  %v485_v25 = vmax.f32 %v445_v20, 0.0  ;;  %v484_v34 = vmax.f32 %v444_v22, 0.0 }
 0x11b   :  { %v515_v0 = vmax.f32 %v475_v30, 0.0  ;;  %v473_v47 = vadd.f32 %v4185_v52, %v430_v55  ;;  %v438_v2 = vmul.f32 %v4177_v38, %v7029_v18  ;;  %v7030_v30 = vld [vmem:[#allocation4_spill] sm:$0xff]  ;;  %7031 = vst [vmem:[#allocation7_spill] sm:$0xff] %v4403_v9  ;;  %v472_v10 = vadd.f32 %v4185_v52, %v429_v33  ;;  %v7033_v33 = vld [vmem:[#allocation35_spill] sm:$0xff] }
 0x11c   :  { %v434_v54 = vmul.f32 %v4177_v38, %v7030_v30  ;;  %v478_v11 = vadd.f32 %v4185_v52, %v435_v56  ;;  %v474_v28 = vadd.f32 %v4185_v52, %v431_v3  ;;  %v433_v18 = vmul.f32 %v4177_v38, %v7032_v59  ;;  %v7034_v3 = vld [vmem:[#allocation32_spill] sm:$0xff] }
 0x11d   :  { %v513_v40 = vmax.f32 %v473_v47, 0.0  ;;  %v481_v20 = vadd.f32 %v4185_v52, %v438_v2  ;;  %v490_v42 = vmax.f32 %v450_v39, 0.0  ;;  %v4413_v30 = vmul.f32 %v4304_v37, %v515_v0 }
 0x11e   :  { %v477_v55 = vadd.f32 %v4185_v52, %v434_v54  ;;  %v512_v1 = vmax.f32 %v472_v10, 0.0  ;;  %v514_v22 = vmax.f32 %v474_v28, 0.0  ;;  %v491_v57 = vmax.f32 %v451_v13, 0.0 }
 0x11f   :  { %v4416_v50 = vmul.f32 %v7033_v33, %v513_v40  ;;  %v476_v47 = vadd.f32 %v4185_v52, %v433_v18  ;;  %v724_v2 = vmul.f32 %v7034_v3, %v484_v34  ;;  %v725_v54 = vmul.f32 %v7035_v48, %v485_v25  ;;  %v7037_v40 = vld [vmem:[#allocation6_spill] sm:$0xff]  ;;  %v7039_v18 = vld [vmem:[#allocation11_spill] sm:$0xff] }
 0x120   :  { %v517_v56 = vmax.f32 %v477_v55, 0.0  ;;  %v4422_v32 = vmul.f32 %v7036_v19, %v512_v1  ;;  %v4425_v59 = vmul.f32 %v4306_v16, %v514_v22  ;;  %v521_v39 = vmax.f32 %v481_v20, 0.0  ;;  %v7038_v1 = vld [vmem:[#allocation5_spill] sm:$0xff]  ;;  %v7040_v20 = vld [vmem:[#allocation14_spill] sm:$0xff] }
 0x121   :  { %v516_v13 = vmax.f32 %v476_v47, 0.0  ;;  %v437_v0 = vmul.f32 %v4177_v38, %v7037_v40  ;;  %v518_v34 = vmax.f32 %v478_v11, 0.0  ;;  %v436_v55 = vmul.f32 %v4177_v38, %v7038_v1  ;;  %v4444_v40 = vpop.permute.xlu0 %719  ;;  %v4454_v28 = vpop.permute.xlu1 %709 }
 0x122   :  { %v4428_v10 = vmul.f32 %v4396_v8, %v517_v56  ;;  %v730_v22 = vmul.f32 %v7039_v18, %v490_v42  ;;  %v731_v33 = vmul.f32 %v7040_v20, %v491_v57  ;;  %7041 = vst [vmem:[#allocation4_spill] sm:$0xff] %v4444_v40  ;;  %v4446_v8 = vpop.permute.xlu2 %714  ;;  %v4450_v25 = vmul.f32 %v4444_v40, %v521_v39  ;;  %v3555_v39 = vld [vmem:[%s6908_s0 + $0x20] sm:$0xff] }
 0x123   :  { %v4441_v56 = vmul.f32 %v4403_v9, %v516_v13  ;;  %v480_v47 = vadd.f32 %v4185_v52, %v437_v0  ;;  %7042 = vst [vmem:[#allocation3_spill] sm:$0xff] %v4446_v8  ;;  %v479_v11 = vadd.f32 %v4185_v52, %v436_v55  ;;  %v763_v57 = vpack.c.bf16 %v725_v54, %v724_v2 }
 0x124   :  { %7043 = vst [vmem:[#allocation6_spill] sm:$0xff] %v4454_v28  ;;  %v4457_v13 = vmul.f32 %v4390_v60, %v518_v34  ;;  %v766_v37 = vpack.c.bf16 %v731_v33, %v730_v22  ;;  %v403_v55 = vmul.f32 %v3555_v39, %v4177_v38  ;;  %v3557_v33 = vld [vmem:[%s6908_s0 + $0x50] sm:$0xff]  ;;  %v7044_v22 = vld [vmem:[#allocation2_spill] sm:$0xff] }
 0x125   :  { %v520_v42 = vmax.f32 %v480_v47, 0.0  ;;  %v519_v0 = vmax.f32 %v479_v11, 0.0  ;;  %v3556_v47 = vld [vmem:[%s6908_s0 + $0x28] sm:$0xff]  ;;  %v409_v34 = vmul.f32 %v3557_v33, %v4177_v38  ;;  %v410_v11 = vmul.f32 %v4177_v38, %v7044_v22  ;;  %v7045_v22 = vld [vmem:[#allocation34_spill] sm:$0xff] }
 0x126   :  { %v404_v2 = vmul.f32 %v3556_v47, %v4177_v38  ;;  %v446_v39 = vadd.f32 %v4185_v52, %v403_v55 }
 0x127   :  { %v4460_v20 = vmul.f32 %v4446_v8, %v520_v42  ;;  %v759_v54 = vmul.f32 %v4454_v28, %v519_v0  ;;  %v452_v47 = vadd.f32 %v4185_v52, %v409_v34  ;;  %v453_v1 = vadd.f32 %v4185_v52, %v410_v11  ;;  %v7047_v8 = vld [vmem:[#allocation13_spill] sm:$0xff]  ;;  %v7048_v34 = vld [vmem:[#allocation12_spill] sm:$0xff] }
 0x128   :  { %v447_v0 = vadd.f32 %v4185_v52, %v404_v2  ;;  %v486_v28 = vmax.f32 %v446_v39, 0.0  ;;  %v7049_v39 = vld [vmem:[#allocation15_spill] sm:$0xff] }
 0x129   :  { %v781_v42 = vpack.c.bf16 %v4450_v25, %v4460_v20  ;;  %v492_v40 = vmax.f32 %v452_v47, 0.0  ;;  %v493_v3 = vmax.f32 %v453_v1, 0.0  ;;  %v7046_v20 = vld [vmem:[#allocation10_spill] sm:$0xff] }
 0x12a   :  { %3122 = vmatmul.msk.bf16.gmra.mxu0 %vm116_vm0, %v763_v57  ;;  %3125 = vmatmul.msk.bf16.gmra.mxu2 %vm116_vm0, %v766_v37  ;;  %v780_v57 = vpack.c.bf16 %v759_v54, %v4457_v13  ;;  %v487_v33 = vmax.f32 %v447_v0, 0.0  ;;  %v726_v27 = vmul.f32 %v7045_v22, %v486_v28  ;;  %v3558_v13 = vld [vmem:[%s6908_s0 + $0x60] sm:$0xff]  ;;  %v3559_v28 = vld [vmem:[%s6908_s0 + $0x68] sm:$0xff] }
 0x12b   :  { %v732_v37 = vmul.f32 %v7046_v20, %v492_v40  ;;  %v733_v55 = vmul.f32 %v7047_v8, %v493_v3  ;;  %v411_v54 = vmul.f32 %v3558_v13, %v4177_v38  ;;  %v412_v1 = vmul.f32 %v3559_v28, %v4177_v38 }
 0x12c   :  { %v727_v25 = vmul.f32 %v4316_v44, %v487_v33  ;;  %v7050_v33 = vpack.c.bf16 %v4319_v46, %v4314_v43  ;;  %v7051_v38 = vpack.c.bf16 %v4325_v23, %v4322_v5  ;;  %v7054_v43 = vpack.c.bf16 %v4346_v31, %v4343_v7 }
 0x12d   :  { %v767_v2 = vpack.c.bf16 %v733_v55, %v732_v37  ;;  %v454_v3 = vadd.f32 %v4185_v52, %v411_v54  ;;  %v7055_v23 = vpack.c.bf16 %v4352_v35, %v4349_v61  ;;  %v7057_v31 = vpack.c.bf16 %v4340_v26, %v4309_v62 }
 0x12e   :  { %v764_v60 = vpack.c.bf16 %v727_v25, %v726_v27  ;;  %v455_v27 = vadd.f32 %v4185_v52, %v412_v1  ;;  %v7052_v52 = vpack.c.bf16 %v4331_v36, %v4328_v21  ;;  %v7053_v25 = vpack.c.bf16 %v4337_v4, %v4334_v53 }
 0x12f   :  { %v494_v40 = vmax.f32 %v454_v3, 0.0  ;;  %v7056_v53 = vpack.c.bf16 %v4358_v6, %v4355_v41  ;;  %v7058_v37 = vpack.c.bf16 %v4416_v50, %v4422_v32  ;;  %v7059_v55 = vpack.c.bf16 %v4413_v30, %v4425_v59 }
 0x131   :  { %v734_v11 = vmul.f32 %v7048_v34, %v494_v40 }
 0x13a   :  { %3123 = vmatmul.msk.bf16.gmra.mxu0 %vm116_vm0, %v764_v60  ;;  %3126 = vmatmul.msk.bf16.gmra.mxu2 %vm116_vm0, %v767_v2  ;;  %v495_v60 = vmax.f32 %v455_v27, 0.0  ;;  %v7060_v2 = vpack.c.bf16 %v4428_v10, %v4441_v56 }
 0x13c   :  { %v735_v0 = vmul.f32 %v7049_v39, %v495_v60 }
 0x13e   :  { %v768_v47 = vpack.c.bf16 %v735_v0, %v734_v11 }
 0x14a   :  { %3127 = vmatmul.msk.bf16.gmra.mxu2 %vm116_vm0, %v768_v47 }
 0x15a   :  { %3128 = vmatmul.msk.bf16.gmra.mxu2 %vm116_vm0, %v7050_v33 }
 0x16a   :  { %3129 = vmatmul.msk.bf16.gmra.mxu2 %vm116_vm0, %v7051_v38 }
 0x17a   :  { %3130 = vmatmul.msk.bf16.gmra.mxu2 %vm116_vm0, %v7052_v52 }
 0x18a   :  { %3131 = vmatmul.msk.bf16.gmra.mxu2 %vm116_vm0, %v7053_v25 }
 0x197   :  { %v4583_v59 = vpop.f32.mrf.mxu0 }
 0x198   :  { %v1045_v11 = vmul.f32 %v4583_v59, %v4583_v59  ;;  %v960_v33 = vsel %vm959_vm4, %v4583_v59, 0.0 }
 0x19a   :  { %3132 = vmatmul.msk.bf16.gmra.mxu2 %vm116_vm0, %v7054_v43 }
 0x19d   :  { %v4525_v46 = vpop.f32.mrf.mxu2 }
 0x19f   :  { %v4587_v28 = vpop.f32.mrf.mxu0 }
 0x1a0   :  { %v1046_v60 = vmul.f32 %v4587_v28, %v4587_v28  ;;  %v961_v0 = vsel %vm959_vm4, %v4587_v28, 0.0 }
 0x1a1   :  { %v962_v43 = vadd.f32 %v961_v0, %v960_v33 }
 0x1a2   :  { %v1086_v38 = vsel %vm959_vm4, %v1046_v60, 0.0 }
 0x1a5   :  { %v4527_v5 = vpop.f32.mrf.mxu2 }
 0x1a7   :  { %v4593_v1 = vpop.f32.mrf.mxu0 }
 0x1a8   :  { %v1047_v47 = vmul.f32 %v4593_v1, %v4593_v1  ;;  %v963_v52 = vsel %vm959_vm4, %v4593_v1, 0.0 }
 0x1a9   :  { %v964_v22 = vadd.f32 %v963_v52, %v962_v43 }
 0x1aa   :  { %3133 = vmatmul.msk.bf16.gmra.mxu2 %vm116_vm0, %v7055_v23 }
 0x1ad   :  { %v4533_v21 = vpop.f32.mrf.mxu2 }
 0x1b5   :  { %v4535_v36 = vpop.f32.mrf.mxu2 }
 0x1ba   :  { %3134 = vmatmul.msk.bf16.gmra.mxu2 %vm116_vm0, %v7056_v53 }
 0x1bd   :  { %v4541_v4 = vpop.f32.mrf.mxu2 }
 0x1c5   :  { %v4543_v7 = vpop.f32.mrf.mxu2 }
 0x1ca   :  { %3135 = vmatmul.msk.bf16.gmra.mxu2 %vm116_vm0, %v7057_v31  ;;  %v1085_v31 = vsel %vm959_vm4, %v1045_v11, 0.0 }
 0x1cb   :  { %v1087_v60 = vadd.f32 %v1086_v38, %v1085_v31  ;;  %v1051_v31 = vmul.f32 %v4525_v46, %v4525_v46 }
 0x1cd   :  { %v4549_v61 = vpop.f32.mrf.mxu2 }
 0x1d5   :  { %v4551_v35 = vpop.f32.mrf.mxu2 }
 0x1da   :  { %3136 = vmatmul.msk.bf16.gmra.mxu2 %vm116_vm0, %v7058_v37  ;;  %v1088_v37 = vsel %vm959_vm4, %v1047_v47, 0.0 }
 0x1db   :  { %v1089_v11 = vadd.f32 %v1088_v37, %v1087_v60  ;;  %v1053_v60 = vmul.f32 %v4533_v21, %v4533_v21 }
 0x1dd   :  { %v4557_v41 = vpop.f32.mrf.mxu2 }
 0x1e5   :  { %v4559_v6 = vpop.f32.mrf.mxu2 }
 0x1ea   :  { %3137 = vmatmul.msk.bf16.gmra.mxu2 %vm116_vm0, %v7059_v55 }
 0x1ed   :  { %v4565_v62 = vpop.f32.mrf.mxu2 }
 0x1f5   :  { %v4567_v26 = vpop.f32.mrf.mxu2 }
 0x1fa   :  { %3138 = vmatmul.msk.bf16.gmra.mxu2 %vm116_vm0, %v7060_v2 }
 0x1fd   :  { %v4573_v50 = vpop.f32.mrf.mxu2 }
 0x205   :  { %v4575_v32 = vpop.f32.mrf.mxu2 }
 0x20a   :  { %3139 = vmatmul.msk.bf16.gmra.mxu2 %vm116_vm0, %v780_v57  ;;  %v4597_v57 = vpop.f32.mrf.mxu0 }
 0x20b   :  { %v1048_v25 = vmul.f32 %v4597_v57, %v4597_v57  ;;  %v965_v55 = vsel %vm959_vm4, %v4597_v57, 0.0 }
 0x20c   :  { %v966_v16 = vadd.f32 %v965_v55, %v964_v22  ;;  %v971_v22 = vsel %vm959_vm4, %v4525_v46, 0.0  ;;  %v1096_v55 = vsel %vm959_vm4, %v1051_v31, 0.0 }
 0x20d   :  { %v4578_v13 = vpop.f32.mrf.mxu2  ;;  %v1090_v9 = vsel %vm959_vm4, %v1048_v25, 0.0 }
 0x20e   :  { %v1091_v49 = vadd.f32 %v1090_v9, %v1089_v11  ;;  %v1052_v9 = vmul.f32 %v4527_v5, %v4527_v5 }
 0x212   :  { %v4601_v40 = vpop.f32.mrf.mxu0 }
 0x213   :  { %v1049_v2 = vmul.f32 %v4601_v40, %v4601_v40  ;;  %v967_v0 = vsel %vm959_vm4, %v4601_v40, 0.0 }
 0x214   :  { %v968_v15 = vadd.f32 %v967_v0, %v966_v16 }
 0x215   :  { %v4580_v30 = vpop.f32.mrf.mxu2  ;;  %v1092_v47 = vsel %vm959_vm4, %v1049_v2, 0.0  ;;  %v1098_v2 = vsel %vm959_vm4, %v1052_v9, 0.0  ;;  %v979_v9 = vsel %vm959_vm4, %v4541_v4, 0.0 }
 0x216   :  { %v1093_v43 = vadd.f32 %v1092_v47, %v1091_v49  ;;  %v1100_v47 = vsel %vm959_vm4, %v1053_v60, 0.0  ;;  %v981_v60 = vsel %vm959_vm4, %v4543_v7, 0.0 }
 0x21a   :  { %3140 = vmatmul.msk.bf16.gmra.mxu2 %vm116_vm0, %v781_v42  ;;  %v4620_v23 = vpop.f32.mrf.mxu0 }
 0x21b   :  { %v1050_v33 = vmul.f32 %v4620_v23, %v4620_v23  ;;  %v969_v19 = vsel %vm959_vm4, %v4620_v23, 0.0 }
 0x21c   :  { %v970_v52 = vadd.f32 %v969_v19, %v968_v15  ;;  %v973_v15 = vsel %vm959_vm4, %v4527_v5, 0.0 }
 0x21d   :  { %v4585_v54 = vpop.f32.mrf.mxu2  ;;  %v1094_v38 = vsel %vm959_vm4, %v1050_v33, 0.0  ;;  %v975_v33 = vsel %vm959_vm4, %v4533_v21, 0.0 }
 0x21e   :  { %v1095_v45 = vadd.f32 %v1094_v38, %v1093_v43  ;;  %v972_v37 = vadd.f32 %v971_v22, %v970_v52  ;;  %v977_v52 = vsel %vm959_vm4, %v4535_v36, 0.0 }
 0x220   :  { %v1097_v16 = vadd.f32 %v1096_v55, %v1095_v45  ;;  %v974_v19 = vadd.f32 %v973_v15, %v972_v37  ;;  %v1054_v45 = vmul.f32 %v4535_v36, %v4535_v36  ;;  %v1055_v37 = vmul.f32 %v4541_v4, %v4541_v4 }
 0x222   :  { %v1099_v0 = vadd.f32 %v1098_v2, %v1097_v16  ;;  %v976_v11 = vadd.f32 %v975_v33, %v974_v19  ;;  %v1102_v22 = vsel %vm959_vm4, %v1054_v45, 0.0  ;;  %v1104_v15 = vsel %vm959_vm4, %v1055_v37, 0.0 }
 0x223   :  { %v1056_v19 = vmul.f32 %v4543_v7, %v4543_v7  ;;  %v983_v45 = vsel %vm959_vm4, %v4549_v61, 0.0  ;;  %v1059_v37 = vmul.f32 %v4557_v41, %v4557_v41 }
 0x224   :  { %v1101_v38 = vadd.f32 %v1100_v47, %v1099_v0  ;;  %v978_v43 = vadd.f32 %v977_v52, %v976_v11  ;;  %v1057_v0 = vmul.f32 %v4549_v61, %v4549_v61 }
 0x225   :  { %v4589_v10 = vpop.f32.mrf.mxu2  ;;  %v1106_v47 = vsel %vm959_vm4, %v1056_v19, 0.0  ;;  %v987_v19 = vsel %vm959_vm4, %v4557_v41, 0.0 }
 0x226   :  { %v1103_v55 = vadd.f32 %v1102_v22, %v1101_v38  ;;  %v980_v16 = vadd.f32 %v979_v9, %v978_v43  ;;  %v1058_v38 = vmul.f32 %v4551_v35, %v4551_v35  ;;  %v1108_v43 = vsel %vm959_vm4, %v1057_v0, 0.0  ;;  %v1177_v9 = vld [vmem:[%s6913_s8 + $0x38] sm:$0xff] }
 0x227   :  { %v985_v22 = vsel %vm959_vm4, %v4551_v35, 0.0  ;;  %1213 = vmatpush.msrb.mxu0 %v1177_v9  ;;  %1189 = vmatpush.msra.mxu3 %v1177_v9  ;;  %v993_v9 = vsel %vm959_vm4, %v4567_v26, 0.0 }
 0x228   :  { %v1105_v2 = vadd.f32 %v1104_v15, %v1103_v55  ;;  %v982_v33 = vadd.f32 %v981_v60, %v980_v16  ;;  %v1176_v16 = vld [vmem:[%s6913_s8 + $0x30] sm:$0xff]  ;;  %v1110_v15 = vsel %vm959_vm4, %v1058_v38, 0.0 }
 0x229   :  { %1214 = vmatpush.msrb.mxu0 %v1176_v16  ;;  %1190 = vmatpush.msra.mxu3 %v1176_v16  ;;  %v1063_v16 = vmul.f32 %v4573_v50, %v4573_v50 }
 0x22a   :  { %v1107_v52 = vadd.f32 %v1106_v47, %v1105_v2  ;;  %v984_v55 = vadd.f32 %v983_v45, %v982_v33  ;;  %v1060_v2 = vmul.f32 %v4559_v6, %v4559_v6  ;;  %v1112_v33 = vsel %vm959_vm4, %v1059_v37, 0.0 }
 0x22b   :  { %v989_v47 = vsel %vm959_vm4, %v4559_v6, 0.0  ;;  %v1061_v45 = vmul.f32 %v4565_v62, %v4565_v62 }
 0x22c   :  { %v1109_v60 = vadd.f32 %v1108_v43, %v1107_v52  ;;  %v986_v0 = vadd.f32 %v985_v22, %v984_v55  ;;  %v1114_v17 = vsel %vm959_vm4, %v1060_v2, 0.0  ;;  %v991_v52 = vsel %vm959_vm4, %v4565_v62, 0.0 }
 0x22d   :  { %v4591_v56 = vpop.f32.mrf.mxu2  ;;  %v1062_v43 = vmul.f32 %v4567_v26, %v4567_v26  ;;  %v1116_v55 = vsel %vm959_vm4, %v1061_v45, 0.0  ;;  %v1120_v45 = vsel %vm959_vm4, %v1063_v16, 0.0 }
 0x22e   :  { %v988_v38 = vadd.f32 %v987_v19, %v986_v0  ;;  %v1111_v51 = vadd.f32 %v1110_v15, %v1109_v60  ;;  %v1175_v15 = vld [vmem:[%s6913_s8 + $0x28] sm:$0xff]  ;;  %v1064_v0 = vmul.f32 %v4575_v32, %v4575_v32  ;;  %v1007_v18 = vsel %vm959_vm4, %v4591_v56, 0.0 }
 0x22f   :  { %1215 = vmatpush.msrb.mxu0 %v1175_v15  ;;  %1191 = vmatpush.msra.mxu3 %v1175_v15  ;;  %v1118_v60 = vsel %vm959_vm4, %v1062_v43, 0.0  ;;  %v999_v15 = vsel %vm959_vm4, %v4578_v13, 0.0 }
 0x230   :  { %v1113_v22 = vadd.f32 %v1112_v33, %v1111_v51  ;;  %v990_v37 = vadd.f32 %v989_v47, %v988_v38  ;;  %v995_v51 = vsel %vm959_vm4, %v4573_v50, 0.0  ;;  %v997_v38 = vsel %vm959_vm4, %v4575_v32, 0.0 }
 0x231   :  { %v1122_v43 = vsel %vm959_vm4, %v1064_v0, 0.0  ;;  %v1174_v0 = vld [vmem:[%s6913_s8 + $0x20] sm:$0xff] }
 0x232   :  { %v992_v19 = vadd.f32 %v991_v52, %v990_v37  ;;  %v1115_v2 = vadd.f32 %v1114_v17, %v1113_v22  ;;  %v1065_v17 = vmul.f32 %v4578_v13, %v4578_v13  ;;  %1216 = vmatpush.msrb.mxu0 %v1174_v0  ;;  %1192 = vmatpush.msra.mxu3 %v1174_v0 }
 0x234   :  { %v1117_v33 = vadd.f32 %v1116_v55, %v1115_v2  ;;  %v994_v47 = vadd.f32 %v993_v9, %v992_v19  ;;  %v1066_v55 = vmul.f32 %v4580_v30, %v4580_v30  ;;  %v1124_v19 = vsel %vm959_vm4, %v1065_v17, 0.0 }
 0x235   :  { %v4595_v3 = vpop.f32.mrf.mxu2  ;;  %v1001_v2 = vsel %vm959_vm4, %v4580_v30, 0.0 }
 0x236   :  { %v996_v52 = vadd.f32 %v995_v51, %v994_v47  ;;  %v1119_v22 = vadd.f32 %v1118_v60, %v1117_v33  ;;  %v1067_v60 = vmul.f32 %v4585_v54, %v4585_v54  ;;  %v1126_v47 = vsel %vm959_vm4, %v1066_v55, 0.0 }
 0x238   :  { %v1121_v9 = vadd.f32 %v1120_v45, %v1119_v22  ;;  %v998_v16 = vadd.f32 %v997_v38, %v996_v52  ;;  %v1003_v45 = vsel %vm959_vm4, %v4585_v54, 0.0  ;;  %v1068_v38 = vmul.f32 %v4589_v10, %v4589_v10 }
 0x239   :  { %v1128_v22 = vsel %vm959_vm4, %v1067_v60, 0.0 }
 0x23a   :  { %v1000_v51 = vadd.f32 %v999_v15, %v998_v16  ;;  %v1123_v33 = vadd.f32 %v1122_v43, %v1121_v9  ;;  %v1005_v43 = vsel %vm959_vm4, %v4589_v10, 0.0  ;;  %v1069_v15 = vmul.f32 %v4591_v56, %v4591_v56 }
 0x23b   :  { %v1130_v24 = vsel %vm959_vm4, %v1068_v38, 0.0 }
 0x23c   :  { %v1125_v17 = vadd.f32 %v1124_v19, %v1123_v33  ;;  %v1002_v52 = vadd.f32 %v1001_v2, %v1000_v51  ;;  %v1070_v19 = vmul.f32 %v4595_v3, %v4595_v3  ;;  %v1132_v51 = vsel %vm959_vm4, %v1069_v15, 0.0 }
 0x23d   :  { %v4599_v27 = vpop.f32.mrf.mxu2  ;;  %v1009_v33 = vsel %vm959_vm4, %v4595_v3, 0.0 }
 0x23e   :  { %v1004_v9 = vadd.f32 %v1003_v45, %v1002_v52  ;;  %v1127_v55 = vadd.f32 %v1126_v47, %v1125_v17  ;;  %v1071_v0 = vmul.f32 %v4599_v27, %v4599_v27  ;;  %v1134_v38 = vsel %vm959_vm4, %v1070_v19, 0.0 }
 0x23f   :  { %v1011_v17 = vsel %vm959_vm4, %v4599_v27, 0.0 }
 0x240   :  { %v1129_v2 = vadd.f32 %v1128_v22, %v1127_v55  ;;  %v1006_v60 = vadd.f32 %v1005_v43, %v1004_v9  ;;  %v1136_v15 = vsel %vm959_vm4, %v1071_v0, 0.0 }
 0x242   :  { %v1008_v47 = vadd.f32 %v1007_v18, %v1006_v60  ;;  %v1131_v45 = vadd.f32 %v1130_v24, %v1129_v2 }
 0x244   :  { %v1133_v22 = vadd.f32 %v1132_v51, %v1131_v45  ;;  %v1010_v43 = vadd.f32 %v1009_v33, %v1008_v47 }
 0x245   :  { %v4603_v42 = vpop.f32.mrf.mxu2 }
 0x246   :  { %v1072_v52 = vmul.f32 %v4603_v42, %v4603_v42  ;;  %v1013_v9 = vsel %vm959_vm4, %v4603_v42, 0.0  ;;  %v1012_v18 = vadd.f32 %v1011_v17, %v1010_v43  ;;  %v1135_v24 = vadd.f32 %v1134_v38, %v1133_v22  ;;  %v1172_v43 = vld [vmem:[%s6913_s8 + $0x10] sm:$0xff] }
 0x248   :  { %v1138_v19 = vsel %vm959_vm4, %v1072_v52, 0.0  ;;  %v1137_v33 = vadd.f32 %v1136_v15, %v1135_v24  ;;  %v1014_v0 = vadd.f32 %v1013_v9, %v1012_v18  ;;  %v1173_v52 = vld [vmem:[%s6913_s8 + $0x18] sm:$0xff] }
 0x249   :  { %1217 = vmatpush.msrb.mxu0 %v1173_v52  ;;  %1193 = vmatpush.msra.mxu3 %v1173_v52 }
 0x24a   :  { %v1139_v22 = vadd.f32 %v1138_v19, %v1137_v33  ;;  %v1171_v19 = vld [vmem:[%s6913_s8 + $0x8] sm:$0xff] }
 0x24b   :  { %1218 = vmatpush.msrb.mxu0 %v1172_v43  ;;  %1194 = vmatpush.msra.mxu3 %v1172_v43 }
 0x24d   :  { %v4622_v53 = vpop.f32.mrf.mxu2  ;;  %1219 = vmatpush.msrb.mxu0 %v1171_v19  ;;  %1195 = vmatpush.msra.mxu3 %v1171_v19 }
 0x24e   :  { %v1073_v55 = vmul.f32 %v4622_v53, %v4622_v53  ;;  %v1015_v60 = vsel %vm959_vm4, %v4622_v53, 0.0 }
 0x24f   :  { %v1016_v17 = vadd.f32 %v1015_v60, %v1014_v0 }
 0x250   :  { %v1140_v47 = vsel %vm959_vm4, %v1073_v55, 0.0 }
 0x251   :  { %v1141_v18 = vadd.f32 %v1140_v47, %v1139_v22  ;;  %v1170_v47 = vld [vmem:[%s6913_s8] sm:$0xff] }
 0x252   :  { %1196 = vmatpush.msra.mxu3 %v1170_v47  ;;  %1220 = vmatpush.msrb.mxu0 %v1170_v47 }
 0x255   :  { %v4639_v25 = vpop.f32.mrf.mxu2 }
 0x256   :  { %v1074_v51 = vmul.f32 %v4639_v25, %v4639_v25  ;;  %v1017_v45 = vsel %vm959_vm4, %v4639_v25, 0.0 }
 0x257   :  { %v1018_v24 = vadd.f32 %v1017_v45, %v1016_v17 }
 0x258   :  { %v1142_v15 = vsel %vm959_vm4, %v1074_v51, 0.0 }
 0x259   :  { %v1143_v58 = vadd.f32 %v1142_v15, %v1141_v18 }
 0x25d   :  { %v4650_v49 = vpop.f32.mrf.mxu2 }
 0x25e   :  { %v1075_v38 = vmul.f32 %v4650_v49, %v4650_v49  ;;  %v1019_v9 = vsel %vm959_vm4, %v4650_v49, 0.0 }
 0x25f   :  { %v1020_v0 = vadd.f32 %v1019_v9, %v1018_v24 }
 0x260   :  { %v1144_v60 = vsel %vm959_vm4, %v1075_v38, 0.0 }
 0x261   :  { %v1145_v22 = vadd.f32 %v1144_v60, %v1143_v58 }
 0x265   :  { %v4662_v31 = vpop.f32.mrf.mxu2 }
 0x266   :  { %v1076_v55 = vmul.f32 %v4662_v31, %v4662_v31  ;;  %v1021_v33 = vsel %vm959_vm4, %v4662_v31, 0.0 }
 0x267   :  { %v1022_v52 = vadd.f32 %v1021_v33, %v1020_v0 }
 0x268   :  { %v1146_v45 = vsel %vm959_vm4, %v1076_v55, 0.0 }
 0x269   :  { %v1147_v18 = vadd.f32 %v1146_v45, %v1145_v22 }
 0x26d   :  { %v4676_v11 = vpop.f32.mrf.mxu2 }
 0x26e   :  { %v1077_v51 = vmul.f32 %v4676_v11, %v4676_v11  ;;  %v1023_v38 = vsel %vm959_vm4, %v4676_v11, 0.0 }
 0x26f   :  { %v1024_v55 = vadd.f32 %v1023_v38, %v1022_v52 }
 0x270   :  { %v1148_v43 = vsel %vm959_vm4, %v1077_v51, 0.0 }
 0x271   :  { %v1149_v19 = vadd.f32 %v1148_v43, %v1147_v18 }
 0x275   :  { %v4704_v29 = vpop.f32.mrf.mxu2 }
 0x276   :  { %v1078_v17 = vmul.f32 %v4704_v29, %v4704_v29  ;;  %v1025_v15 = vsel %vm959_vm4, %v4704_v29, 0.0 }
 0x277   :  { %v1026_v60 = vadd.f32 %v1025_v15, %v1024_v55 }
 0x278   :  { %v1150_v24 = vsel %vm959_vm4, %v1078_v17, 0.0 }
 0x279   :  { %v1151_v45 = vadd.f32 %v1150_v24, %v1149_v19 }
 0x27d   :  { %v4729_v37 = vpop.f32.mrf.mxu2 }
 0x27e   :  { %v1079_v9 = vmul.f32 %v4729_v37, %v4729_v37  ;;  %v1027_v48 = vsel %vm959_vm4, %v4729_v37, 0.0 }
 0x27f   :  { %v1028_v47 = vadd.f32 %v1027_v48, %v1026_v60 }
 0x280   :  { %v1152_v33 = vsel %vm959_vm4, %v1079_v9, 0.0 }
 0x281   :  { %v1153_v43 = vadd.f32 %v1152_v33, %v1151_v45 }
 0x285   :  { %v4754_v16 = vpop.f32.mrf.mxu2 }
 0x286   :  { %v1080_v58 = vmul.f32 %v4754_v16, %v4754_v16  ;;  %v1029_v51 = vsel %vm959_vm4, %v4754_v16, 0.0 }
 0x287   :  { %v1030_v15 = vadd.f32 %v1029_v51, %v1028_v47 }
 0x288   :  { %v1154_v17 = vsel %vm959_vm4, %v1080_v58, 0.0 }
 0x289   :  { %v1155_v24 = vadd.f32 %v1154_v17, %v1153_v43 }
 0x28d   :  { %v4776_v2 = vpop.f32.mrf.mxu2 }
 0x28e   :  { %v1081_v0 = vmul.f32 %v4776_v2, %v4776_v2  ;;  %v1031_v22 = vsel %vm959_vm4, %v4776_v2, 0.0 }
 0x28f   :  { %v1032_v18 = vadd.f32 %v1031_v22, %v1030_v15 }
 0x290   :  { %v1156_v9 = vsel %vm959_vm4, %v1081_v0, 0.0 }
 0x291   :  { %v1157_v60 = vadd.f32 %v1156_v9, %v1155_v24 }
 0x295   :  { %v4807_v44 = vpop.f32.mrf.mxu2 }
 0x296   :  { %v1082_v52 = vmul.f32 %v4807_v44, %v4807_v44  ;;  %v1033_v55 = vsel %vm959_vm4, %v4807_v44, 0.0 }
 0x297   :  { %v1034_v63 = vadd.f32 %v1033_v55, %v1032_v18 }
 0x298   :  { %v1158_v58 = vsel %vm959_vm4, %v1082_v52, 0.0 }
 0x299   :  { %v1159_v47 = vadd.f32 %v1158_v58, %v1157_v60 }
 0x29d   :  { %v4832_v38 = vpop.f32.mrf.mxu2 }
 0x29e   :  { %v1083_v48 = vmul.f32 %v4832_v38, %v4832_v38  ;;  %v1035_v19 = vsel %vm959_vm4, %v4832_v38, 0.0 }
 0x29f   :  { %v1036_v51 = vadd.f32 %v1035_v19, %v1034_v63 }
 0x2a0   :  { %v1160_v33 = vsel %vm959_vm4, %v1083_v48, 0.0 }
 0x2a1   :  { %v1161_v17 = vadd.f32 %v1160_v33, %v1159_v47 }
 0x2a5   :  { %v4848_v0 = vpop.f32.mrf.mxu2 }
 0x2a6   :  { %v1037_v45 = vsel %vm959_vm4, %v4848_v0, 0.0  ;;  %v1084_v22 = vmul.f32 %v4848_v0, %v4848_v0 }
 0x2a7   :  { %v1038_v43 = vadd.f32 %v1037_v45, %v1036_v51 }
 0x2a8   :  { %v1162_v52 = vsel %vm959_vm4, %v1084_v22, 0.0 }
 0x2a9   :  { %v1039_v15 = vrot.slane %v1038_v43, 4  ;;  %v1163_v8 = vadd.f32 %v1162_v52, %v1161_v17 }
 0x2ab   :  { %v1164_v9 = vrot.slane %v1163_v8, 4  ;;  %v1040_v55 = vadd.f32 %v1039_v15, %v1038_v43 }
 0x2ad   :  { %v1165_v18 = vadd.f32 %v1164_v9, %v1163_v8  ;;  %v1041_v48 = vrot.slane %v1040_v55, 2 }
 0x2af   :  { %v1166_v63 = vrot.slane %v1165_v18, 2  ;;  %v1042_v24 = vadd.f32 %v1041_v48, %v1040_v55 }
 0x2b1   :  { %v1167_v58 = vadd.f32 %v1166_v63, %v1165_v18  ;;  %v1043_v19 = vrot.slane %v1042_v24, 1 }
 0x2b3   :  { %v1044_v60 = vadd.f32 %v1043_v19, %v1042_v24  ;;  %v1168_v20 = vrot.slane %v1167_v58, 1  ;;  %v1242_v24 = vld [vmem:[%s6915_s7] sm:$0x1] }
 0x2b5   :  { %3141 = vmatmul.msk.f32.vlgmr.msra.gmra.mxu3 %vm959_vm4, %v1044_v60  ;;  %v1169_v39 = vadd.f32 %v1168_v20, %v1167_v58  ;;  %v1229_v20 = vld [vmem:[%s6914_s6] sm:$0x1]  ;;  %s3561_s6 = smov 64  }
 0x2b7   :  { %3142 = vmatmul.msk.f32.vlgmr.msrb.gmra.mxu0 %vm959_vm4, %v1169_v39 }
 0x334   :  { %v1222_v33 = vpop.f32.mrf.mxu0 }
 0x335   :  { %v1225_v45 = vmul.f32 0.001953125, %v1222_v33 }
 0x338   :  { %v1198_v51 = vpop.f32.mrf.mxu3 }
 0x339   :  { %v1201_v47 = vmul.f32 0.001953125, %v1198_v51 }
 0x33b   :  { %v1226_v22 = vmul.f32 %v1201_v47, %v1201_v47 }
 0x33d   :  { %v1227_v17 = vsub.f32 %v1225_v45, %v1226_v22 }
 0x33f   :  { %v1228_v43 = vmax.f32 %v1227_v17, 0.0 }
 0x341   :  { %v1230_v8 = vadd.f32 1e-05, %v1228_v43 }
 0x343   :  { %3553 = vrsqrt.f32 %v1230_v8  ;;  %vm1237_vm6 = vweird.f32 %v1230_v8 }
 0x349   :  { %v3554_v52 = vpop.eup %3553 }
 0x34a   :  { %v1232_v15 = vmul.f32 %v3554_v52, %v1230_v8  ;;  %vm1238_vm5 = vweird.f32 %v3554_v52 }
 0x34b   :  { %vm1239_vm7 = vmor %vm1237_vm6, %vm1238_vm5 }
 0x34c   :  { %v1233_v9 = vmul.f32 %v3554_v52, %v1232_v15 }
 0x34e   :  { %v1234_v55 = vmul.f32 0.5, %v1233_v9 }
 0x350   :  { %v1235_v18 = vsub.f32 1.5, %v1234_v55 }
 0x352   :  { %v1236_v39 = vmul.f32 %v3554_v52, %v1235_v18 }
 0x354   :  { %v1240_v48 = vsel %vm1239_vm7, %v3554_v52, %v1236_v39 }
 0x355   :  { %v1241_v63 = vmul.f32 %v1240_v48, %v1229_v20 }
 0x357   :  { %v1243_v58 = vmul.f32 %v1241_v63, %v1201_v47  ;;  %v1246_v19 = vperm.slane %v1241_v63, 0 }
 0x359   :  { %v1244_v60 = vsub.f32 %v1242_v24, %v1243_v58  ;;  %v1248_v33 = vmul.f32 %v1246_v19, %v4583_v59  ;;  %v1249_v51 = vmul.f32 %v1246_v19, %v4587_v28  ;;  %v1250_v45 = vmul.f32 %v1246_v19, %v4593_v1 }
 0x35a   :  { %v1251_v22 = vmul.f32 %v1246_v19, %v4597_v57  ;;  %v1252_v17 = vmul.f32 %v1246_v19, %v4601_v40  ;;  %v1253_v43 = vmul.f32 %v1246_v19, %v4620_v23  ;;  %v1254_v52 = vmul.f32 %v1246_v19, %v4525_v46 }
 0x35b   :  { %v4869_v8 = vperm.slane %v1244_v60, 0  ;;  %v1255_v47 = vmul.f32 %v1246_v19, %v4527_v5  ;;  %v1256_v15 = vmul.f32 %v1246_v19, %v4533_v21  ;;  %v1257_v59 = vmul.f32 %v1246_v19, %v4535_v36 }
 0x35c   :  { %v1258_v28 = vmul.f32 %v1246_v19, %v4541_v4  ;;  %v1259_v1 = vmul.f32 %v1246_v19, %v4543_v7  ;;  %v1260_v57 = vmul.f32 %v1246_v19, %v4549_v61  ;;  %v1261_v40 = vmul.f32 %v1246_v19, %v4551_v35 }
 0x35d   :  { %v1262_v23 = vmul.f32 %v1246_v19, %v4557_v41  ;;  %v1263_v9 = vmul.f32 %v1246_v19, %v4559_v6  ;;  %v1264_v46 = vmul.f32 %v1246_v19, %v4565_v62  ;;  %v1265_v5 = vmul.f32 %v1246_v19, %v4567_v26 }
 0x35e   :  { %v1266_v21 = vmul.f32 %v1246_v19, %v4573_v50  ;;  %v1267_v36 = vmul.f32 %v1246_v19, %v4575_v32  ;;  %v1268_v4 = vmul.f32 %v1246_v19, %v4578_v13  ;;  %v1269_v7 = vmul.f32 %v1246_v19, %v4580_v30 }
 0x35f   :  { %v1270_v61 = vmul.f32 %v1246_v19, %v4585_v54  ;;  %v1271_v35 = vmul.f32 %v1246_v19, %v4589_v10  ;;  %v1272_v41 = vmul.f32 %v1246_v19, %v4591_v56  ;;  %v1273_v6 = vmul.f32 %v1246_v19, %v4595_v3 }
 0x360   :  { %v1274_v62 = vmul.f32 %v1246_v19, %v4599_v27  ;;  %v1275_v26 = vmul.f32 %v1246_v19, %v4603_v42  ;;  %v1276_v50 = vmul.f32 %v1246_v19, %v4622_v53  ;;  %v1277_v32 = vmul.f32 %v1246_v19, %v4639_v25 }
 0x361   :  { %v1278_v13 = vmul.f32 %v1246_v19, %v4650_v49  ;;  %v1279_v30 = vmul.f32 %v1246_v19, %v4662_v31  ;;  %v1280_v54 = vmul.f32 %v1246_v19, %v4676_v11  ;;  %v1281_v10 = vmul.f32 %v1246_v19, %v4704_v29 }
 0x362   :  { %v1282_v56 = vmul.f32 %v1246_v19, %v4729_v37  ;;  %v1283_v3 = vmul.f32 %v1246_v19, %v4754_v16  ;;  %v1284_v27 = vmul.f32 %v1246_v19, %v4776_v2  ;;  %v1285_v42 = vmul.f32 %v1246_v19, %v4807_v44 }
 0x363   :  { %v1286_v53 = vmul.f32 %v1246_v19, %v4832_v38  ;;  %v1305_v25 = vadd.f32 %v4869_v8, %v1262_v23  ;;  %v1306_v49 = vadd.f32 %v4869_v8, %v1263_v9  ;;  %v1287_v31 = vmul.f32 %v1246_v19, %v4848_v0 }
 0x364   :  { %v4908_v11 = vadd.f32 %v4869_v8, %v1248_v33  ;;  %v4911_v29 = vadd.f32 %v4869_v8, %v1249_v51  ;;  %v4914_v37 = vadd.f32 %v4869_v8, %v1250_v45  ;;  %v4917_v44 = vadd.f32 %v4869_v8, %v1251_v22 }
 0x365   :  { %v1345_v16 = vmax.f32 %v1305_v25, 0.0  ;;  %v1346_v2 = vmax.f32 %v1306_v49, 0.0  ;;  %v4920_v38 = vadd.f32 %v4869_v8, %v1252_v17  ;;  %v4923_v55 = vadd.f32 %v4869_v8, %v1253_v43 }
 0x366   :  { %v4926_v0 = vadd.f32 %v4869_v8, %v1254_v52  ;;  %v4929_v18 = vadd.f32 %v4869_v8, %v1255_v47  ;;  %v4932_v20 = vadd.f32 %v4869_v8, %v1256_v15  ;;  %v4941_v63 = vadd.f32 %v4869_v8, %v1257_v59 }
 0x367   :  { %v4935_v39 = vmul.f32 %v1345_v16, %v4137_v14  ;;  %v4938_v48 = vmul.f32 %v1346_v2, %v4135_v12  ;;  %v4944_v24 = vadd.f32 %v4869_v8, %v1258_v28  ;;  %v4947_v58 = vadd.f32 %v4869_v8, %v1259_v1 }
 0x368   :  { %v1303_v19 = vadd.f32 %v4869_v8, %v1260_v57  ;;  %v1304_v60 = vadd.f32 %v4869_v8, %v1261_v40  ;;  %v4952_v33 = vadd.f32 %v4869_v8, %v1264_v46  ;;  %v4957_v14 = vadd.f32 %v4869_v8, %v1265_v5 }
 0x369   :  { %v3461_v12 = vpack.i.bf16 %v4938_v48, %v4935_v39  ;;  %v4960_v51 = vadd.f32 %v4869_v8, %v1266_v21  ;;  %v4963_v45 = vadd.f32 %v4869_v8, %v1267_v36  ;;  %v4966_v22 = vadd.f32 %v4869_v8, %v1268_v4 }
 0x36a   :  { %v4969_v17 = vadd.f32 %v4869_v8, %v1269_v7  ;;  %v4972_v43 = vadd.f32 %v4869_v8, %v1270_v61  ;;  %v4975_v52 = vadd.f32 %v4869_v8, %v1271_v35  ;;  %v4979_v47 = vadd.f32 %v4869_v8, %v1272_v41  ;;  %v7062_v35 = vld [vmem:[#allocation10_spill] sm:$0xff]  ;;  %v7063_v41 = vld [vmem:[#allocation13_spill] sm:$0xff] }
 0x36b   :  { %3462 = vrot.lane.b32.xlu0 %v3461_v12, %s3561_s6  ;;  %v4982_v15 = vadd.f32 %v4869_v8, %v1273_v6  ;;  %v4985_v59 = vadd.f32 %v4869_v8, %v1274_v62  ;;  %v4988_v28 = vadd.f32 %v4869_v8, %v1275_v26  ;;  %v4991_v1 = vadd.f32 %v4869_v8, %v1276_v50 }
 0x36c   :  { %v4994_v57 = vadd.f32 %v4869_v8, %v1278_v13  ;;  %v4997_v40 = vadd.f32 %v4869_v8, %v1279_v30  ;;  %v5000_v23 = vadd.f32 %v4869_v8, %v1280_v54  ;;  %v5003_v9 = vadd.f32 %v4869_v8, %v1277_v32  ;;  %v7061_v54 = vld [vmem:[#allocation15_spill] sm:$0xff] }
 0x36d   :  { %v5006_v46 = vadd.f32 %v4869_v8, %v1281_v10  ;;  %v5009_v5 = vadd.f32 %v4869_v8, %v1282_v56  ;;  %v5012_v21 = vadd.f32 %v4869_v8, %v1284_v27  ;;  %v5015_v36 = vadd.f32 %v4869_v8, %v1283_v3 }
 0x36e   :  { %v5018_v4 = vadd.f32 %v4869_v8, %v1285_v42  ;;  %v5021_v7 = vadd.f32 %v4869_v8, %v1286_v53  ;;  %v5024_v61 = vadd.f32 %v4869_v8, %v1287_v31  ;;  %v1343_v6 = vmax.f32 %v1303_v19, 0.0 }
 0x36f   :  { %v1344_v62 = vmax.f32 %v1304_v60, 0.0  ;;  %v1331_v26 = vmax.f32 %v4908_v11, 0.0  ;;  %v1332_v50 = vmax.f32 %v4911_v29, 0.0  ;;  %v1333_v32 = vmax.f32 %v4914_v37, 0.0  ;;  %v7089_v37 = vld [vmem:[#allocation27_spill] sm:$0xff] }
 0x370   :  { %v1334_v13 = vmax.f32 %v4917_v44, 0.0  ;;  %v5033_v30 = vmul.f32 %v1343_v6, %v7048_v34  ;;  %v1335_v10 = vmax.f32 %v4920_v38, 0.0  ;;  %v1336_v56 = vmax.f32 %v4923_v55, 0.0 }
 0x371   :  { %v5036_v8 = vmul.f32 %v1344_v62, %v7061_v54  ;;  %v1337_v3 = vmax.f32 %v4926_v0, 0.0  ;;  %v1339_v42 = vmax.f32 %v4932_v20, 0.0  ;;  %v1341_v34 = vmax.f32 %v4944_v24, 0.0  ;;  %v7066_v62 = vld [vmem:[#allocation39_spill] sm:$0xff]  ;;  %v7067_v54 = vld [vmem:[#allocation8_spill] sm:$0xff] }
 0x372   :  { %v1342_v49 = vmax.f32 %v4947_v58, 0.0  ;;  %v1347_v31 = vmax.f32 %v4952_v33, 0.0  ;;  %v1348_v29 = vmax.f32 %v4957_v14, 0.0  ;;  %v1349_v16 = vmax.f32 %v4960_v51, 0.0 }
 0x373   :  { %v3456_v25 = vpack.i.bf16 %v5036_v8, %v5033_v30  ;;  %v1350_v2 = vmax.f32 %v4963_v45, 0.0  ;;  %v1351_v44 = vmax.f32 %v4966_v22, 0.0  ;;  %v1352_v55 = vmax.f32 %v4969_v17, 0.0 }
 0x374   :  { %v1353_v0 = vmax.f32 %v4972_v43, 0.0  ;;  %v1354_v20 = vmax.f32 %v4975_v52, 0.0  ;;  %v1355_v24 = vmax.f32 %v4979_v47, 0.0  ;;  %v1356_v58 = vmax.f32 %v4982_v15, 0.0  ;;  %v7088_v52 = vld [vmem:[#allocation25_spill] sm:$0xff] }
 0x375   :  { %3457 = vrot.lane.b32.xlu2 %v3456_v25, %s3561_s6  ;;  %v1357_v19 = vmax.f32 %v4985_v59, 0.0  ;;  %v1358_v60 = vmax.f32 %v4988_v28, 0.0  ;;  %v1359_v33 = vmax.f32 %v4991_v1, 0.0  ;;  %v1360_v12 = vmax.f32 %v5003_v9, 0.0 }
 0x376   :  { %v1361_v51 = vmax.f32 %v4994_v57, 0.0  ;;  %v1363_v17 = vmax.f32 %v5000_v23, 0.0  ;;  %v1365_v47 = vmax.f32 %v5009_v5, 0.0  ;;  %v1367_v59 = vmax.f32 %v5012_v21, 0.0  ;;  %v7064_v5 = vld [vmem:[#allocation29_spill] sm:$0xff]  ;;  %v7065_v21 = vld [vmem:[#allocation31_spill] sm:$0xff] }
 0x377   :  { %v1369_v1 = vmax.f32 %v5021_v7, 0.0  ;;  %v5076_v23 = vmul.f32 %v1341_v34, %v7062_v35  ;;  %v5079_v22 = vmul.f32 %v1342_v49, %v7063_v41  ;;  %v5082_v6 = vmul.f32 %v1332_v50, %v7064_v5  ;;  %v7068_v57 = vld [vmem:[#allocation11_spill] sm:$0xff]  ;;  %v7069_v41 = vld [vmem:[#allocation18_spill] sm:$0xff]  ;;  %v7070_v50 = vld [vmem:[#allocation16_spill] sm:$0xff] }
 0x378   :  { %v5085_v43 = vmul.f32 %v1334_v13, %v7065_v21  ;;  %v5088_v7 = vmul.f32 %v1336_v56, %v7066_v62  ;;  %v5091_v27 = vmul.f32 %v1337_v3, %v7067_v54  ;;  %v5094_v25 = vmul.f32 %v1339_v42, %v7068_v57  ;;  %v7071_v13 = vld [vmem:[#allocation20_spill] sm:$0xff]  ;;  %v7073_v3 = vld [vmem:[#allocation22_spill] sm:$0xff] }
 0x379   :  { %v3451_v35 = vpack.i.bf16 %v5079_v22, %v5076_v23  ;;  %v5099_v34 = vmul.f32 %v1347_v31, %v7069_v41  ;;  %v5102_v49 = vmul.f32 %v1349_v16, %v7070_v50  ;;  %v5105_v5 = vmul.f32 %v1351_v44, %v7071_v13  ;;  %v7072_v56 = vld [vmem:[#allocation24_spill] sm:$0xff]  ;;  %v7074_v42 = vld [vmem:[#allocation26_spill] sm:$0xff]  ;;  %v7078_v50 = vld [vmem:[#allocation7_spill] sm:$0xff] }
 0x37a   :  { %v5108_v62 = vmul.f32 %v1353_v0, %v7072_v56  ;;  %v5111_v54 = vmul.f32 %v1355_v24, %v7073_v3  ;;  %v5114_v57 = vmul.f32 %v1357_v19, %v7074_v42  ;;  %v7075_v21 = vld [vmem:[#allocation28_spill] sm:$0xff]  ;;  %v7077_v41 = vld [vmem:[#allocation38_spill] sm:$0xff]  ;;  %v5127_v0 = vmul.f32 %v1365_v47, %v7078_v50  ;;  %v7080_v56 = vld [vmem:[#allocation3_spill] sm:$0xff] }
 0x37b   :  { %v5117_v53 = vmul.f32 %v1359_v33, %v7075_v21  ;;  %3452 = vrot.lane.b32.xlu1 %v3451_v35, %s3561_s6  ;;  %v7076_v31 = vld [vmem:[#allocation36_spill] sm:$0xff]  ;;  %v5124_v44 = vmul.f32 %v1363_v17, %v7077_v41  ;;  %v5133_v19 = vmul.f32 %v1369_v1, %v7080_v56  ;;  %v7081_v35 = vld [vmem:[#allocation19_spill] sm:$0xff]  ;;  %v1429_v41 = vrot.slane %v5102_v49, 7  ;;  %v7083_v33 = vld [vmem:[#allocation17_spill] sm:$0xff] }
 0x37c   :  { %v5121_v16 = vmul.f32 %v1361_v51, %v7076_v31  ;;  %v7079_v13 = vld [vmem:[#allocation40_spill] sm:$0xff]  ;;  %v5138_v42 = vmul.f32 %v1352_v55, %v7081_v35  ;;  %v1433_v50 = vrot.slane %v5108_v62, 7  ;;  %v6962_v35 = vrot.slane %v5102_v49, 1  ;;  %v7084_v1 = vld [vmem:[#allocation23_spill] sm:$0xff]  ;;  %v7086_v56 = vld [vmem:[#allocation30_spill] sm:$0xff] }
 0x37d   :  { %v5130_v24 = vmul.f32 %v1367_v59, %v7079_v13  ;;  %v6963_v21 = vrot.slane %v5105_v5, 1  ;;  %v6965_v51 = vrot.slane %v5111_v54, 1  ;;  %v7082_v13 = vld [vmem:[#allocation21_spill] sm:$0xff]  ;;  %v5186_v17 = vmul.f32 %v1354_v20, %v7084_v1  ;;  %v7085_v47 = vld [vmem:[#allocation32_spill] sm:$0xff]  ;;  %v7091_v1 = vld [vmem:[#allocation14_spill] sm:$0xff] }
 0x37e   :  { %v3476_v59 = vpack.i.bf16 %v5138_v42, %v5105_v5  ;;  %v5176_v3 = vmul.f32 %v1350_v2, %v7082_v13  ;;  %v5191_v31 = vmul.f32 %v1333_v32, %v7085_v47  ;;  %v5196_v45 = vmul.f32 %v1331_v26, %v7086_v56 }
 0x37f   :  { %v5208_v20 = vmul.f32 %v1358_v60, %v7088_v52  ;;  %v5213_v32 = vmul.f32 %v1356_v58, %v7089_v37  ;;  %v3486_v26 = vpack.i.bf16 %v5186_v17, %v5108_v62  ;;  %v7090_v60 = vld [vmem:[#allocation33_spill] sm:$0xff]  ;;  %v7092_v13 = vmax.f32 %v4941_v63, 0.0 }
 0x380   :  { %3477 = vrot.lane.b32.xlu0 %v3476_v59, %s3561_s6  ;;  %v5181_v59 = vmul.f32 %v1348_v29, %v7083_v33  ;;  %v3471_v14 = vpack.i.bf16 %v5176_v3, %v5102_v49  ;;  %v7087_v29 = vld [vmem:[#allocation34_spill] sm:$0xff]  ;;  %v3491_v38 = vpack.i.bf16 %v5085_v43, %v5191_v31  ;;  %v5233_v33 = vmul.f32 %v1360_v12, %v7090_v60  ;;  %v7095_v37 = vld [vmem:[#allocation37_spill] sm:$0xff] }
 0x381   :  { %v5203_v2 = vmul.f32 %v1335_v10, %v7087_v29  ;;  %v3481_v10 = vpack.i.bf16 %v5082_v6, %v5196_v45  ;;  %v3506_v15 = vpack.i.bf16 %v5208_v20, %v5114_v57  ;;  %v5241_v56 = vmul.f32 %v7092_v13, %v7091_v1  ;;  %v7097_v60 = vld [vmem:[#allocation41_spill] sm:$0xff]  ;;  %v7101_v13 = vld [vmem:[#allocation4_spill] sm:$0xff] }
 0x382   :  { %v3466_v11 = vpack.i.bf16 %v5181_v59, %v5099_v34  ;;  %3472 = vrot.lane.b32.xlu2 %v3471_v14, %s3561_s6  ;;  %v7093_v14 = vld [vmem:[#allocation9_spill] sm:$0xff]  ;;  %v7094_v29 = vmax.f32 %v4929_v18, 0.0  ;;  %v7096_v9 = vmax.f32 %v5006_v46, 0.0  ;;  %v7100_v63 = vmax.f32 %v4997_v40, 0.0 }
 0x383   :  { %v7102_v18 = vmax.f32 %v5024_v61, 0.0  ;;  %v7104_v40 = vmax.f32 %v5018_v4, 0.0  ;;  %v1508_v4 = vrot.slane %v5036_v8, 1  ;;  %v1514_v61 = vrot.slane %v5176_v3, 1 }
 0x384   :  { %3467 = vrot.lane.b32.xlu1 %v3466_v11, %s3561_s6  ;;  %v5246_v52 = vmul.f32 %v7094_v29, %v7093_v14  ;;  %v5251_v12 = vmul.f32 %v7096_v9, %v7095_v37  ;;  %v7098_v11 = vmax.f32 %v5015_v36, 0.0  ;;  %v1424_v29 = vrot.slane %v5036_v8, 7  ;;  %v7103_v9 = vld [vmem:[#allocation6_spill] sm:$0xff] }
 0x385   :  { %v5266_v14 = vmul.f32 %v7102_v18, %v7101_v13  ;;  %v3521_v36 = vpack.i.bf16 %v5241_v56, %v5094_v25  ;;  %v1428_v37 = vrot.slane %v5181_v59, 7  ;;  %v6964_v46 = vrot.slane %v5186_v17, 7 }
 0x386   :  { %v5256_v47 = vmul.f32 %v7098_v11, %v7097_v60  ;;  %v5278_v60 = vmul.f32 %v7104_v40, %v7103_v9  ;;  %v1422_v9 = vrot.slane %v5079_v22, 7  ;;  %v1430_v11 = vrot.slane %v5176_v3, 7 }
 0x387   :  { %v1518_v13 = vrot.slane %v5186_v17, 1  ;;  %v1426_v18 = vrot.slane %v4938_v48, 7  ;;  %v1510_v8 = vrot.slane %v4938_v48, 1  ;;  %v7105_v3 = vrot.slane %v4935_v39, 1 }
 0x388   :  { %3492 = vrot.lane.b32.xlu0 %v3491_v38, %s3561_s6  ;;  %v7099_v38 = vld [vmem:[#allocation35_spill] sm:$0xff] }
 0x389   :  { %v5261_v1 = vmul.f32 %v7100_v63, %v7099_v38  ;;  %v1451_v63 = vlaneseq  ;;  %v1432_v38 = vrot.slane %v5138_v42, 7 }
 0x38a   :  { %3487 = vrot.lane.b32.xlu2 %v3486_v26, %s3561_s6  ;;  %v7106_v26 = vrot.slane %v5033_v30, 7 }
 0x38b   :  { %v5292_v40 = vshrl.u32 %v1451_v63, 7  ;;  %v1506_v63 = vrot.slane %v5079_v22, 1 }
 0x38c   :  { %3482 = vrot.lane.b32.xlu1 %v3481_v10, %s3561_s6  ;;  %v7107_v48 = vmov %v7106_v26 }
 0x38d   :  { %vm1453_vm8 = vcmp.lt.s32.totalorder %v5292_v40, 1  ;;  %vm1535_vm9 = vcmp.lt.s32.totalorder %v5292_v40, 7 }
 0x38e   :  { %v5312_v55 = vsel %vm1535_vm9, %v1508_v4, %v7105_v3  ;;  %v5318_v58 = vsel %vm1453_vm8, %v7106_v26, %v1424_v29  ;;  %v5324_v22 = vsel %vm1453_vm8, %v1422_v9, %v7107_v48  ;;  %v5337_v26 = vsel %vm1453_vm8, %v1429_v41, %v1430_v11 }
 0x38f   :  { %v5343_v48 = vsel %vm1453_vm8, %v1428_v37, %v1429_v41  ;;  %v5349_v28 = vsel %vm1535_vm9, %v1514_v61, %v6963_v21  ;;  %v5363_v41 = vsel %vm1453_vm8, %v1433_v50, %v6964_v46  ;;  %v7114_v46 = vrot.slane %v5099_v34, 1 }
 0x390   :  { %3507 = vrot.lane.b32.xlu0 %v3506_v15, %s3561_s6  ;;  %v7108_v15 = vrot.slane %v5033_v30, 1  ;;  %7109 = vst [vmem:[#allocation5_spill] sm:$0xff] %v5363_v41 }
 0x391   :  { %v5387_v10 = vsel %vm1535_vm9, %v1510_v8, %v7114_v46  ;;  %v7118_v46 = vrot.slane %v5033_v30, 1  ;;  %v7123_v30 = vrot.slane %v5076_v23, 1 }
 0x392   :  { %v5331_v3 = vsel %vm1535_vm9, %v7108_v15, %v1508_v4  ;;  %v5355_v4 = vsel %vm1535_vm9, %v6962_v35, %v1514_v61  ;;  %v5369_v15 = vsel %vm1453_vm8, %v1432_v38, %v1433_v50  ;;  %v5375_v61 = vsel %vm1535_vm9, %v1518_v13, %v6965_v51 }
 0x393   :  { %7110 = vst [vmem:[#allocation2_spill] sm:$0xff] %v5369_v15  ;;  %v7112_v35 = vrot.slane %v5108_v62, 1  ;;  %v7115_v50 = vrot.slane %v4935_v39, 7 }
 0x394   :  { %7111 = vst [vmem:[#allocation12_spill] sm:$0xff] %v5375_v61 }
 0x395   :  { %v5381_v21 = vsel %vm1535_vm9, %v7112_v35, %v1518_v13  ;;  %v5393_v15 = vsel %vm1453_vm8, %v7115_v50, %v1426_v18  ;;  %v7116_v51 = vmov %v7115_v50  ;;  %v7117_v35 = vrot.slane %v4935_v39, 1 }
 0x396   :  { %7113 = vst [vmem:[#allocation15_spill] sm:$0xff] %v5381_v21  ;;  %v5399_v61 = vsel %vm1453_vm8, %v1424_v29, %v7116_v51  ;;  %v5411_v21 = vsel %vm1535_vm9, %v1506_v63, %v7118_v46  ;;  %v7120_v50 = vrot.slane %v5076_v23, 7  ;;  %v7122_v39 = vrot.slane %v5241_v56, 7 }
 0x397   :  { %v5405_v13 = vsel %vm1535_vm9, %v7117_v35, %v1510_v8  ;;  %7119 = vst [vmem:[#allocation10_spill] sm:$0xff] %v5411_v21  ;;  %v5431_v8 = vsel %vm1535_vm9, %v7123_v30, %v1506_v63  ;;  %v7125_v35 = vrot.slane %v5091_v27, 1  ;;  %v7126_v46 = vrot.slane %v5088_v7, 1 }
 0x398   :  { %v5417_v41 = vsel %vm1453_vm8, %v7120_v50, %v1422_v9  ;;  %v7121_v51 = vmov %v7120_v50  ;;  %7124 = vst [vmem:[#allocation13_spill] sm:$0xff] %v5431_v8  ;;  %v1415_v50 = vrot.slane %v5203_v2, 7  ;;  %v1499_v21 = vrot.slane %v5203_v2, 1  ;;  %3522 = vrot.lane.b32.xlu0 %v3521_v36, %s3561_s6 }
 0x399   :  { %v5425_v29 = vsel %vm1453_vm8, %v7122_v39, %v7121_v51  ;;  %v5439_v9 = vsel %vm1535_vm9, %v7126_v46, %v7125_v35  ;;  %v7128_v51 = vrot.slane %v5105_v5, 7  ;;  %v1516_v8 = vrot.slane %v5138_v42, 1 }
 0x39a   :  { %7127 = vst [vmem:[#allocation29_spill] sm:$0xff] %v5439_v9  ;;  %v7130_v35 = vrot.slane %v5099_v34, 7  ;;  %v7132_v9 = vpack.i.bf16 %v5088_v7, %v5203_v2  ;;  %v1524_v36 = vrot.slane %v5233_v33, 1 }
 0x39b   :  { %v5447_v39 = vsel %vm1453_vm8, %v7128_v51, %v1432_v38  ;;  %v7129_v63 = vmov %v7128_v51  ;;  %v7133_v38 = vrot.slane %v5088_v7, 7 }
 0x39c   :  { %v5453_v30 = vsel %vm1453_vm8, %v1430_v11, %v7129_v63  ;;  %v5460_v46 = vsel %vm1453_vm8, %v7130_v35, %v1428_v37  ;;  %3502 = vrot.lane.b32.xlu2 %v7132_v9, %s3561_s6  ;;  %v7134_v11 = vrot.slane %v5085_v43, 7  ;;  %v7135_v37 = vrot.slane %v5088_v7, 1 }
 0x39d   :  { %7131 = vst [vmem:[#allocation31_spill] sm:$0xff] %v5460_v46  ;;  %v5470_v51 = vsel %vm1453_vm8, %v1415_v50, %v7133_v38  ;;  %v7136_v2 = vmov %v7130_v35  ;;  %v7138_v35 = vpack.i.bf16 %v5213_v32, %v5111_v54  ;;  %v1528_v46 = vrot.slane %v5251_v12, 1 }
 0x39e   :  { %v5476_v42 = vsel %vm1453_vm8, %v7134_v11, %v1415_v50  ;;  %v5482_v63 = vsel %vm1535_vm9, %v1499_v21, %v7135_v37  ;;  %v5488_v9 = vsel %vm1453_vm8, %v1426_v18, %v7136_v2  ;;  %v7139_v50 = vrot.slane %v5108_v62, 1 }
 0x39f   :  { %7137 = vst [vmem:[#allocation39_spill] sm:$0xff] %v5488_v9  ;;  %3497 = vrot.lane.b32.xlu1 %v7138_v35, %s3561_s6  ;;  %v7140_v11 = vrot.slane %v5105_v5, 1  ;;  %v1512_v18 = vrot.slane %v5181_v59, 1  ;;  %v1438_v2 = vrot.slane %v5208_v20, 7  ;;  %v1442_v62 = vrot.slane %v5261_v1, 7 }
 0x3a0   :  { %v5499_v38 = vsel %vm1535_vm9, %v1516_v8, %v7139_v50  ;;  %v1444_v9 = vrot.slane %v5251_v12, 7  ;;  %v7142_v50 = vrot.slane %v5102_v49, 1  ;;  %v7148_v49 = vrot.slane %v5233_v33, 7 }
 0x3a1   :  { %v5505_v37 = vsel %vm1535_vm9, %v7140_v11, %v1516_v8  ;;  %v7144_v8 = vrot.slane %v5099_v34, 1  ;;  %v7146_v11 = vrot.slane %v5117_v53, 7  ;;  %v7151_v34 = vrot.slane %v5121_v16, 1 }
 0x3a2   :  { %7141 = vst [vmem:[#allocation8_spill] sm:$0xff] %v5505_v37  ;;  %v5517_v5 = vsel %vm1535_vm9, %v1512_v18, %v7142_v50 }
 0x3a3   :  { %7143 = vst [vmem:[#allocation11_spill] sm:$0xff] %v5517_v5  ;;  %v5523_v59 = vsel %vm1535_vm9, %v7144_v8, %v1512_v18  ;;  %v5529_v35 = vsel %vm1453_vm8, %v1438_v2, %v7146_v11  ;;  %v7149_v37 = vmov %v7146_v11  ;;  %v5544_v18 = vsel %vm1535_vm9, %v1524_v36, %v7151_v34 }
 0x3a4   :  { %7145 = vst [vmem:[#allocation18_spill] sm:$0xff] %v5523_v59  ;;  %v5538_v50 = vsel %vm1453_vm8, %v7149_v37, %v7148_v49  ;;  %v7153_v8 = vrot.slane %v5117_v53, 1  ;;  %v7155_v59 = vrot.slane %v5124_v44, 7  ;;  %v7159_v34 = vrot.slane %v5127_v0, 1 }
 0x3a5   :  { %7147 = vst [vmem:[#allocation16_spill] sm:$0xff] %v5529_v35  ;;  %v1449_v35 = vrot.slane %v5133_v19, 7 }
 0x3a6   :  { %7150 = vst [vmem:[#allocation20_spill] sm:$0xff] %v5538_v50  ;;  %v5550_v11 = vsel %vm1535_vm9, %v7153_v8, %v1524_v36  ;;  %v5556_v5 = vsel %vm1453_vm8, %v7155_v59, %v1444_v9  ;;  %v7157_v37 = vmov %v7155_v59  ;;  %v7161_v36 = vrot.slane %v5124_v44, 1 }
 0x3a7   :  { %7152 = vst [vmem:[#allocation24_spill] sm:$0xff] %v5544_v18  ;;  %v5562_v49 = vsel %vm1453_vm8, %v1442_v62, %v7157_v37  ;;  %v5568_v18 = vsel %vm1535_vm9, %v1528_v46, %v7159_v34  ;;  %v7163_v59 = vrot.slane %v5085_v43, 1  ;;  %v1413_v37 = vrot.slane %v5191_v31, 7 }
 0x3a8   :  { %7154 = vst [vmem:[#allocation22_spill] sm:$0xff] %v5550_v11  ;;  %v5574_v8 = vsel %vm1535_vm9, %v7161_v36, %v1528_v46  ;;  %v1450_v46 = vrot.slane %v5266_v14, 7  ;;  %v1533_v36 = vrot.slane %v5133_v19, 1  ;;  %v7167_v34 = vrot.slane %v5082_v6, 7 }
 0x3a9   :  { %7156 = vst [vmem:[#allocation26_spill] sm:$0xff] %v5556_v5  ;;  %v5580_v5 = vsel %vm1535_vm9, %v7163_v59, %v1499_v21  ;;  %v7165_v21 = vpack.i.bf16 %v5233_v33, %v5117_v53  ;;  %v7166_v59 = vrot.slane %v5085_v43, 7 }
 0x3aa   :  { %7158 = vst [vmem:[#allocation28_spill] sm:$0xff] %v5562_v49  ;;  %v1497_v49 = vrot.slane %v5191_v31, 1  ;;  %v5604_v11 = vsel %vm1453_vm8, %v7167_v34, %v1413_v37 }
 0x3ab   :  { %7160 = vst [vmem:[#allocation36_spill] sm:$0xff] %v5568_v18  ;;  %v1448_v18 = vrot.slane %v5278_v60, 7  ;;  %3517 = vrot.lane.b32.xlu2 %v7165_v21, %s3561_s6  ;;  %v5598_v31 = vsel %vm1453_vm8, %v1413_v37, %v7166_v59  ;;  %v7170_v21 = vrot.slane %v5082_v6, 1  ;;  %v7172_v59 = vpack.i.bf16 %v5246_v52, %v5091_v27 }
 0x3ac   :  { %7162 = vst [vmem:[#allocation38_spill] sm:$0xff] %v5574_v8  ;;  %v7168_v8 = vrot.slane %v5085_v43, 1  ;;  %v7173_v37 = vpack.i.bf16 %v5256_v47, %v5127_v0  ;;  %v7174_v43 = vmov %v7167_v34  ;;  %v7182_v6 = vrot.slane %v5114_v57, 7 }
 0x3ad   :  { %7164 = vst [vmem:[#allocation7_spill] sm:$0xff] %v5580_v5  ;;  %v5616_v50 = vsel %vm1535_vm9, %v7170_v21, %v1497_v49  ;;  %3512 = vrot.lane.b32.xlu1 %v7172_v59, %s3561_s6 }
 0x3ae   :  { %v5610_v5 = vsel %vm1535_vm9, %v1497_v49, %v7168_v8  ;;  %7171 = vst [vmem:[#allocation3_spill] sm:$0xff] %v5616_v50  ;;  %3537 = vrot.lane.b32.xlu0 %v7173_v37, %s3561_s6  ;;  %v7175_v8 = vrot.slane %v5196_v45, 7  ;;  %v7177_v49 = vmov %v7170_v21  ;;  %v7178_v21 = vrot.slane %v5196_v45, 1 }
 0x3af   :  { %7169 = vst [vmem:[#allocation40_spill] sm:$0xff] %v5610_v5  ;;  %v5644_v50 = vsel %vm1453_vm8, %v1449_v35, %v1450_v46  ;;  %v5648_v37 = vsel %vm1453_vm8, %v1448_v18, %v1449_v35  ;;  %v1534_v5 = vrot.slane %v5266_v14, 1 }
 0x3b0   :  { %v5632_v34 = vsel %vm1453_vm8, %v7175_v8, %v7174_v43  ;;  %v5640_v59 = vsel %vm1535_vm9, %v7178_v21, %v7177_v49  ;;  %7180 = vst [vmem:[#allocation17_spill] sm:$0xff] %v5644_v50  ;;  %v1436_v43 = vrot.slane %v5213_v32, 7  ;;  %v5656_v8 = vsel %vm1453_vm8, %v7182_v6, %v1438_v2 }
 0x3b1   :  { %7176 = vst [vmem:[#allocation19_spill] sm:$0xff] %v5632_v34  ;;  %v1522_v49 = vrot.slane %v5208_v20, 1  ;;  %v7183_v21 = vrot.slane %v5111_v54, 7  ;;  %v7184_v50 = vrot.slane %v5186_v17, 7  ;;  %v5671_v34 = vsel %vm1535_vm9, %v1534_v5, 0.0 }
 0x3b2   :  { %7179 = vst [vmem:[#allocation21_spill] sm:$0xff] %v5640_v59  ;;  %v1418_v59 = vrot.slane %v5246_v52, 7  ;;  %v5675_v2 = vsel %vm1535_vm9, %v1533_v36, %v1534_v5  ;;  %v7187_v20 = vmov %v7182_v6  ;;  %v7189_v6 = vrot.slane %v5117_v53, 1 }
 0x3b3   :  { %7181 = vst [vmem:[#allocation23_spill] sm:$0xff] %v5648_v37  ;;  %v5665_v35 = vsel %vm1453_vm8, %v7184_v50, %v7183_v21  ;;  %v1520_v37 = vrot.slane %v5213_v32, 1  ;;  %v5681_v17 = vsel %vm1453_vm8, %v1436_v43, %v7187_v20  ;;  %v7188_v50 = vmov %v7183_v21 }
 0x3b4   :  { %7185 = vst [vmem:[#allocation32_spill] sm:$0xff] %v5665_v35  ;;  %v5687_v32 = vsel %vm1453_vm8, %v7188_v50, %v1436_v43  ;;  %v5693_v21 = vsel %vm1535_vm9, %v1522_v49, %v7189_v6  ;;  %v7190_v5 = vrot.slane %v5114_v57, 1  ;;  %v7192_v43 = vrot.slane %v5111_v54, 1 }
 0x3b5   :  { %7186 = vst [vmem:[#allocation30_spill] sm:$0xff] %v5675_v2  ;;  %v7194_v50 = vrot.slane %v5241_v56, 7  ;;  %v7195_v6 = vrot.slane %v5094_v25, 7  ;;  %v1504_v54 = vrot.slane %v5241_v56, 1  ;;  %v7201_v56 = vrot.slane %v5127_v0, 7 }
 0x3b6   :  { %v5699_v35 = vsel %vm1535_vm9, %v7190_v5, %v1522_v49  ;;  %v7191_v20 = vmov %v7190_v5  ;;  %v5711_v53 = vsel %vm1535_vm9, %v7192_v43, %v1520_v37 }
 0x3b7   :  { %v5705_v2 = vsel %vm1535_vm9, %v1520_v37, %v7191_v20  ;;  %7193 = vst [vmem:[#allocation34_spill] sm:$0xff] %v5711_v53  ;;  %v5719_v49 = vsel %vm1453_vm8, %v7195_v6, %v7194_v50  ;;  %v7196_v57 = vmov %v7195_v6  ;;  %v7198_v20 = vrot.slane %v5091_v27, 7 }
 0x3b8   :  { %v5725_v5 = vsel %vm1453_vm8, %v1418_v59, %v7196_v57  ;;  %v7200_v53 = vrot.slane %v5088_v7, 7  ;;  %v1502_v6 = vrot.slane %v5246_v52, 1  ;;  %v1446_v57 = vrot.slane %v5256_v47, 7 }
 0x3b9   :  { %7197 = vst [vmem:[#allocation25_spill] sm:$0xff] %v5725_v5  ;;  %v5732_v37 = vsel %vm1453_vm8, %v7198_v20, %v1418_v59  ;;  %v7199_v43 = vmov %v7198_v20  ;;  %v5748_v5 = vsel %vm1453_vm8, %v1444_v9, %v7201_v56  ;;  %v7202_v59 = vpack.i.bf16 %v5251_v12, %v5124_v44 }
 0x3ba   :  { %v5740_v50 = vsel %vm1453_vm8, %v7200_v53, %v7199_v43  ;;  %v7203_v7 = vrot.slane %v5076_v23, 1  ;;  %v7204_v52 = vrot.slane %v5094_v25, 1  ;;  %v1530_v9 = vrot.slane %v5256_v47, 1 }
 0x3bb   :  { %3532 = vrot.lane.b32.xlu2 %v7202_v59, %s3561_s6  ;;  %v7205_v43 = vrot.slane %v5121_v16, 7  ;;  %v7207_v23 = vpack.i.bf16 %v5261_v1, %v5121_v16  ;;  %v3562_v56 = vmov 0.0   ;;  %v7209_v47 = vrot.slane %v5091_v27, 1 }
 0x3bc   :  { %v5758_v53 = vsel %vm1535_vm9, %v1504_v54, %v7203_v7  ;;  %v5764_v20 = vsel %vm1535_vm9, %v7204_v52, %v1504_v54  ;;  %1618 = vrot.lane.b32.xlu0 %v3562_v56, %s3561_s6  ;;  %v7208_v59 = vmov %v7204_v52  ;;  %v7210_v7 = vrot.slane %v5127_v0, 7 }
 0x3bd   :  { %v5771_v12 = vsel %vm1453_vm8, %v7205_v43, %v1442_v62  ;;  %3527 = vrot.lane.b32.xlu1 %v7207_v23, %s3561_s6  ;;  %v5782_v54 = vsel %vm1535_vm9, %v1502_v6, %v7208_v59  ;;  %v5788_v62 = vsel %vm1535_vm9, %v7209_v47, %v1502_v6  ;;  %v1526_v43 = vrot.slane %v5261_v1, 1 }
 0x3be   :  { %7206 = vst [vmem:[#allocation27_spill] sm:$0xff] %v5771_v12  ;;  %v5794_v52 = vsel %vm1453_vm8, %v7210_v7, %v1446_v57  ;;  %v7211_v25 = vrot.slane %v5130_v24, 1  ;;  %v7212_v27 = vrot.slane %v5127_v0, 1  ;;  %v7213_v56 = vrot.slane %v5121_v16, 7 }
 0x3bf   :  { %v7214_v59 = vrot.slane %v5233_v33, 7  ;;  %v5819_v1 = vsel %vm1453_vm8, %v1450_v46, 0.0  ;;  %v7217_v7 = vrot.slane %v5124_v44, 1  ;;  %v1447_v33 = vrot.slane %v5130_v24, 7 }
 0x3c0   :  { %v5801_v23 = vsel %vm1535_vm9, %v1530_v9, %v7211_v25  ;;  %v5807_v6 = vsel %vm1535_vm9, %v7212_v27, %v1530_v9  ;;  %7216 = vst [vmem:[#allocation14_spill] sm:$0xff] %v5819_v1  ;;  %v7219_v9 = vrot.slane %v5121_v16, 1  ;;  %v1532_v27 = vrot.slane %v5278_v60, 1 }
 0x3c1   :  { %v5815_v47 = vsel %vm1453_vm8, %v7214_v59, %v7213_v56  ;;  %v5825_v0 = vsel %vm1535_vm9, %v1526_v43, %v7217_v7  ;;  %v5837_v46 = vsel %vm1453_vm8, %v1447_v33, %v1448_v18  ;;  %v5841_v44 = vsel %vm1453_vm8, %v1446_v57, %v1447_v33  ;;  %v3407_v18 = vld [vmem:[%s6916_s9 + $0x58] sm:$0xff]  ;;  %v3412_v7 = vld [vmem:[%s6916_s9 + $0x80] sm:$0xff] }
 0x3c2   :  { %7215 = vst [vmem:[#allocation33_spill] sm:$0xff] %v5815_v47  ;;  %v5831_v25 = vsel %vm1535_vm9, %v7219_v9, %v1526_v43  ;;  %v5845_v56 = vsel %vm1535_vm9, %v1532_v27, %v1533_v36  ;;  %v7224_v16 = vrot.slane %v5130_v24, 1  ;;  %v7226_v59 = vpack.i.bf16 %v5266_v14, %v5133_v19  ;;  %v3415_v36 = vld [vmem:[%s6916_s9 + $0x98] sm:$0xff]  ;;  %2602 = vmatpush.bf16.msrb.mxu2 %v3407_v18  ;;  %v3414_v19 = vld [vmem:[%s6916_s9 + $0x90] sm:$0xff]  ;;  %v3413_v14 = vld [vmem:[%s6916_s9 + $0x88] sm:$0xff] }
 0x3c3   :  { %7218 = vst [vmem:[#allocation9_spill] sm:$0xff] %v5825_v0  ;;  %v7227_v57 = vpack.i.bf16 %v5278_v60, %v5130_v24  ;;  %3433 = vmatpush.bf16.msra.mxu1 %v3415_v36  ;;  %2187 = vmatpush.bf16.msra.mxu0 %v3415_v36  ;;  %v3411_v33 = vld [vmem:[%s6916_s9 + $0x78] sm:$0xff] }
 0x3c4   :  { %7220 = vst [vmem:[#allocation37_spill] sm:$0xff] %v5831_v25  ;;  %v5851_v43 = vsel %vm1535_vm9, %v7224_v16, %v1532_v27  ;;  %3547 = vrot.lane.b32.xlu2 %v7226_v59, %s3561_s6  ;;  %v3419_v27 = vld [vmem:[%s6916_s9 + $0xb8] sm:$0xff] }
 0x3c5   :  { %7221 = vst [vmem:[#allocation41_spill] sm:$0xff] %v5837_v46  ;;  %3542 = vrot.lane.b32.xlu1 %v7227_v57, %s3561_s6  ;;  %3441 = vmatpush.bf16.msrb.mxu3 %v3419_v27  ;;  %v3410_v57 = vld [vmem:[%s6916_s9 + $0x70] sm:$0xff] }
 0x3c6   :  { %7222 = vst [vmem:[#allocation35_spill] sm:$0xff] %v5841_v44  ;;  %v7252_v46 = vld [vmem:[#allocation28_spill] sm:$0xff] }
 0x3c7   :  { %7223 = vst [vmem:[#allocation4_spill] sm:$0xff] %v5845_v56  ;;  %3434 = vmatpush.bf16.msra.mxu1 %v3414_v19  ;;  %2188 = vmatpush.bf16.msra.mxu0 %v3414_v19  ;;  %v3418_v19 = vld [vmem:[%s6916_s9 + $0xb0] sm:$0xff]  ;;  %v7251_v56 = vld [vmem:[#allocation26_spill] sm:$0xff] }
 0x3c8   :  { %7225 = vst [vmem:[#allocation6_spill] sm:$0xff] %v5851_v43 }
 0x3c9   :  { %3442 = vmatpush.bf16.msrb.mxu3 %v3418_v19 }
 0x3cb   :  { %3435 = vmatpush.bf16.msra.mxu1 %v3413_v14  ;;  %2189 = vmatpush.bf16.msra.mxu0 %v3413_v14  ;;  %v3416_v14 = vld [vmem:[%s6916_s9 + $0xa0] sm:$0xff] }
 0x3cf   :  { %v3458_v24 = vpop.permute.xlu2 %3457  ;;  %3436 = vmatpush.bf16.msra.mxu1 %v3412_v7  ;;  %2190 = vmatpush.bf16.msra.mxu0 %v3412_v7 }
 0x3d0   :  { %v3460_v60 = vunpack.i.h.bf16 %v3458_v24  ;;  %v3459_v9 = vunpack.i.l.bf16 %v3458_v24 }
 0x3d2   :  { %v1754_v16 = vsel %vm959_vm4, %v5324_v22, %v3459_v9  ;;  %v1755_v59 = vsel %vm959_vm4, %v5318_v58, %v3460_v60  ;;  %v3409_v58 = vld [vmem:[%s6916_s9 + $0x68] sm:$0xff] }
 0x3d3   :  { %v1797_v18 = vpack.c.bf16 %v5331_v3, %v1754_v16  ;;  %v1798_v36 = vpack.c.bf16 %v5312_v55, %v1755_v59  ;;  %3437 = vmatpush.bf16.msra.mxu1 %v3411_v33  ;;  %2191 = vmatpush.bf16.msra.mxu0 %v3411_v33  ;;  %v3417_v55 = vld [vmem:[%s6916_s9 + $0xa8] sm:$0xff]  ;;  %v3408_v3 = vld [vmem:[%s6916_s9 + $0x60] sm:$0xff]  ;;  %v3427_v59 = vld [vmem:[%s6916_s9 + $0xf8] sm:$0xff] }
 0x3d4   :  { %3443 = vmatpush.bf16.msrb.mxu3 %v3417_v55 }
 0x3d7   :  { %3438 = vmatpush.bf16.msra.mxu1 %v3410_v57  ;;  %2192 = vmatpush.bf16.msra.mxu0 %v3410_v57  ;;  %v3431_v57 = vld [vmem:[%s6916_s9 + $0x118] sm:$0xff] }
 0x3d8   :  { %3444 = vmatpush.bf16.msrb.mxu3 %v3416_v14 }
 0x3db   :  { %3439 = vmatpush.bf16.msra.mxu1 %v3409_v58  ;;  %2193 = vmatpush.bf16.msra.mxu0 %v3409_v58 }
 0x3dc   :  { %2813 = vmatpush.bf16.msra.mxu3 %v3427_v59 }
 0x3dd   :  { %v3463_v22 = vpop.permute.xlu0 %3462 }
 0x3de   :  { %v3465_v7 = vunpack.i.h.bf16 %v3463_v22  ;;  %v3464_v24 = vunpack.i.l.bf16 %v3463_v22  ;;  %v1939_v22 = vunpack.c.l.b16 %v1797_v18 }
 0x3df   :  { %3440 = vmatpush.bf16.msra.mxu1 %v3408_v3  ;;  %2194 = vmatpush.bf16.msra.mxu0 %v3408_v3  ;;  %v1940_v3 = vunpack.c.h.b16 %v1797_v18  ;;  %v7231_v18 = vld [vmem:[#allocation15_spill] sm:$0xff] }
 0x3e0   :  { %v1756_v60 = vsel %vm959_vm4, %v5399_v61, %v3464_v24  ;;  %v1757_v9 = vsel %vm959_vm4, %v5393_v15, %v3465_v7  ;;  %v3473_v15 = vpop.permute.xlu2 %3472  ;;  %v1941_v7 = vunpack.c.l.b16 %v1798_v36 }
 0x3e1   :  { %v5911_v33 = vpack.c.bf16 %v5405_v13, %v1756_v60  ;;  %v5914_v16 = vpack.c.bf16 %v5387_v10, %v1757_v9  ;;  %v3475_v61 = vunpack.i.h.bf16 %v3473_v15  ;;  %v3474_v13 = vunpack.i.l.bf16 %v3473_v15 }
 0x3e2   :  { %v5928_v9 = vpack.c.b16 %v1941_v7, %v1939_v22  ;;  %v7232_v7 = vld [vmem:[#allocation13_spill] sm:$0xff] }
 0x3e3   :  { %2300 = vmatpush.bf16.msrb.mxu0 %v3419_v27  ;;  %2926 = vmatpush.bf16.msrb.mxu1 %v3431_v57  ;;  %v1761_v10 = vsel %vm959_vm4, %v5337_v26, %v3475_v61  ;;  %v1760_v58 = vsel %vm959_vm4, %v5343_v48, %v3474_v13  ;;  %v1942_v27 = vunpack.c.h.b16 %v1798_v36  ;;  %v7228_v26 = vld [vmem:[#allocation5_spill] sm:$0xff]  ;;  %v7229_v61 = vld [vmem:[#allocation2_spill] sm:$0xff] }
 0x3e4   :  { %v1804_v24 = vpack.c.bf16 %v5349_v28, %v1761_v10  ;;  %v1803_v60 = vpack.c.bf16 %v5355_v4, %v1760_v58  ;;  %v7230_v10 = vld [vmem:[#allocation12_spill] sm:$0xff] }
 0x3e5   :  { %v5930_v59 = vpack.c.b16 %v1942_v27, %v1940_v3  ;;  %v7233_v27 = vld [vmem:[#allocation10_spill] sm:$0xff] }
 0x3e7   :  { %2301 = vmatpush.bf16.msrb.mxu0 %v3418_v19 }
 0x3e8   :  { %v3488_v19 = vpop.permute.xlu2 %3487 }
 0x3e9   :  { %v3490_v57 = vunpack.i.h.bf16 %v3488_v19  ;;  %v3489_v15 = vunpack.i.l.bf16 %v3488_v19 }
 0x3eb   :  { %2302 = vmatpush.bf16.msrb.mxu0 %v3417_v55  ;;  %v1765_v48 = vsel %vm959_vm4, %v7228_v26, %v3490_v57  ;;  %v1764_v13 = vsel %vm959_vm4, %v7229_v61, %v3489_v15 }
 0x3ec   :  { %v5937_v4 = vpack.c.bf16 %v7230_v10, %v1765_v48  ;;  %v5940_v36 = vpack.c.bf16 %v7231_v18, %v1764_v13 }
 0x3ed   :  { %v3453_v28 = vpop.permute.xlu1 %3452 }
 0x3ee   :  { %v3455_v58 = vunpack.i.h.bf16 %v3453_v28  ;;  %v3454_v22 = vunpack.i.l.bf16 %v3453_v28 }
 0x3ef   :  { %2303 = vmatpush.bf16.msrb.mxu0 %v3416_v14 }
 0x3f0   :  { %v1752_v55 = vsel %vm959_vm4, %v5425_v29, %v3454_v22  ;;  %v1753_v14 = vsel %vm959_vm4, %v5417_v41, %v3455_v58 }
 0x3f1   :  { %v1795_v3 = vpack.c.bf16 %v7232_v7, %v1752_v55  ;;  %v1796_v19 = vpack.c.bf16 %v7233_v27, %v1753_v14  ;;  %v7235_v55 = vld [vmem:[#allocation29_spill] sm:$0xff] }
 0x3f2   :  { %v3478_v15 = vpop.permute.xlu0 %3477 }
 0x3f3   :  { %v1936_v26 = vunpack.c.h.b16 %v1795_v3  ;;  %v1938_v48 = vunpack.c.h.b16 %v1796_v19  ;;  %v3480_v13 = vunpack.i.h.bf16 %v3478_v15  ;;  %v3479_v18 = vunpack.i.l.bf16 %v3478_v15 }
 0x3f4   :  { %v1935_v43 = vunpack.c.l.b16 %v1795_v3  ;;  %v1937_v28 = vunpack.c.l.b16 %v1796_v19  ;;  %v1952_v15 = vunpack.c.h.b16 %v1803_v60 }
 0x3f5   :  { %v5952_v58 = vpack.c.b16 %v1938_v48, %v1936_v26  ;;  %v1763_v7 = vsel %vm959_vm4, %v5447_v39, %v3480_v13  ;;  %v1762_v3 = vsel %vm959_vm4, %v5453_v30, %v3479_v18  ;;  %v3426_v39 = vld [vmem:[%s6916_s9 + $0xf0] sm:$0xff]  ;;  %v1954_v30 = vunpack.c.h.b16 %v1804_v24 }
 0x3f6   :  { %v3503_v57 = vpop.permute.xlu2 %3502  ;;  %v5965_v27 = vpack.c.bf16 %v5499_v38, %v1763_v7  ;;  %v3468_v48 = vpop.permute.xlu1 %3467  ;;  %2814 = vmatpush.bf16.msra.mxu3 %v3426_v39  ;;  %v7241_v7 = vld [vmem:[#allocation16_spill] sm:$0xff] }
 0x3f7   :  { %v3505_v61 = vunpack.i.h.bf16 %v3503_v57  ;;  %v3504_v10 = vunpack.i.l.bf16 %v3503_v57  ;;  %7234 = vst [vmem:[#allocation5_spill] sm:$0xff] %v5952_v58  ;;  %3220 = vmatmul.msk.bf16.vlgmr.msrb.gmra.mxu3 %vm959_vm4, %v5952_v58  ;;  %v1953_v57 = vunpack.c.l.b16 %v1804_v24  ;;  %v5980_v13 = vpack.c.b16 %v1954_v30, %v1952_v15  ;;  %v7244_v15 = vld [vmem:[#allocation39_spill] sm:$0xff]  ;;  %v7245_v30 = vld [vmem:[#allocation24_spill] sm:$0xff] }
 0x3f8   :  { %v3470_v18 = vunpack.i.h.bf16 %v3468_v48 }
 0x3f9   :  { %v1746_v29 = vsel %vm959_vm4, %v5476_v42, %v3504_v10  ;;  %v1747_v41 = vsel %vm959_vm4, %v5470_v51, %v3505_v61  ;;  %v7236_v42 = vld [vmem:[#allocation8_spill] sm:$0xff]  ;;  %v5970_v51 = vpack.c.b16 %v1937_v28, %v1935_v43  ;;  %7239 = vst [vmem:[#allocation15_spill] sm:$0xff] %v5980_v13  ;;  %v3469_v28 = vunpack.i.l.bf16 %v3468_v48  ;;  %v7246_v48 = vld [vmem:[#allocation22_spill] sm:$0xff] }
 0x3fa   :  { %v5955_v22 = vpack.c.bf16 %v5482_v63, %v1746_v29  ;;  %v5958_v14 = vpack.c.bf16 %v7235_v55, %v1747_v41  ;;  %v5968_v19 = vpack.c.bf16 %v7236_v42, %v1762_v3  ;;  %v1951_v63 = vunpack.c.l.b16 %v1803_v60  ;;  %v3493_v10 = vpop.permute.xlu0 %3492  ;;  %v7240_v41 = vld [vmem:[#allocation20_spill] sm:$0xff] }
 0x3fb   :  { %7237 = vst [vmem:[#allocation2_spill] sm:$0xff] %v5970_v51  ;;  %2220 = vmatmul.bf16.vlgmr.msra.gmra.mxu1 %v5970_v51  ;;  %v3495_v60 = vunpack.i.h.bf16 %v3493_v10  ;;  %v3494_v29 = vunpack.i.l.bf16 %v3493_v10  ;;  %v7242_v3 = vrot.slane %v5196_v45, 7  ;;  %v1758_v39 = vsel %vm959_vm4, %v7244_v15, %v3469_v28  ;;  %v3406_v28 = vld [vmem:[%s6916_s9 + $0x50] sm:$0xff] }
 0x3fc   :  { %v5978_v26 = vpack.c.b16 %v1953_v57, %v1951_v63  ;;  %v7243_v63 = vld [vmem:[#allocation31_spill] sm:$0xff]  ;;  %2603 = vmatpush.bf16.msrb.mxu2 %v3406_v28  ;;  %v1925_v40 = vunpack.c.l.b16 %v5958_v14 }
 0x3fd   :  { %v1494_v42 = vsel %vm1453_vm8, 0.0, %v7242_v3  ;;  %v1759_v57 = vsel %vm959_vm4, %v7243_v63, %v3470_v18  ;;  %v1744_v3 = vsel %vm959_vm4, %v5604_v11, %v3494_v29  ;;  %v1745_v18 = vsel %vm959_vm4, %v5598_v31, %v3495_v60 }
 0x3fe   :  { %7238 = vst [vmem:[#allocation12_spill] sm:$0xff] %v5978_v26  ;;  %v1946_v11 = vunpack.c.h.b16 %v5914_v16  ;;  %v1959_v31 = vunpack.c.l.b16 %v5940_v36  ;;  %v1961_v60 = vunpack.c.l.b16 %v5937_v4  ;;  %v1924_v29 = vunpack.c.h.b16 %v5955_v22 }
 0x400   :  { %v6039_v47 = vpack.c.b16 %v1961_v60, %v1959_v31 }
 0x405   :  { %v3518_v38 = vpop.permute.xlu2 %3517 }
 0x406   :  { %v3520_v61 = vunpack.i.h.bf16 %v3518_v38  ;;  %v3519_v43 = vunpack.i.l.bf16 %v3518_v38 }
 0x407   :  { %3221 = vmatmul.msk.bf16.gmra.mxu3 %vm959_vm4, %v5930_v59 }
 0x408   :  { %v1771_v55 = vsel %vm959_vm4, %v7240_v41, %v3520_v61  ;;  %v1770_v24 = vsel %vm959_vm4, %v7241_v7, %v3519_v43  ;;  %v7247_v61 = vld [vmem:[#allocation11_spill] sm:$0xff]  ;;  %v7248_v43 = vld [vmem:[#allocation18_spill] sm:$0xff] }
 0x409   :  { %v5995_v38 = vpack.c.bf16 %v7245_v30, %v1771_v55  ;;  %v5998_v10 = vpack.c.bf16 %v7246_v48, %v1770_v24  ;;  %v6001_v41 = vpack.c.bf16 %v7247_v61, %v1759_v57  ;;  %v6004_v7 = vpack.c.bf16 %v7248_v43, %v1758_v39  ;;  %v7249_v55 = vld [vmem:[#allocation40_spill] sm:$0xff]  ;;  %v7250_v24 = vld [vmem:[#allocation7_spill] sm:$0xff] }
 0x40a   :  { %v6014_v63 = vpack.c.bf16 %v7249_v55, %v1744_v3  ;;  %v6017_v15 = vpack.c.bf16 %v7250_v24, %v1745_v18  ;;  %v1943_v57 = vunpack.c.l.b16 %v5911_v33  ;;  %v1945_v39 = vunpack.c.l.b16 %v5914_v16  ;;  %v3483_v24 = vpop.permute.xlu1 %3482 }
 0x40b   :  { %v1944_v30 = vunpack.c.h.b16 %v5911_v33  ;;  %v1926_v48 = vunpack.c.h.b16 %v5958_v14  ;;  %v3508_v33 = vpop.permute.xlu0 %3507  ;;  %v3485_v28 = vunpack.i.h.bf16 %v3483_v24  ;;  %v3484_v58 = vunpack.i.l.bf16 %v3483_v24  ;;  %2225 = vmatmul.bf16.gmra.mxu1 %v5928_v9 }
 0x40c   :  { %v1919_v43 = vunpack.c.l.b16 %v6014_v63  ;;  %v1921_v3 = vunpack.c.l.b16 %v6017_v15  ;;  %v6029_v51 = vpack.c.b16 %v1945_v39, %v1943_v57  ;;  %v3510_v26 = vunpack.i.h.bf16 %v3508_v33  ;;  %v7254_v57 = vld [vmem:[#allocation38_spill] sm:$0xff] }
 0x40d   :  { %v6031_v16 = vpack.c.b16 %v1946_v11, %v1944_v30  ;;  %v3509_v13 = vunpack.i.l.bf16 %v3508_v33  ;;  %v1742_v30 = vsel %vm959_vm4, %v1494_v42, %v3484_v58  ;;  %v7255_v11 = vld [vmem:[#allocation19_spill] sm:$0xff]  ;;  %v7256_v33 = vld [vmem:[#allocation21_spill] sm:$0xff]  ;;  %v7258_v58 = vrot.slane %v5196_v45, 1 }
 0x40e   :  { %v6037_v0 = vpack.c.b16 %v1921_v3, %v1919_v43  ;;  %v1743_v24 = vsel %vm959_vm4, %v7255_v11, %v3485_v28  ;;  %v1923_v45 = vunpack.c.l.b16 %v5955_v22  ;;  %v6078_v43 = vpack.c.b16 %v1926_v48, %v1924_v29  ;;  %v3404_v11 = vld [vmem:[%s6916_s9 + $0x40] sm:$0xff]  ;;  %v7260_v29 = vld [vmem:[#allocation23_spill] sm:$0xff] }
 0x40f   :  { %v1768_v31 = vsel %vm959_vm4, %v5681_v17, %v3509_v13  ;;  %v6068_v42 = vsel %vm1535_vm9, 0.0, %v7258_v58 }
 0x410   :  { %v6090_v48 = vpack.c.b16 %v1925_v40, %v1923_v45  ;;  %v7263_v40 = vld [vmem:[#allocation34_spill] sm:$0xff] }
 0x415   :  { %v3533_v61 = vpop.permute.xlu2 %3532 }
 0x416   :  { %v3535_v18 = vunpack.i.h.bf16 %v3533_v61  ;;  %v3534_v55 = vunpack.i.l.bf16 %v3533_v61  ;;  %v7253_v61 = vld [vmem:[#allocation36_spill] sm:$0xff] }
 0x417   :  { %3222 = vmatmul.msk.bf16.gmra.mxu3 %vm959_vm4, %v6031_v16 }
 0x418   :  { %v1775_v44 = vsel %vm959_vm4, %v7251_v56, %v3535_v18  ;;  %v1774_v25 = vsel %vm959_vm4, %v7252_v46, %v3534_v55  ;;  %v1785_v56 = vpack.c.bf16 %v7256_v33, %v1742_v30  ;;  %v7257_v18 = vld [vmem:[#allocation3_spill] sm:$0xff]  ;;  %v1769_v46 = vsel %vm959_vm4, %v5656_v8, %v3510_v26  ;;  %v3523_v30 = vpop.permute.xlu0 %3522 }
 0x419   :  { %v6042_v12 = vpack.c.bf16 %v7253_v61, %v1775_v44  ;;  %v6045_v39 = vpack.c.bf16 %v7254_v57, %v1774_v25  ;;  %v1786_v1 = vpack.c.bf16 %v7257_v18, %v1743_v24  ;;  %v6059_v25 = vpack.c.bf16 %v5693_v21, %v1769_v46  ;;  %v3405_v21 = vld [vmem:[%s6916_s9 + $0x48] sm:$0xff]  ;;  %v3498_v61 = vpop.permute.xlu1 %3497  ;;  %v7259_v18 = vld [vmem:[#allocation17_spill] sm:$0xff] }
 0x41a   :  { %v6062_v44 = vpack.c.bf16 %v5699_v35, %v1768_v31  ;;  %v1920_v8 = vunpack.c.h.b16 %v6014_v63  ;;  %v1922_v26 = vunpack.c.h.b16 %v6017_v15  ;;  %v1915_v17 = vunpack.c.l.b16 %v1785_v56  ;;  %2604 = vmatpush.bf16.msrb.mxu2 %v3405_v21  ;;  %v3425_v31 = vld [vmem:[%s6916_s9 + $0xe8] sm:$0xff] }
 0x41b   :  { %v1917_v13 = vunpack.c.l.b16 %v1786_v1  ;;  %v1916_v35 = vunpack.c.h.b16 %v1785_v56  ;;  %v1918_v3 = vunpack.c.h.b16 %v1786_v1  ;;  %v3500_v24 = vunpack.i.h.bf16 %v3498_v61  ;;  %2815 = vmatpush.bf16.msra.mxu3 %v3425_v31  ;;  %2230 = vmatmul.bf16.gmra.mxu1 %v6029_v51 }
 0x41c   :  { %v3499_v33 = vunpack.i.l.bf16 %v3498_v61  ;;  %v3525_v56 = vunpack.i.h.bf16 %v3523_v30  ;;  %v3524_v22 = vunpack.i.l.bf16 %v3523_v30  ;;  %v1947_v46 = vunpack.c.l.b16 %v6004_v7 }
 0x41d   :  { %v6080_v57 = vpack.c.b16 %v1917_v13, %v1915_v17  ;;  %v7261_v17 = vld [vmem:[#allocation30_spill] sm:$0xff]  ;;  %v1767_v21 = vsel %vm959_vm4, %v5687_v32, %v3500_v24  ;;  %v1962_v24 = vunpack.c.h.b16 %v5937_v4 }
 0x41e   :  { %v3548_v60 = vpop.permute.xlu2 %3547  ;;  %v6107_v45 = vpack.c.bf16 %v5705_v2, %v1767_v21  ;;  %v1751_v61 = vsel %vm959_vm4, %v5719_v49, %v3525_v56  ;;  %2605 = vmatpush.bf16.msrb.mxu2 %v3404_v11  ;;  %v1960_v2 = vunpack.c.h.b16 %v5940_v36  ;;  %v1950_v49 = vunpack.c.h.b16 %v6001_v41 }
 0x41f   :  { %v3550_v55 = vunpack.i.h.bf16 %v3548_v60  ;;  %v3549_v28 = vunpack.i.l.bf16 %v3548_v60  ;;  %2195 = vmatmul.bf16.vlgmr.msra.gmra.mxu0 %v6080_v57  ;;  %v7262_v60 = vld [vmem:[#allocation32_spill] sm:$0xff]  ;;  %v6127_v56 = vpack.c.b16 %v1918_v3, %v1916_v35  ;;  %v1982_v11 = vunpack.c.h.b16 %v6042_v12 }
 0x420   :  { %v3538_v36 = vpop.permute.xlu0 %3537 }
 0x421   :  { %v1781_v14 = vsel %vm959_vm4, %v7259_v18, %v3550_v55  ;;  %v1780_v1 = vsel %vm959_vm4, %v7260_v29, %v3549_v28  ;;  %v1766_v55 = vsel %vm959_vm4, %v7262_v60, %v3499_v33  ;;  %v6117_v18 = vpack.c.bf16 %v5758_v53, %v1751_v61  ;;  %v3513_v29 = vpop.permute.xlu1 %3512 }
 0x422   :  { %v6097_v58 = vpack.c.bf16 %v5671_v34, %v1781_v14  ;;  %v6100_v13 = vpack.c.bf16 %v7261_v17, %v1780_v1  ;;  %v6110_v28 = vpack.c.bf16 %v7263_v40, %v1766_v55  ;;  %v7264_v34 = vld [vmem:[#allocation25_spill] sm:$0xff]  ;;  %v1949_v33 = vunpack.c.l.b16 %v6001_v41 }
 0x423   :  { %v1750_v30 = vsel %vm959_vm4, %v7264_v34, %v3524_v22  ;;  %v1948_v14 = vunpack.c.h.b16 %v6004_v7  ;;  %v1980_v53 = vunpack.c.h.b16 %v6045_v39  ;;  %v1957_v22 = vunpack.c.l.b16 %v5965_v27 }
 0x424   :  { %v6120_v32 = vpack.c.bf16 %v5764_v20, %v1750_v30  ;;  %v1955_v20 = vunpack.c.l.b16 %v5968_v19  ;;  %v6133_v1 = vpack.c.b16 %v1949_v33, %v1947_v46  ;;  %v1956_v7 = vunpack.c.h.b16 %v5968_v19 }
 0x425   :  { %v6135_v4 = vpack.c.b16 %v1950_v49, %v1948_v14  ;;  %v1958_v41 = vunpack.c.h.b16 %v5965_v27  ;;  %v3515_v35 = vunpack.i.h.bf16 %v3513_v29  ;;  %v3514_v3 = vunpack.i.l.bf16 %v3513_v29 }
 0x426   :  { %v3540_v31 = vunpack.i.h.bf16 %v3538_v36  ;;  %v3539_v17 = vunpack.i.l.bf16 %v3538_v36  ;;  %v6139_v21 = vpack.c.b16 %v1957_v22, %v1955_v20  ;;  %v6143_v55 = vpack.c.b16 %v1962_v24, %v1960_v2 }
 0x427   :  { %v6141_v60 = vpack.c.b16 %v1958_v41, %v1956_v7  ;;  %v1971_v40 = vunpack.c.l.b16 %v5998_v10  ;;  %v1749_v46 = vsel %vm959_vm4, %v5732_v37, %v3515_v35  ;;  %v1748_v19 = vsel %vm959_vm4, %v5740_v50, %v3514_v3  ;;  %v7267_v7 = vld [vmem:[#allocation14_spill] sm:$0xff]  ;;  %3223 = vmatmul.msk.bf16.gmra.mxu3 %vm959_vm4, %v6135_v4 }
 0x428   :  { %v1777_v27 = vsel %vm959_vm4, %v5794_v52, %v3540_v31  ;;  %v1776_v61 = vsel %vm959_vm4, %v5748_v5, %v3539_v17  ;;  %v6155_v34 = vpack.c.bf16 %v5782_v54, %v1749_v46  ;;  %v6158_v30 = vpack.c.bf16 %v5788_v62, %v1748_v19  ;;  %v7269_v17 = vld [vmem:[#allocation33_spill] sm:$0xff] }
 0x429   :  { %v6161_v2 = vpack.c.bf16 %v5801_v23, %v1777_v27  ;;  %v6164_v37 = vpack.c.bf16 %v5807_v6, %v1776_v61  ;;  %v6172_v5 = vpack.c.b16 %v1922_v26, %v1920_v8  ;;  %v1973_v50 = vunpack.c.l.b16 %v5995_v38  ;;  %v7270_v27 = vld [vmem:[#allocation9_spill] sm:$0xff] }
 0x42a   :  { %v1972_v54 = vunpack.c.h.b16 %v5998_v10  ;;  %v1974_v62 = vunpack.c.h.b16 %v5995_v38  ;;  %v1994_v52 = vunpack.c.h.b16 %v6097_v58  ;;  %v1992_v23 = vunpack.c.h.b16 %v6100_v13  ;;  %v7271_v61 = vld [vmem:[#allocation37_spill] sm:$0xff] }
 0x42b   :  { %v1934_v6 = vunpack.c.h.b16 %v6117_v18  ;;  %v1932_v24 = vunpack.c.h.b16 %v6120_v32  ;;  %v1927_v63 = vunpack.c.l.b16 %v6158_v30  ;;  %v1929_v15 = vunpack.c.l.b16 %v6155_v34  ;;  %2235 = vmatmul.bf16.gmra.mxu1 %v6133_v1 }
 0x42c   :  { %v6184_v8 = vpack.c.b16 %v1973_v50, %v1971_v40  ;;  %v6186_v26 = vpack.c.b16 %v1974_v62, %v1972_v54  ;;  %v1930_v38 = vunpack.c.h.b16 %v6155_v34  ;;  %v1979_v14 = vunpack.c.l.b16 %v6045_v39 }
 0x42d   :  { %v1981_v49 = vunpack.c.l.b16 %v6042_v12  ;;  %v6191_v20 = vpack.c.b16 %v1982_v11, %v1980_v53  ;;  %v6201_v39 = vpack.c.b16 %v1929_v15, %v1927_v63  ;;  %v3430_v12 = vld [vmem:[%s6916_s9 + $0x110] sm:$0xff]  ;;  %v7268_v11 = vld [vmem:[#allocation27_spill] sm:$0xff]  ;;  %v1963_v46 = vunpack.c.l.b16 %v6110_v28 }
 0x42e   :  { %7265 = vst [vmem:[#allocation13_spill] sm:$0xff] %v6186_v26  ;;  %v1619_v33 = vpop.permute.xlu0 %1618  ;;  %v1965_v19 = vunpack.c.l.b16 %v6107_v45  ;;  %2927 = vmatpush.bf16.msrb.mxu1 %v3430_v12  ;;  %v1928_v62 = vunpack.c.h.b16 %v6158_v30 }
 0x42f   :  { %v3528_v10 = vpop.permute.xlu1 %3527  ;;  %7266 = vst [vmem:[#allocation10_spill] sm:$0xff] %v6191_v20  ;;  %v1741_v36 = vsel %vm959_vm4, 0.0, %v1619_v33  ;;  %v6196_v41 = vsel %vm959_vm4, %v7267_v7, %v1619_v33  ;;  %2200 = vmatmul.bf16.gmra.mxu0 %v6037_v0 }
 0x430   :  { %v3530_v22 = vunpack.i.h.bf16 %v3528_v10  ;;  %v3529_v29 = vunpack.i.l.bf16 %v3528_v10  ;;  %v1783_v35 = vpack.c.bf16 0.0, %v1741_v36  ;;  %v1784_v3 = vpack.c.bf16 %v6068_v42, %v1741_v36 }
 0x431   :  { %v1825_v31 = vpack.c.bf16 0.0, %v6196_v41  ;;  %v6223_v33 = vpack.c.b16 %v1965_v19, %v1963_v46  ;;  %v1967_v36 = vunpack.c.l.b16 %v6062_v44  ;;  %v1931_v46 = vunpack.c.l.b16 %v6120_v32  ;;  %v7289_v41 = vld [vmem:[#allocation12_spill] sm:$0xff] }
 0x432   :  { %v1773_v53 = vsel %vm959_vm4, %v7268_v11, %v3530_v22  ;;  %v1772_v40 = vsel %vm959_vm4, %v7269_v17, %v3529_v29  ;;  %v6214_v50 = vunpack.c.l.b16 %v1783_v35  ;;  %v6216_v54 = vunpack.c.h.b16 %v1783_v35 }
 0x433   :  { %v1816_v42 = vpack.c.bf16 %v7270_v27, %v1773_v53  ;;  %v1815_v34 = vpack.c.bf16 %v7271_v61, %v1772_v40  ;;  %v2409_v63 = vunpack.c.l.b16 %v1784_v3  ;;  %v2410_v15 = vunpack.c.h.b16 %v1784_v3 }
 0x434   :  { %7272 = vst [vmem:[#allocation29_spill] sm:$0xff] %v6214_v50  ;;  %v6221_v10 = vunpack.c.h.b16 %v1825_v31  ;;  %v1964_v22 = vunpack.c.h.b16 %v6110_v28  ;;  %v1966_v29 = vunpack.c.h.b16 %v6107_v45  ;;  %v1969_v3 = vunpack.c.l.b16 %v6059_v25 }
 0x435   :  { %7273 = vst [vmem:[#allocation8_spill] sm:$0xff] %v6216_v54  ;;  %v6229_v7 = vpack.c.b16 %v2409_v63, %v6214_v50  ;;  %v2412_v35 = vpack.c.b16 %v2410_v15, %v6216_v54  ;;  %v1968_v53 = vunpack.c.h.b16 %v6062_v44  ;;  %v1970_v28 = vunpack.c.h.b16 %v6059_v25  ;;  %v7276_v15 = vld [vmem:[#allocation41_spill] sm:$0xff] }
 0x436   :  { %7274 = vst [vmem:[#allocation20_spill] sm:$0xff] %v6221_v10  ;;  %v6235_v11 = vpack.c.b16 %v1966_v29, %v1964_v22  ;;  %v6239_v45 = vpack.c.b16 %v1981_v49, %v1979_v14  ;;  %v1933_v19 = vunpack.c.l.b16 %v6117_v18  ;;  %v6244_v27 = vpack.c.b16 %v1969_v3, %v1967_v36  ;;  %v7277_v14 = vld [vmem:[#allocation35_spill] sm:$0xff]  ;;  %v7279_v36 = vld [vmem:[#allocation4_spill] sm:$0xff]  ;;  %v7280_v3 = vld [vmem:[#allocation6_spill] sm:$0xff] }
 0x437   :  { %v3543_v12 = vpop.permute.xlu1 %3542  ;;  %3283 = vmatmul.msk.bf16.vlgmr.msrb.gmra.mxu2 %vm959_vm4, %v2412_v35  ;;  %v6246_v61 = vpack.c.b16 %v1970_v28, %v1968_v53  ;;  %v1991_v63 = vunpack.c.l.b16 %v6100_v13  ;;  %v1993_v44 = vunpack.c.l.b16 %v6097_v58  ;;  %v6258_v29 = vpack.c.b16 %v1994_v52, %v1992_v23  ;;  %v3424_v23 = vld [vmem:[%s6916_s9 + $0xe0] sm:$0xff] }
 0x438   :  { %7275 = vst [vmem:[#allocation16_spill] sm:$0xff] %v6239_v45  ;;  %v3545_v17 = vunpack.i.h.bf16 %v3543_v12  ;;  %v3544_v40 = vunpack.i.l.bf16 %v3543_v12  ;;  %v6254_v22 = vpack.c.b16 %v1933_v19, %v1931_v46  ;;  %v6266_v53 = vpack.c.b16 %v1930_v38, %v1928_v62  ;;  %2816 = vmatpush.bf16.msra.mxu3 %v3424_v23 }
 0x439   :  { %7278 = vst [vmem:[#allocation31_spill] sm:$0xff] %v6258_v29  ;;  %v6264_v13 = vpack.c.b16 %v1993_v44, %v1991_v63  ;;  %v6272_v28 = vpack.c.b16 %v1934_v6, %v1932_v24  ;;  %v1986_v58 = vunpack.c.h.b16 %v6161_v2  ;;  %v1984_v52 = vunpack.c.h.b16 %v6164_v37 }
 0x43a   :  { %v1779_v25 = vsel %vm959_vm4, %v7276_v15, %v3545_v17  ;;  %v1778_v49 = vsel %vm959_vm4, %v7277_v14, %v3544_v40  ;;  %v1975_v38 = vunpack.c.l.b16 %v1815_v34  ;;  %v1977_v62 = vunpack.c.l.b16 %v1816_v42  ;;  %v7286_v15 = vld [vmem:[#allocation15_spill] sm:$0xff] }
 0x43b   :  { %v1822_v35 = vpack.c.bf16 %v7279_v36, %v1779_v25  ;;  %v1821_v12 = vpack.c.bf16 %v7280_v3, %v1778_v49  ;;  %7281 = vst [vmem:[#allocation39_spill] sm:$0xff] %v6264_v13  ;;  %v1976_v17 = vunpack.c.h.b16 %v1815_v34  ;;  %v1978_v32 = vunpack.c.h.b16 %v1816_v42  ;;  %3224 = vmatmul.msk.bf16.gmra.mxu3 %vm959_vm4, %v7286_v15  ;;  %2240 = vmatmul.bf16.gmra.mxu1 %v7289_v41  ;;  %v3429_v49 = vld [vmem:[%s6916_s9 + $0x108] sm:$0xff]  ;;  %v3403_v36 = vld [vmem:[%s6916_s9 + $0x38] sm:$0xff] }
 0x43c   :  { %v1983_v18 = vunpack.c.l.b16 %v6164_v37  ;;  %v1985_v6 = vunpack.c.l.b16 %v6161_v2  ;;  %v6283_v24 = vpack.c.b16 %v1977_v62, %v1975_v38  ;;  %v6287_v46 = vpack.c.b16 %v1986_v58, %v1984_v52  ;;  %2928 = vmatpush.bf16.msrb.mxu1 %v3429_v49  ;;  %2489 = vmatpush.bf16.msra.mxu0 %v3403_v36  ;;  %v3401_v3 = vld [vmem:[%s6916_s9 + $0x28] sm:$0xff]  ;;  %v3400_v52 = vld [vmem:[%s6916_s9 + $0x20] sm:$0xff]  ;;  %v3399_v38 = vld [vmem:[%s6916_s9 + $0x18] sm:$0xff] }
 0x43d   :  { %v6285_v40 = vpack.c.b16 %v1978_v32, %v1976_v17  ;;  %v6293_v63 = vunpack.c.l.b16 %v1825_v31  ;;  %v1990_v44 = vunpack.c.h.b16 %v1822_v35  ;;  %v1988_v34 = vunpack.c.h.b16 %v1821_v12  ;;  %v3423_v31 = vld [vmem:[%s6916_s9 + $0xd8] sm:$0xff]  ;;  %v3398_v32 = vld [vmem:[%s6916_s9 + $0x10] sm:$0xff]  ;;  %v3421_v36 = vld [vmem:[%s6916_s9 + $0xc8] sm:$0xff] }
 0x43e   :  { %7283 = vst [vmem:[#allocation22_spill] sm:$0xff] %v6287_v46  ;;  %v6289_v19 = vpack.c.b16 %v1985_v6, %v1983_v18  ;;  %v1987_v37 = vunpack.c.l.b16 %v1821_v12  ;;  %v1989_v42 = vunpack.c.l.b16 %v1822_v35  ;;  %2817 = vmatpush.bf16.msra.mxu3 %v3423_v31  ;;  %v3422_v35 = vld [vmem:[%s6916_s9 + $0xd0] sm:$0xff]  ;;  %v7291_v6 = vld [vmem:[#allocation5_spill] sm:$0xff]  ;;  %v3396_v31 = vld [vmem:[%s6916_s9] sm:$0xff] }
 0x43f   :  { %2205 = vmatmul.bf16.gmra.mxu0 %v6090_v48  ;;  %7282 = vst [vmem:[#allocation24_spill] sm:$0xff] %v6285_v40  ;;  %v6303_v14 = vpack.c.b16 %v1990_v44, %v1988_v34  ;;  %v3397_v44 = vld [vmem:[%s6916_s9 + $0x8] sm:$0xff] }
 0x440   :  { %7284 = vst [vmem:[#allocation11_spill] sm:$0xff] %v6289_v19  ;;  %v6301_v25 = vpack.c.b16 %v1989_v42, %v1987_v37 }
 0x441   :  { %7285 = vst [vmem:[#allocation18_spill] sm:$0xff] %v6293_v63 }
 0x442   :  { %7287 = vst [vmem:[#allocation40_spill] sm:$0xff] %v6301_v25  ;;  %2818 = vmatpush.bf16.msra.mxu3 %v3422_v35 }
 0x443   :  { %7288 = vst [vmem:[#allocation7_spill] sm:$0xff] %v6303_v14 }
 0x446   :  { %2819 = vmatpush.bf16.msra.mxu3 %v3421_v36 }
 0x447   :  { %3284 = vmatmul.msk.bf16.gmra.mxu2 %vm959_vm4, %v6127_v56 }
 0x44b   :  { %3225 = vmatmul.msk.bf16.gmra.mxu3 %vm959_vm4, %v6141_v60  ;;  %2245 = vmatmul.bf16.gmra.mxu1 %v6139_v21 }
 0x44f   :  { %2210 = vmatmul.bf16.gmra.mxu0 %v6201_v39 }
 0x457   :  { %3285 = vmatmul.msk.bf16.gmra.mxu2 %vm959_vm4, %v6172_v5 }
 0x45b   :  { %3226 = vmatmul.msk.bf16.gmra.mxu3 %vm959_vm4, %v6143_v55  ;;  %2250 = vmatmul.bf16.gmra.mxu1 %v6039_v47 }
 0x45f   :  { %2215 = vmatmul.bf16.gmra.mxu0 %v6254_v22 }
 0x467   :  { %3286 = vmatmul.msk.bf16.gmra.mxu2 %vm959_vm4, %v6078_v43 }
 0x46b   :  { %3227 = vmatmul.msk.bf16.gmra.mxu3 %vm959_vm4, %v6235_v11  ;;  %2255 = vmatmul.bf16.gmra.mxu1 %v6223_v33 }
 0x46f   :  { %3215 = vmatmul.msk.bf16.vlgmr.msrb.gmra.mxu0 %vm959_vm4, %v6127_v56  ;;  %v3402_v56 = vld [vmem:[%s6916_s9 + $0x30] sm:$0xff] }
 0x470   :  { %2490 = vmatpush.bf16.msra.mxu0 %v3402_v56 }
 0x474   :  { %2491 = vmatpush.bf16.msra.mxu0 %v3401_v3 }
 0x477   :  { %3287 = vmatmul.msk.bf16.gmra.mxu2 %vm959_vm4, %v6266_v53 }
 0x478   :  { %v2221_v12 = vpop.f32.mrf.mxu1  ;;  %2492 = vmatpush.bf16.msra.mxu0 %v3400_v52 }
 0x47a   :  { %v2330_v58 = vpop.f32.mrf.mxu3 }
 0x47b   :  { %3228 = vmatmul.msk.bf16.gmra.mxu3 %vm959_vm4, %v6246_v61  ;;  %2260 = vmatmul.bf16.gmra.mxu1 %v6244_v27  ;;  %v6353_v23 = vadd.f32 %v2330_v58, %v2221_v12  ;;  %v3428_v12 = vld [vmem:[%s6916_s9 + $0x100] sm:$0xff] }
 0x47c   :  { %2493 = vmatpush.bf16.msra.mxu0 %v3399_v38  ;;  %2929 = vmatpush.bf16.msrb.mxu1 %v3428_v12  ;;  %v3420_v12 = vld [vmem:[%s6916_s9 + $0xc0] sm:$0xff] }
 0x47d   :  { %2820 = vmatpush.bf16.msra.mxu3 %v3420_v12 }
 0x47f   :  { %3216 = vmatmul.msk.bf16.gmra.mxu0 %vm959_vm4, %v6172_v5 }
 0x480   :  { %v2223_v62 = vpop.f32.mrf.mxu1  ;;  %2494 = vmatpush.bf16.msra.mxu0 %v3398_v32 }
 0x482   :  { %v2332_v17 = vpop.f32.mrf.mxu3 }
 0x483   :  { %v6363_v18 = vadd.f32 %v2332_v17, %v2223_v62 }
 0x484   :  { %2495 = vmatpush.bf16.msra.mxu0 %v3397_v44 }
 0x485   :  { %7290 = vst [vmem:[#allocation26_spill] sm:$0xff] %v6363_v18 }
 0x487   :  { %3288 = vmatmul.msk.bf16.gmra.mxu2 %vm959_vm4, %v6272_v28 }
 0x488   :  { %v2226_v34 = vpop.f32.mrf.mxu1  ;;  %2496 = vmatpush.bf16.msra.mxu0 %v3396_v31 }
 0x48a   :  { %v2335_v42 = vpop.f32.mrf.mxu3 }
 0x48b   :  { %3229 = vmatmul.msk.bf16.gmra.mxu3 %vm959_vm4, %v6186_v26  ;;  %2265 = vmatmul.bf16.gmra.mxu1 %v6184_v8  ;;  %v6378_v49 = vadd.f32 %v2335_v42, %v2226_v34 }
 0x48d   :  { %7292 = vst [vmem:[#allocation28_spill] sm:$0xff] %v6378_v49  ;;  %v7309_v49 = vld [vmem:[#allocation2_spill] sm:$0xff] }
 0x48f   :  { %3217 = vmatmul.msk.bf16.gmra.mxu0 %vm959_vm4, %v6078_v43 }
 0x490   :  { %v2228_v56 = vpop.f32.mrf.mxu1 }
 0x492   :  { %v2337_v3 = vpop.f32.mrf.mxu3 }
 0x493   :  { %v6390_v58 = vadd.f32 %v2337_v3, %v2228_v56 }
 0x495   :  { %7293 = vst [vmem:[#allocation36_spill] sm:$0xff] %v6390_v58 }
 0x497   :  { %3289 = vmatmul.msk.bf16.gmra.mxu2 %vm959_vm4, %v7291_v6 }
 0x498   :  { %v2231_v52 = vpop.f32.mrf.mxu1 }
 0x49a   :  { %v2340_v62 = vpop.f32.mrf.mxu3 }
 0x49b   :  { %3230 = vmatmul.msk.bf16.gmra.mxu3 %vm959_vm4, %v6285_v40  ;;  %2270 = vmatmul.bf16.gmra.mxu1 %v6283_v24  ;;  %v6399_v17 = vadd.f32 %v2340_v62, %v2231_v52 }
 0x49c   :  { %v6373_v37 = vpop.f32.mrf.mxu0 }
 0x49d   :  { %7294 = vst [vmem:[#allocation38_spill] sm:$0xff] %v6399_v17 }
 0x49f   :  { %3218 = vmatmul.msk.bf16.gmra.mxu0 %vm959_vm4, %v6266_v53 }
 0x4a0   :  { %v2233_v32 = vpop.f32.mrf.mxu1 }
 0x4a2   :  { %v2342_v34 = vpop.f32.mrf.mxu3 }
 0x4a3   :  { %v6405_v42 = vadd.f32 %v2342_v34, %v2233_v32 }
 0x4a4   :  { %v6385_v35 = vpop.f32.mrf.mxu0 }
 0x4a5   :  { %7295 = vst [vmem:[#allocation19_spill] sm:$0xff] %v6405_v42 }
 0x4a7   :  { %3290 = vmatmul.msk.bf16.gmra.mxu2 %vm959_vm4, %v5930_v59 }
 0x4a8   :  { %v2236_v31 = vpop.f32.mrf.mxu1 }
 0x4aa   :  { %v2345_v56 = vpop.f32.mrf.mxu3 }
 0x4ab   :  { %3231 = vmatmul.msk.bf16.gmra.mxu3 %vm959_vm4, %v6191_v20  ;;  %2275 = vmatmul.bf16.gmra.mxu1 %v6239_v45  ;;  %v6414_v3 = vadd.f32 %v2345_v56, %v2236_v31 }
 0x4ac   :  { %v6397_v38 = vpop.f32.mrf.mxu0 }
 0x4ad   :  { %7296 = vst [vmem:[#allocation21_spill] sm:$0xff] %v6414_v3 }
 0x4af   :  { %3219 = vmatmul.msk.bf16.gmra.mxu0 %vm959_vm4, %v6272_v28 }
 0x4b0   :  { %v2238_v52 = vpop.f32.mrf.mxu1 }
 0x4b2   :  { %v2347_v32 = vpop.f32.mrf.mxu3 }
 0x4b3   :  { %v6422_v34 = vadd.f32 %v2347_v32, %v2238_v52 }
 0x4b4   :  { %v6403_v44 = vpop.f32.mrf.mxu0 }
 0x4b5   :  { %7297 = vst [vmem:[#allocation3_spill] sm:$0xff] %v6422_v34 }
 0x4b7   :  { %3291 = vmatmul.msk.bf16.gmra.mxu2 %vm959_vm4, %v6031_v16 }
 0x4b8   :  { %v2241_v30 = vpop.f32.mrf.mxu1 }
 0x4ba   :  { %v6433_v12 = vpop.f32.mrf.mxu2 }
 0x4bb   :  { %3232 = vmatmul.msk.bf16.gmra.mxu3 %vm959_vm4, %v6287_v46  ;;  %2280 = vmatmul.bf16.gmra.mxu1 %v6289_v19 }
 0x4bc   :  { %v6412_v36 = vpop.f32.mrf.mxu0 }
 0x4be   :  { %v2350_v31 = vpop.f32.mrf.mxu3 }
 0x4bf   :  { %2497 = vmatmul.bf16.vlgmr.msra.gmra.mxu0 %v6229_v7  ;;  %v6431_v56 = vadd.f32 %v2350_v31, %v2241_v30 }
 0x4c0   :  { %v2243_v52 = vpop.f32.mrf.mxu1 }
 0x4c1   :  { %7298 = vst [vmem:[#allocation17_spill] sm:$0xff] %v6431_v56 }
 0x4c2   :  { %v6442_v63 = vpop.f32.mrf.mxu2 }
 0x4c4   :  { %v6420_v62 = vpop.f32.mrf.mxu0 }
 0x4c6   :  { %v2352_v2 = vpop.f32.mrf.mxu3 }
 0x4c7   :  { %3292 = vmatmul.msk.bf16.gmra.mxu2 %vm959_vm4, %v6135_v4  ;;  %v6438_v10 = vadd.f32 %v2352_v2, %v2243_v52 }
 0x4c8   :  { %v2246_v54 = vpop.f32.mrf.mxu1 }
 0x4c9   :  { %7299 = vst [vmem:[#allocation23_spill] sm:$0xff] %v6438_v10 }
 0x4ca   :  { %v6452_v52 = vpop.f32.mrf.mxu2 }
 0x4cb   :  { %3233 = vmatmul.msk.bf16.gmra.mxu3 %vm959_vm4, %v6303_v14  ;;  %2285 = vmatmul.bf16.gmra.mxu1 %v6301_v25 }
 0x4cc   :  { %v6429_v7 = vpop.f32.mrf.mxu0 }
 0x4cf   :  { %2502 = vmatmul.bf16.gmra.mxu0 %v6080_v57  ;;  %v2355_v57 = vpop.f32.mrf.mxu3 }
 0x4d0   :  { %v6449_v31 = vadd.f32 %v2355_v57, %v2246_v54  ;;  %v2248_v2 = vpop.f32.mrf.mxu1 }
 0x4d2   :  { %7300 = vst [vmem:[#allocation30_spill] sm:$0xff] %v6449_v31  ;;  %v6465_v31 = vpop.f32.mrf.mxu2 }
 0x4d4   :  { %v6436_v32 = vpop.f32.mrf.mxu0 }
 0x4d7   :  { %3293 = vmatmul.msk.bf16.gmra.mxu2 %vm959_vm4, %v7286_v15  ;;  %v2357_v10 = vpop.f32.mrf.mxu3 }
 0x4d8   :  { %v6456_v56 = vadd.f32 %v2357_v10, %v2248_v2  ;;  %v2251_v34 = vpop.f32.mrf.mxu1 }
 0x4da   :  { %7301 = vst [vmem:[#allocation32_spill] sm:$0xff] %v6456_v56 }
 0x4db   :  { %3234 = vmatmul.msk.bf16.gmra.mxu3 %vm959_vm4, %v6258_v29  ;;  %2290 = vmatmul.bf16.gmra.mxu1 %v6264_v13  ;;  %v6476_v29 = vpop.f32.mrf.mxu2 }
 0x4dc   :  { %v6447_v30 = vpop.f32.mrf.mxu0 }
 0x4df   :  { %2507 = vmatmul.bf16.gmra.mxu0 %v6037_v0  ;;  %v2360_v57 = vpop.f32.mrf.mxu3 }
 0x4e0   :  { %v6467_v3 = vadd.f32 %v2360_v57, %v2251_v34  ;;  %v2253_v10 = vpop.f32.mrf.mxu1 }
 0x4e2   :  { %7302 = vst [vmem:[#allocation34_spill] sm:$0xff] %v6467_v3 }
 0x4e4   :  { %v6454_v50 = vpop.f32.mrf.mxu0 }
 0x4e7   :  { %3294 = vmatmul.msk.bf16.gmra.mxu2 %vm959_vm4, %v6141_v60  ;;  %v2362_v56 = vpop.f32.mrf.mxu3 }
 0x4e8   :  { %v6472_v42 = vadd.f32 %v2362_v56, %v2253_v10  ;;  %v2256_v13 = vpop.f32.mrf.mxu1  ;;  %v6486_v10 = vpop.f32.mrf.mxu2 }
 0x4ea   :  { %7303 = vst [vmem:[#allocation25_spill] sm:$0xff] %v6472_v42 }
 0x4eb   :  { %2821 = vmatmul.bf16.vlgmr.msra.gmra.mxu3 %v6037_v0  ;;  %3375 = vmatmul.msk.bf16.vlgmr.msrb.gmra.mxu1 %vm959_vm4, %v6172_v5 }
 0x4ec   :  { %v6463_v54 = vpop.f32.mrf.mxu0 }
 0x4ef   :  { %2512 = vmatmul.bf16.gmra.mxu0 %v6090_v48  ;;  %v2365_v57 = vpop.f32.mrf.mxu3 }
 0x4f0   :  { %v6483_v3 = vadd.f32 %v2365_v57, %v2256_v13  ;;  %v2258_v56 = vpop.f32.mrf.mxu1  ;;  %v6495_v5 = vpop.f32.mrf.mxu2 }
 0x4f2   :  { %7304 = vst [vmem:[#allocation14_spill] sm:$0xff] %v6483_v3 }
 0x4f4   :  { %v6470_v2 = vpop.f32.mrf.mxu0 }
 0x4f7   :  { %3295 = vmatmul.msk.bf16.gmra.mxu2 %vm959_vm4, %v6143_v55  ;;  %v2367_v25 = vpop.f32.mrf.mxu3 }
 0x4f8   :  { %v6490_v17 = vadd.f32 %v2367_v25, %v2258_v56  ;;  %v2261_v0 = vpop.f32.mrf.mxu1  ;;  %v6506_v58 = vpop.f32.mrf.mxu2 }
 0x4fa   :  { %7305 = vst [vmem:[#allocation27_spill] sm:$0xff] %v6490_v17 }
 0x4fb   :  { %2826 = vmatmul.bf16.gmra.mxu3 %v6090_v48  ;;  %3376 = vmatmul.msk.bf16.gmra.mxu1 %vm959_vm4, %v6078_v43 }
 0x4fc   :  { %v6481_v34 = vpop.f32.mrf.mxu0 }
 0x4ff   :  { %2517 = vmatmul.bf16.gmra.mxu0 %v6201_v39  ;;  %v2370_v57 = vpop.f32.mrf.mxu3 }
 0x500   :  { %v6501_v3 = vadd.f32 %v2370_v57, %v2261_v0  ;;  %v2263_v25 = vpop.f32.mrf.mxu1 }
 0x502   :  { %7306 = vst [vmem:[#allocation33_spill] sm:$0xff] %v6501_v3  ;;  %v6519_v3 = vpop.f32.mrf.mxu2 }
 0x504   :  { %v6488_v42 = vpop.f32.mrf.mxu0 }
 0x507   :  { %3296 = vmatmul.msk.bf16.gmra.mxu2 %vm959_vm4, %v6235_v11  ;;  %v2372_v17 = vpop.f32.mrf.mxu3 }
 0x508   :  { %v6508_v19 = vadd.f32 %v2372_v17, %v2263_v25  ;;  %v2266_v48 = vpop.f32.mrf.mxu1 }
 0x50a   :  { %7307 = vst [vmem:[#allocation9_spill] sm:$0xff] %v6508_v19 }
 0x50b   :  { %2831 = vmatmul.bf16.gmra.mxu3 %v6201_v39  ;;  %3377 = vmatmul.msk.bf16.gmra.mxu1 %vm959_vm4, %v6266_v53  ;;  %v6528_v53 = vpop.f32.mrf.mxu2 }
 0x50c   :  { %v6499_v13 = vpop.f32.mrf.mxu0 }
 0x50f   :  { %2522 = vmatmul.bf16.gmra.mxu0 %v6254_v22  ;;  %v2375_v0 = vpop.f32.mrf.mxu3 }
 0x510   :  { %v6517_v57 = vadd.f32 %v2375_v0, %v2266_v48  ;;  %v2268_v17 = vpop.f32.mrf.mxu1 }
 0x512   :  { %7308 = vst [vmem:[#allocation37_spill] sm:$0xff] %v6517_v57 }
 0x514   :  { %v6504_v56 = vpop.f32.mrf.mxu0 }
 0x517   :  { %3297 = vmatmul.msk.bf16.gmra.mxu2 %vm959_vm4, %v6246_v61  ;;  %v2377_v19 = vpop.f32.mrf.mxu3 }
 0x518   :  { %v6524_v18 = vadd.f32 %v2377_v19, %v2268_v17  ;;  %v2271_v39 = vpop.f32.mrf.mxu1  ;;  %v6538_v17 = vpop.f32.mrf.mxu2 }
 0x519   :  { %7312 = vst [vmem:[#allocation4_spill] sm:$0xff] %v6538_v17 }
 0x51a   :  { %7310 = vst [vmem:[#allocation41_spill] sm:$0xff] %v6524_v18 }
 0x51b   :  { %2836 = vmatmul.bf16.gmra.mxu3 %v6254_v22  ;;  %3378 = vmatmul.msk.bf16.gmra.mxu1 %vm959_vm4, %v6272_v28 }
 0x51c   :  { %v6515_v43 = vpop.f32.mrf.mxu0 }
 0x51f   :  { %2527 = vmatmul.bf16.gmra.mxu0 %v7309_v49  ;;  %v2380_v0 = vpop.f32.mrf.mxu3 }
 0x520   :  { %v6535_v57 = vadd.f32 %v2380_v0, %v2271_v39  ;;  %v2273_v19 = vpop.f32.mrf.mxu1  ;;  %v6549_v0 = vpop.f32.mrf.mxu2 }
 0x522   :  { %7311 = vst [vmem:[#allocation35_spill] sm:$0xff] %v6535_v57 }
 0x524   :  { %v6522_v25 = vpop.f32.mrf.mxu0 }
 0x527   :  { %3298 = vmatmul.msk.bf16.gmra.mxu2 %vm959_vm4, %v6186_v26  ;;  %v2382_v45 = vpop.f32.mrf.mxu3 }
 0x528   :  { %v6542_v26 = vadd.f32 %v2382_v45, %v2273_v19  ;;  %v2276_v22 = vpop.f32.mrf.mxu1 }
 0x52a   :  { %7313 = vst [vmem:[#allocation6_spill] sm:$0xff] %v6542_v26 }
 0x52b   :  { %2841 = vmatmul.bf16.gmra.mxu3 %v7309_v49  ;;  %3379 = vmatmul.msk.bf16.gmra.mxu1 %vm959_vm4, %v7291_v6  ;;  %v6558_v49 = vpop.f32.mrf.mxu2 }
 0x52c   :  { %v6533_v48 = vpop.f32.mrf.mxu0 }
 0x52f   :  { %2532 = vmatmul.bf16.gmra.mxu0 %v5928_v9  ;;  %v2385_v39 = vpop.f32.mrf.mxu3 }
 0x530   :  { %v6551_v57 = vadd.f32 %v2385_v39, %v2276_v22  ;;  %v2278_v17 = vpop.f32.mrf.mxu1 }
 0x532   :  { %7314 = vst [vmem:[#allocation15_spill] sm:$0xff] %v6551_v57 }
 0x534   :  { %v6540_v18 = vpop.f32.mrf.mxu0 }
 0x537   :  { %3299 = vmatmul.msk.bf16.gmra.mxu2 %vm959_vm4, %v6285_v40  ;;  %v2387_v19 = vpop.f32.mrf.mxu3 }
 0x538   :  { %v6554_v26 = vadd.f32 %v2387_v19, %v2278_v17  ;;  %v2281_v40 = vpop.f32.mrf.mxu1  ;;  %v6566_v17 = vpop.f32.mrf.mxu2 }
 0x539   :  { %7317 = vst [vmem:[#allocation2_spill] sm:$0xff] %v6566_v17 }
 0x53a   :  { %7315 = vst [vmem:[#allocation12_spill] sm:$0xff] %v6554_v26 }
 0x53b   :  { %2846 = vmatmul.bf16.gmra.mxu3 %v5928_v9  ;;  %3380 = vmatmul.msk.bf16.gmra.mxu1 %vm959_vm4, %v5930_v59 }
 0x53c   :  { %v2498_v28 = vpop.f32.mrf.mxu0 }
 0x53f   :  { %2537 = vmatmul.bf16.gmra.mxu0 %v6029_v51  ;;  %v2390_v22 = vpop.f32.mrf.mxu3 }
 0x540   :  { %v6563_v39 = vadd.f32 %v2390_v22, %v2281_v40  ;;  %v2283_v57 = vpop.f32.mrf.mxu1  ;;  %v6575_v59 = vpop.f32.mrf.mxu2 }
 0x542   :  { %7316 = vst [vmem:[#allocation5_spill] sm:$0xff] %v6563_v39 }
 0x544   :  { %v2500_v45 = vpop.f32.mrf.mxu0 }
 0x547   :  { %3300 = vmatmul.msk.bf16.gmra.mxu2 %vm959_vm4, %v6191_v20  ;;  %v2392_v26 = vpop.f32.mrf.mxu3 }
 0x548   :  { %v6570_v20 = vadd.f32 %v2392_v26, %v2283_v57  ;;  %v2286_v9 = vpop.f32.mrf.mxu1  ;;  %v6588_v17 = vpop.f32.mrf.mxu2 }
 0x549   :  { %7321 = vst [vmem:[#allocation45_spill] sm:$0xff] %v6588_v17 }
 0x54a   :  { %7318 = vst [vmem:[#allocation42_spill] sm:$0xff] %v6570_v20 }
 0x54b   :  { %2851 = vmatmul.bf16.gmra.mxu3 %v6029_v51  ;;  %3381 = vmatmul.msk.bf16.gmra.mxu1 %vm959_vm4, %v6031_v16 }
 0x54c   :  { %v2503_v6 = vpop.f32.mrf.mxu0 }
 0x54f   :  { %2542 = vmatmul.bf16.gmra.mxu0 %v6133_v1  ;;  %v2395_v22 = vpop.f32.mrf.mxu3 }
 0x550   :  { %v6581_v39 = vadd.f32 %v2395_v22, %v2286_v9  ;;  %v2288_v26 = vpop.f32.mrf.mxu1 }
 0x552   :  { %7319 = vst [vmem:[#allocation43_spill] sm:$0xff] %v6581_v39 }
 0x554   :  { %v6568_v19 = vpop.f32.mrf.mxu0 }
 0x557   :  { %3301 = vmatmul.msk.bf16.gmra.mxu2 %vm959_vm4, %v6287_v46  ;;  %v2397_v20 = vpop.f32.mrf.mxu3 }
 0x558   :  { %v6586_v46 = vadd.f32 %v2397_v20, %v2288_v26  ;;  %v2291_v51 = vpop.f32.mrf.mxu1 }
 0x55a   :  { %7320 = vst [vmem:[#allocation44_spill] sm:$0xff] %v6586_v46 }
 0x55b   :  { %2856 = vmatmul.bf16.gmra.mxu3 %v6133_v1  ;;  %3382 = vmatmul.msk.bf16.gmra.mxu1 %vm959_vm4, %v6135_v4 }
 0x55c   :  { %v6579_v40 = vpop.f32.mrf.mxu0 }
 0x55f   :  { %2547 = vmatmul.bf16.gmra.mxu0 %v7289_v41  ;;  %v2400_v9 = vpop.f32.mrf.mxu3 }
 0x560   :  { %v6597_v22 = vadd.f32 %v2400_v9, %v2291_v51  ;;  %v2293_v20 = vpop.f32.mrf.mxu1 }
 0x562   :  { %7322 = vst [vmem:[#allocation46_spill] sm:$0xff] %v6597_v22 }
 0x564   :  { %v6584_v57 = vpop.f32.mrf.mxu0 }
 0x567   :  { %3302 = vmatmul.msk.bf16.gmra.mxu2 %vm959_vm4, %v6303_v14  ;;  %v2402_v46 = vpop.f32.mrf.mxu3  ;;  %v2306_v14 = vadd.f32 %v6463_v54, %v6373_v37 }
 0x568   :  { %v6602_v39 = vadd.f32 %v2402_v46, %v2293_v20  ;;  %v2931_v1 = vpop.f32.mrf.mxu1  ;;  %v2308_v46 = vadd.f32 %v6470_v2, %v6385_v35 }
 0x569   :  { %v2499_v17 = vadd.f32 %v2498_v28, %v2306_v14  ;;  %v2311_v28 = vadd.f32 %v6481_v34, %v6397_v38  ;;  %v2313_v38 = vadd.f32 %v6488_v42, %v6403_v44  ;;  %v2316_v44 = vadd.f32 %v6499_v13, %v6412_v36 }
 0x56a   :  { %v2501_v54 = vadd.f32 %v2500_v45, %v2308_v46  ;;  %v2318_v36 = vadd.f32 %v6504_v56, %v6420_v62  ;;  %v2321_v62 = vadd.f32 %v6515_v43, %v6429_v7  ;;  %v2323_v43 = vadd.f32 %v6522_v25, %v6436_v32 }
 0x56b   :  { %2861 = vmatmul.bf16.gmra.mxu3 %v7289_v41  ;;  %3383 = vmatmul.msk.bf16.gmra.mxu1 %vm959_vm4, %v7286_v15  ;;  %v2608_v9 = vadd.f32 %v6433_v12, %v2499_v17  ;;  %v2504_v17 = vadd.f32 %v2503_v6, %v2311_v28  ;;  %v2326_v32 = vadd.f32 %v6533_v48, %v6447_v30 }
 0x56c   :  { %v6595_v16 = vpop.f32.mrf.mxu0  ;;  %v2610_v41 = vadd.f32 %v6442_v63, %v2501_v54  ;;  %v2328_v30 = vadd.f32 %v6540_v18, %v6454_v50  ;;  %v7323_v18 = vld [vmem:[#allocation13_spill] sm:$0xff] }
 0x56f   :  { %2552 = vmatmul.bf16.gmra.mxu0 %v6139_v21  ;;  %v2822_v51 = vpop.f32.mrf.mxu3 }
 0x570   :  { %v2932_v22 = vadd.f32 %v2931_v1, %v2822_v51  ;;  %v2933_v37 = vpop.f32.mrf.mxu1  ;;  %v2506_v51 = vadd.f32 %v6568_v19, %v2313_v38 }
 0x572   :  { %v3031_v20 = vadd.f32 %v2932_v22, %v2608_v9  ;;  %v2613_v22 = vadd.f32 %v6452_v52, %v2504_v17 }
 0x574   :  { %v6600_v26 = vpop.f32.mrf.mxu0  ;;  %3071 = vst.msk [vmem:[%s6917_s10] sm:$0xff] %vm116_vm0, %v3031_v20  ;;  %v2509_v20 = vadd.f32 %v6579_v40, %v2316_v44 }
 0x576   :  { %v2618_v19 = vadd.f32 %v6476_v29, %v2509_v20 }
 0x577   :  { %v2824_v14 = vpop.f32.mrf.mxu3 }
 0x578   :  { %v2934_v12 = vadd.f32 %v2933_v37, %v2824_v14  ;;  %v2936_v2 = vpop.f32.mrf.mxu1  ;;  %v2511_v14 = vadd.f32 %v6584_v57, %v2318_v36 }
 0x57a   :  { %v3032_v35 = vadd.f32 %v2934_v12, %v2610_v41  ;;  %v2514_v12 = vadd.f32 %v6595_v16, %v2321_v62 }
 0x57b   :  { %2866 = vmatmul.bf16.gmra.mxu3 %v6139_v21  ;;  %3384 = vmatmul.msk.bf16.gmra.mxu1 %vm959_vm4, %v6141_v60  ;;  %v2615_v60 = vadd.f32 %v6465_v31, %v2506_v51 }
 0x57c   :  { %v6609_v4 = vpop.f32.mrf.mxu0  ;;  %3072 = vst.msk [vmem:[%s6917_s10 + $0x8] sm:$0xff] %vm116_vm0, %v3032_v35  ;;  %v2623_v28 = vadd.f32 %v6495_v5, %v2514_v12 }
 0x57f   :  { %2557 = vmatmul.bf16.gmra.mxu0 %v6039_v47  ;;  %v2827_v63 = vpop.f32.mrf.mxu3 }
 0x580   :  { %v2937_v1 = vadd.f32 %v2936_v2, %v2827_v63  ;;  %v2938_v6 = vpop.f32.mrf.mxu1  ;;  %v2516_v2 = vadd.f32 %v6600_v26, %v2323_v43 }
 0x582   :  { %v3033_v34 = vadd.f32 %v2937_v1, %v2613_v22  ;;  %v2625_v5 = vadd.f32 %v6506_v58, %v2516_v2  ;;  %v2519_v22 = vadd.f32 %v6609_v4, %v2326_v32 }
 0x584   :  { %v6619_v15 = vpop.f32.mrf.mxu0  ;;  %3073 = vst.msk [vmem:[%s6917_s10 + $0x10] sm:$0xff] %vm116_vm0, %v3033_v34  ;;  %v2628_v58 = vadd.f32 %v6519_v3, %v2519_v22  ;;  %v7334_v22 = vld [vmem:[#allocation40_spill] sm:$0xff] }
 0x585   :  { %v2521_v34 = vadd.f32 %v6619_v15, %v2328_v30 }
 0x587   :  { %v2829_v21 = vpop.f32.mrf.mxu3 }
 0x588   :  { %v2939_v9 = vadd.f32 %v2938_v6, %v2829_v21  ;;  %v2941_v46 = vpop.f32.mrf.mxu1 }
 0x58a   :  { %v3034_v42 = vadd.f32 %v2939_v9, %v2615_v60  ;;  %v2647_v60 = vpop.f32.mrf.mxu2 }
 0x58b   :  { %2871 = vmatmul.bf16.gmra.mxu3 %v6039_v47  ;;  %3385 = vmatmul.msk.bf16.gmra.mxu1 %vm959_vm4, %v6143_v55  ;;  %v2620_v55 = vadd.f32 %v6486_v10, %v2511_v14  ;;  %v7327_v14 = vld [vmem:[#allocation28_spill] sm:$0xff] }
 0x58c   :  { %v6631_v45 = vpop.f32.mrf.mxu0  ;;  %3074 = vst.msk [vmem:[%s6917_s10 + $0x18] sm:$0xff] %vm116_vm0, %v3034_v42  ;;  %v7325_v42 = vld [vmem:[#allocation16_spill] sm:$0xff] }
 0x58d   :  { %v2524_v50 = vadd.f32 %v6631_v45, %v6353_v23  ;;  %v7326_v23 = vld [vmem:[#allocation26_spill] sm:$0xff] }
 0x58f   :  { %2562 = vmatmul.bf16.gmra.mxu0 %v6223_v33  ;;  %v2832_v31 = vpop.f32.mrf.mxu3 }
 0x590   :  { %v2942_v37 = vadd.f32 %v2941_v46, %v2832_v31  ;;  %v2943_v54 = vpop.f32.mrf.mxu1 }
 0x592   :  { %v3035_v13 = vadd.f32 %v2942_v37, %v2618_v19  ;;  %v2649_v36 = vpop.f32.mrf.mxu2 }
 0x594   :  { %v6643_v52 = vpop.f32.mrf.mxu0  ;;  %3075 = vst.msk [vmem:[%s6917_s10 + $0x20] sm:$0xff] %vm116_vm0, %v3035_v13 }
 0x595   :  { %v2526_v45 = vadd.f32 %v6643_v52, %v7326_v23  ;;  %v7328_v52 = vld [vmem:[#allocation24_spill] sm:$0xff] }
 0x597   :  { %v2834_v47 = vpop.f32.mrf.mxu3  ;;  %v2635_v19 = vadd.f32 %v6549_v0, %v2526_v45 }
 0x598   :  { %v2944_v29 = vadd.f32 %v2943_v54, %v2834_v47  ;;  %v2946_v41 = vpop.f32.mrf.mxu1 }
 0x59a   :  { %v3036_v56 = vadd.f32 %v2944_v29, %v2620_v55 }
 0x59b   :  { %2876 = vmatmul.bf16.gmra.mxu3 %v6223_v33  ;;  %3386 = vmatmul.msk.bf16.gmra.mxu1 %vm959_vm4, %v6235_v11 }
 0x59c   :  { %v6659_v40 = vpop.f32.mrf.mxu0  ;;  %3076 = vst.msk [vmem:[%s6917_s10 + $0x28] sm:$0xff] %vm116_vm0, %v3036_v56  ;;  %v7329_v56 = vld [vmem:[#allocation11_spill] sm:$0xff] }
 0x59d   :  { %v2529_v47 = vadd.f32 %v6659_v40, %v7327_v14  ;;  %v2652_v40 = vpop.f32.mrf.mxu2 }
 0x59f   :  { %2567 = vmatmul.bf16.gmra.mxu0 %v6244_v27  ;;  %v2837_v10 = vpop.f32.mrf.mxu3  ;;  %v2638_v0 = vadd.f32 %v6558_v49, %v2529_v47 }
 0x5a0   :  { %v2947_v7 = vadd.f32 %v2946_v41, %v2837_v10  ;;  %v2948_v35 = vpop.f32.mrf.mxu1  ;;  %v7330_v10 = vld [vmem:[#allocation36_spill] sm:$0xff] }
 0x5a2   :  { %v3037_v16 = vadd.f32 %v2947_v7, %v2623_v28  ;;  %v7331_v7 = vld [vmem:[#allocation2_spill] sm:$0xff] }
 0x5a4   :  { %v6675_v57 = vpop.f32.mrf.mxu0  ;;  %3077 = vst.msk [vmem:[%s6917_s10 + $0x30] sm:$0xff] %vm116_vm0, %v3037_v16 }
 0x5a5   :  { %v2531_v28 = vadd.f32 %v6675_v57, %v7330_v10  ;;  %v2654_v57 = vpop.f32.mrf.mxu2 }
 0x5a7   :  { %v2839_v11 = vpop.f32.mrf.mxu3  ;;  %v2640_v43 = vadd.f32 %v7331_v7, %v2531_v28 }
 0x5a8   :  { %v2949_v17 = vadd.f32 %v2948_v35, %v2839_v11  ;;  %v2951_v63 = vpop.f32.mrf.mxu1  ;;  %v7332_v11 = vld [vmem:[#allocation38_spill] sm:$0xff] }
 0x5aa   :  { %v3038_v25 = vadd.f32 %v2949_v17, %v2625_v5  ;;  %v7333_v17 = vld [vmem:[#allocation10_spill] sm:$0xff] }
 0x5ab   :  { %2881 = vmatmul.bf16.gmra.mxu3 %v6244_v27  ;;  %3387 = vmatmul.msk.bf16.gmra.mxu1 %vm959_vm4, %v6246_v61  ;;  %v2630_v61 = vadd.f32 %v6528_v53, %v2521_v34  ;;  %v7324_v53 = vld [vmem:[#allocation4_spill] sm:$0xff]  ;;  %v7336_v34 = vld [vmem:[#allocation45_spill] sm:$0xff] }
 0x5ac   :  { %v6688_v33 = vpop.f32.mrf.mxu0  ;;  %3078 = vst.msk [vmem:[%s6917_s10 + $0x38] sm:$0xff] %vm116_vm0, %v3038_v25  ;;  %v2633_v9 = vadd.f32 %v7324_v53, %v2524_v50  ;;  %v7338_v50 = vld [vmem:[#allocation22_spill] sm:$0xff] }
 0x5ad   :  { %v2534_v5 = vadd.f32 %v6688_v33, %v7332_v11 }
 0x5af   :  { %2572 = vmatmul.bf16.gmra.mxu0 %v6184_v8  ;;  %v2842_v26 = vpop.f32.mrf.mxu3  ;;  %v2643_v25 = vadd.f32 %v6575_v59, %v2534_v5 }
 0x5b0   :  { %v2952_v1 = vadd.f32 %v2951_v63, %v2842_v26  ;;  %v2953_v4 = vpop.f32.mrf.mxu1 }
 0x5b2   :  { %v3039_v48 = vadd.f32 %v2952_v1, %v2628_v58  ;;  %v7335_v1 = vld [vmem:[#allocation19_spill] sm:$0xff] }
 0x5b4   :  { %v6702_v38 = vpop.f32.mrf.mxu0  ;;  %3079 = vst.msk [vmem:[%s6917_s10 + $0x40] sm:$0xff] %vm116_vm0, %v3039_v48 }
 0x5b5   :  { %v2536_v30 = vadd.f32 %v6702_v38, %v7335_v1 }
 0x5b7   :  { %v2844_v27 = vpop.f32.mrf.mxu3 }
 0x5b8   :  { %v2954_v3 = vadd.f32 %v2953_v4, %v2844_v27  ;;  %v2956_v21 = vpop.f32.mrf.mxu1  ;;  %v2657_v4 = vpop.f32.mrf.mxu2  ;;  %v2645_v27 = vadd.f32 %v7336_v34, %v2536_v30 }
 0x5ba   :  { %v3040_v6 = vadd.f32 %v2954_v3, %v2630_v61 }
 0x5bb   :  { %2886 = vmatmul.bf16.gmra.mxu3 %v6184_v8  ;;  %3388 = vmatmul.msk.bf16.gmra.mxu1 %vm959_vm4, %v7323_v18 }
 0x5bc   :  { %v2538_v51 = vpop.f32.mrf.mxu0  ;;  %3080 = vst.msk [vmem:[%s6917_s10 + $0x48] sm:$0xff] %vm116_vm0, %v3040_v6  ;;  %v7337_v6 = vld [vmem:[#allocation21_spill] sm:$0xff] }
 0x5bf   :  { %2577 = vmatmul.bf16.gmra.mxu0 %v6283_v24  ;;  %v2847_v15 = vpop.f32.mrf.mxu3 }
 0x5c0   :  { %v2957_v44 = vadd.f32 %v2956_v21, %v2847_v15  ;;  %v2958_v20 = vpop.f32.mrf.mxu1  ;;  %v2539_v21 = vadd.f32 %v2538_v51, %v7337_v6 }
 0x5c2   :  { %v3041_v46 = vadd.f32 %v2957_v44, %v2633_v9  ;;  %v2648_v15 = vadd.f32 %v2647_v60, %v2539_v21  ;;  %v2659_v9 = vpop.f32.mrf.mxu2 }
 0x5c4   :  { %3081 = vst.msk [vmem:[%s6917_s10 + $0x50] sm:$0xff] %vm116_vm0, %v3041_v46  ;;  %v2540_v8 = vpop.f32.mrf.mxu0  ;;  %v7339_v46 = vld [vmem:[#allocation3_spill] sm:$0xff] }
 0x5c7   :  { %v2849_v31 = vpop.f32.mrf.mxu3 }
 0x5c8   :  { %v2959_v37 = vadd.f32 %v2958_v20, %v2849_v31  ;;  %v2961_v54 = vpop.f32.mrf.mxu1  ;;  %v2541_v20 = vadd.f32 %v2540_v8, %v7339_v46  ;;  %v7341_v8 = vld [vmem:[#allocation7_spill] sm:$0xff] }
 0x5ca   :  { %v3042_v13 = vadd.f32 %v2959_v37, %v2635_v19  ;;  %v2650_v45 = vadd.f32 %v2649_v36, %v2541_v20 }
 0x5cb   :  { %2891 = vmatmul.bf16.gmra.mxu3 %v6283_v24  ;;  %3389 = vmatmul.msk.bf16.gmra.mxu1 %vm959_vm4, %v7328_v52 }
 0x5cc   :  { %3082 = vst.msk [vmem:[%s6917_s10 + $0x58] sm:$0xff] %vm116_vm0, %v3042_v13  ;;  %v2543_v55 = vpop.f32.mrf.mxu0  ;;  %v2662_v13 = vpop.f32.mrf.mxu2 }
 0x5cf   :  { %2582 = vmatmul.bf16.gmra.mxu0 %v7325_v42  ;;  %v2852_v29 = vpop.f32.mrf.mxu3 }
 0x5d0   :  { %v2962_v62 = vadd.f32 %v2961_v54, %v2852_v29  ;;  %v2963_v12 = vpop.f32.mrf.mxu1  ;;  %v7340_v54 = vld [vmem:[#allocation17_spill] sm:$0xff] }
 0x5d1   :  { %v2544_v60 = vadd.f32 %v2543_v55, %v7340_v54 }
 0x5d2   :  { %v3043_v41 = vadd.f32 %v2962_v62, %v2638_v0  ;;  %v7342_v62 = vld [vmem:[#allocation23_spill] sm:$0xff] }
 0x5d3   :  { %v2653_v47 = vadd.f32 %v2652_v40, %v2544_v60 }
 0x5d4   :  { %3083 = vst.msk [vmem:[%s6917_s10 + $0x60] sm:$0xff] %vm116_vm0, %v3043_v41  ;;  %v2545_v35 = vpop.f32.mrf.mxu0  ;;  %v2664_v55 = vpop.f32.mrf.mxu2 }
 0x5d7   :  { %v2854_v24 = vpop.f32.mrf.mxu3 }
 0x5d8   :  { %v2964_v16 = vadd.f32 %v2963_v12, %v2854_v24  ;;  %v2966_v2 = vpop.f32.mrf.mxu1 }
 0x5da   :  { %v3044_v49 = vadd.f32 %v2964_v16, %v2640_v43  ;;  %v7343_v43 = vld [vmem:[#allocation30_spill] sm:$0xff]  ;;  %v7344_v16 = vld [vmem:[#allocation39_spill] sm:$0xff] }
 0x5db   :  { %2896 = vmatmul.bf16.gmra.mxu3 %v7325_v42  ;;  %3390 = vmatmul.msk.bf16.gmra.mxu1 %vm959_vm4, %v7333_v17 }
 0x5dc   :  { %3084 = vst.msk [vmem:[%s6917_s10 + $0x68] sm:$0xff] %vm116_vm0, %v3044_v49  ;;  %v2548_v58 = vpop.f32.mrf.mxu0 }
 0x5dd   :  { %v2549_v40 = vadd.f32 %v2548_v58, %v7343_v43 }
 0x5df   :  { %2587 = vmatmul.bf16.gmra.mxu0 %v7329_v56  ;;  %v2857_v32 = vpop.f32.mrf.mxu3  ;;  %v2658_v11 = vadd.f32 %v2657_v4, %v2549_v40  ;;  %v7348_v4 = vld [vmem:[#allocation29_spill] sm:$0xff] }
 0x5e0   :  { %v2967_v63 = vadd.f32 %v2966_v2, %v2857_v32  ;;  %v2968_v33 = vpop.f32.mrf.mxu1  ;;  %v2667_v2 = vpop.f32.mrf.mxu2  ;;  %v7346_v32 = vld [vmem:[#allocation32_spill] sm:$0xff] }
 0x5e2   :  { %v3045_v26 = vadd.f32 %v2967_v63, %v2643_v25 }
 0x5e4   :  { %3085 = vst.msk [vmem:[%s6917_s10 + $0x70] sm:$0xff] %vm116_vm0, %v3045_v26  ;;  %v2550_v38 = vpop.f32.mrf.mxu0 }
 0x5e5   :  { %v2551_v25 = vadd.f32 %v2550_v38, %v7346_v32 }
 0x5e7   :  { %v2859_v48 = vpop.f32.mrf.mxu3  ;;  %v2660_v26 = vadd.f32 %v2659_v9, %v2551_v25 }
 0x5e8   :  { %v2969_v61 = vadd.f32 %v2968_v33, %v2859_v48  ;;  %v2971_v3 = vpop.f32.mrf.mxu1  ;;  %v2669_v33 = vpop.f32.mrf.mxu2  ;;  %v7347_v48 = vld [vmem:[#allocation34_spill] sm:$0xff] }
 0x5ea   :  { %v3046_v59 = vadd.f32 %v2969_v61, %v2645_v27  ;;  %v7349_v27 = vld [vmem:[#allocation18_spill] sm:$0xff] }
 0x5eb   :  { %2901 = vmatmul.bf16.gmra.mxu3 %v7329_v56  ;;  %3391 = vmatmul.msk.bf16.gmra.mxu1 %vm959_vm4, %v7338_v50  ;;  %v2546_v56 = vadd.f32 %v2545_v35, %v7342_v62  ;;  %v7345_v35 = vld [vmem:[#allocation31_spill] sm:$0xff]  ;;  %v7350_v61 = vpack.c.b16 %v7348_v4, %v7349_v27  ;;  %v7360_v27 = vld [vmem:[#allocation41_spill] sm:$0xff] }
 0x5ec   :  { %3086 = vst.msk [vmem:[%s6917_s10 + $0x78] sm:$0xff] %vm116_vm0, %v3046_v59  ;;  %v2553_v51 = vpop.f32.mrf.mxu0  ;;  %v7351_v59 = vld [vmem:[#allocation8_spill] sm:$0xff] }
 0x5ed   :  { %v2655_v12 = vadd.f32 %v2654_v57, %v2546_v56  ;;  %v2554_v34 = vadd.f32 %v2553_v51, %v7347_v48 }
 0x5ef   :  { %2592 = vmatmul.bf16.gmra.mxu0 %v7334_v22  ;;  %v2862_v18 = vpop.f32.mrf.mxu3  ;;  %v2663_v50 = vadd.f32 %v2662_v13, %v2554_v34 }
 0x5f0   :  { %v2972_v53 = vadd.f32 %v2971_v3, %v2862_v18  ;;  %v2973_v42 = vpop.f32.mrf.mxu1  ;;  %v7352_v3 = vld [vmem:[#allocation20_spill] sm:$0xff]  ;;  %v2672_v9 = vpop.f32.mrf.mxu2 }
 0x5f1   :  { %v7353_v6 = vpack.c.b16 %v7351_v59, %v7352_v3 }
 0x5f2   :  { %v3047_v44 = vadd.f32 %v2972_v53, %v2648_v15 }
 0x5f4   :  { %3087 = vst.msk [vmem:[%s6917_s10 + $0x80] sm:$0xff] %vm116_vm0, %v3047_v44  ;;  %v2555_v36 = vpop.f32.mrf.mxu0  ;;  %v7354_v44 = vld [vmem:[#allocation25_spill] sm:$0xff] }
 0x5f7   :  { %v2864_v23 = vpop.f32.mrf.mxu3 }
 0x5f8   :  { %v2974_v31 = vadd.f32 %v2973_v42, %v2864_v23  ;;  %v2976_v37 = vpop.f32.mrf.mxu1  ;;  %v2556_v42 = vadd.f32 %v2555_v36, %v7354_v44  ;;  %v2674_v13 = vpop.f32.mrf.mxu2  ;;  %v7356_v36 = vld [vmem:[#allocation27_spill] sm:$0xff] }
 0x5fa   :  { %v3048_v19 = vadd.f32 %v2974_v31, %v2650_v45  ;;  %v2665_v20 = vadd.f32 %v2664_v55, %v2556_v42 }
 0x5fb   :  { %2906 = vmatmul.bf16.gmra.mxu3 %v7334_v22  ;;  %3392 = vmatmul.msk.bf16.gmra.mxu1 %vm959_vm4, %v7341_v8 }
 0x5fc   :  { %3088 = vst.msk [vmem:[%s6917_s10 + $0x88] sm:$0xff] %vm116_vm0, %v3048_v19  ;;  %v2558_v24 = vpop.f32.mrf.mxu0  ;;  %v7355_v19 = vld [vmem:[#allocation14_spill] sm:$0xff] }
 0x5ff   :  { %v2867_v14 = vpop.f32.mrf.mxu3 }
 0x600   :  { %v2977_v52 = vadd.f32 %v2976_v37, %v2867_v14  ;;  %v2978_v0 = vpop.f32.mrf.mxu1  ;;  %v2559_v37 = vadd.f32 %v2558_v24, %v7355_v19  ;;  %v2677_v62 = vpop.f32.mrf.mxu2 }
 0x602   :  { %v3049_v29 = vadd.f32 %v2977_v52, %v2653_v47  ;;  %v2668_v60 = vadd.f32 %v2667_v2, %v2559_v37  ;;  %v7358_v2 = vld [vmem:[#allocation9_spill] sm:$0xff] }
 0x604   :  { %3089 = vst.msk [vmem:[%s6917_s10 + $0x90] sm:$0xff] %vm116_vm0, %v3049_v29  ;;  %v2560_v63 = vpop.f32.mrf.mxu0 }
 0x605   :  { %v2561_v29 = vadd.f32 %v2560_v63, %v7356_v36 }
 0x607   :  { %v2869_v41 = vpop.f32.mrf.mxu3  ;;  %v2670_v56 = vadd.f32 %v2669_v33, %v2561_v29 }
 0x608   :  { %v2979_v10 = vadd.f32 %v2978_v0, %v2869_v41  ;;  %v2981_v7 = vpop.f32.mrf.mxu1 }
 0x60a   :  { %v3050_v28 = vadd.f32 %v2979_v10, %v2655_v12  ;;  %v7357_v10 = vld [vmem:[#allocation33_spill] sm:$0xff] }
 0x60b   :  { %2911 = vmatmul.bf16.gmra.mxu3 %v7344_v16  ;;  %3393 = vmatmul.msk.bf16.gmra.mxu1 %vm959_vm4, %v7345_v35  ;;  %v2679_v16 = vpop.f32.mrf.mxu2 }
 0x60c   :  { %3090 = vst.msk [vmem:[%s6917_s10 + $0x98] sm:$0xff] %vm116_vm0, %v3050_v28  ;;  %v2563_v21 = vpop.f32.mrf.mxu0 }
 0x60d   :  { %v2564_v28 = vadd.f32 %v2563_v21, %v7357_v10 }
 0x60f   :  { %v2872_v49 = vpop.f32.mrf.mxu3  ;;  %v2673_v43 = vadd.f32 %v2672_v9, %v2564_v28 }
 0x610   :  { %v2982_v5 = vadd.f32 %v2981_v7, %v2872_v49  ;;  %v2983_v17 = vpop.f32.mrf.mxu1 }
 0x612   :  { %v3051_v57 = vadd.f32 %v2982_v5, %v2658_v11 }
 0x614   :  { %3091 = vst.msk [vmem:[%s6917_s10 + $0xa0] sm:$0xff] %vm116_vm0, %v3051_v57  ;;  %v2565_v23 = vpop.f32.mrf.mxu0 }
 0x615   :  { %v2566_v11 = vadd.f32 %v2565_v23, %v7358_v2  ;;  %v7362_v23 = vld [vmem:[#allocation6_spill] sm:$0xff] }
 0x617   :  { %v2874_v22 = vpop.f32.mrf.mxu3 }
 0x618   :  { %v2984_v58 = vadd.f32 %v2983_v17, %v2874_v22  ;;  %v2986_v30 = vpop.f32.mrf.mxu1  ;;  %v2675_v17 = vadd.f32 %v2674_v13, %v2566_v11  ;;  %v2682_v22 = vpop.f32.mrf.mxu2 }
 0x61a   :  { %v3052_v1 = vadd.f32 %v2984_v58, %v2660_v26  ;;  %v7359_v26 = vld [vmem:[#allocation37_spill] sm:$0xff] }
 0x61b   :  { %2916 = vmatmul.bf16.gmra.mxu3 %v7350_v61  ;;  %3394 = vmatmul.msk.bf16.gmra.mxu1 %vm959_vm4, %v7353_v6 }
 0x61c   :  { %3092 = vst.msk [vmem:[%s6917_s10 + $0xa8] sm:$0xff] %vm116_vm0, %v3052_v1  ;;  %v2568_v47 = vpop.f32.mrf.mxu0 }
 0x61d   :  { %v2569_v58 = vadd.f32 %v2568_v47, %v7359_v26 }
 0x61f   :  { %v2877_v38 = vpop.f32.mrf.mxu3  ;;  %v2678_v1 = vadd.f32 %v2677_v62, %v2569_v58 }
 0x620   :  { %v2987_v18 = vadd.f32 %v2986_v30, %v2877_v38  ;;  %v2988_v53 = vpop.f32.mrf.mxu1  ;;  %v2684_v59 = vpop.f32.mrf.mxu2 }
 0x622   :  { %v3053_v15 = vadd.f32 %v2987_v18, %v2663_v50 }
 0x624   :  { %3093 = vst.msk [vmem:[%s6917_s10 + $0xb0] sm:$0xff] %vm116_vm0, %v3053_v15  ;;  %v2570_v24 = vpop.f32.mrf.mxu0  ;;  %v7361_v15 = vld [vmem:[#allocation35_spill] sm:$0xff] }
 0x625   :  { %v2571_v61 = vadd.f32 %v2570_v24, %v7360_v27 }
 0x627   :  { %v2879_v46 = vpop.f32.mrf.mxu3  ;;  %v2680_v6 = vadd.f32 %v2679_v16, %v2571_v61  ;;  %v7365_v16 = vld [vmem:[#allocation5_spill] sm:$0xff] }
 0x628   :  { %v2989_v51 = vadd.f32 %v2988_v53, %v2879_v46  ;;  %v2991_v31 = vpop.f32.mrf.mxu1  ;;  %v2687_v44 = vpop.f32.mrf.mxu2 }
 0x62a   :  { %v3054_v45 = vadd.f32 %v2989_v51, %v2665_v20 }
 0x62c   :  { %3094 = vst.msk [vmem:[%s6917_s10 + $0xb8] sm:$0xff] %vm116_vm0, %v3054_v45  ;;  %v2573_v5 = vpop.f32.mrf.mxu0 }
 0x62d   :  { %v2574_v53 = vadd.f32 %v2573_v5, %v7361_v15 }
 0x62f   :  { %v2882_v54 = vpop.f32.mrf.mxu3  ;;  %v2683_v42 = vadd.f32 %v2682_v22, %v2574_v53 }
 0x630   :  { %v2992_v8 = vadd.f32 %v2991_v31, %v2882_v54  ;;  %v2993_v52 = vpop.f32.mrf.mxu1  ;;  %v2689_v54 = vpop.f32.mrf.mxu2 }
 0x632   :  { %v3055_v14 = vadd.f32 %v2992_v8, %v2668_v60 }
 0x634   :  { %3095 = vst.msk [vmem:[%s6917_s10 + $0xc0] sm:$0xff] %vm116_vm0, %v3055_v14  ;;  %v2575_v48 = vpop.f32.mrf.mxu0  ;;  %v7363_v14 = vld [vmem:[#allocation15_spill] sm:$0xff] }
 0x635   :  { %v2576_v45 = vadd.f32 %v2575_v48, %v7362_v23  ;;  %v7367_v48 = vld [vmem:[#allocation43_spill] sm:$0xff] }
 0x637   :  { %v2884_v0 = vpop.f32.mrf.mxu3  ;;  %v2685_v37 = vadd.f32 %v2684_v59, %v2576_v45 }
 0x638   :  { %v2994_v55 = vadd.f32 %v2993_v52, %v2884_v0  ;;  %v2996_v12 = vpop.f32.mrf.mxu1 }
 0x63a   :  { %v3056_v41 = vadd.f32 %v2994_v55, %v2670_v56  ;;  %v2692_v55 = vpop.f32.mrf.mxu2 }
 0x63c   :  { %3096 = vst.msk [vmem:[%s6917_s10 + $0xc8] sm:$0xff] %vm116_vm0, %v3056_v41  ;;  %v2578_v50 = vpop.f32.mrf.mxu0  ;;  %v7364_v41 = vld [vmem:[#allocation12_spill] sm:$0xff] }
 0x63d   :  { %v2579_v47 = vadd.f32 %v2578_v50, %v7363_v14 }
 0x63f   :  { %v2887_v7 = vpop.f32.mrf.mxu3  ;;  %v2688_v29 = vadd.f32 %v2687_v44, %v2579_v47 }
 0x640   :  { %v2997_v40 = vadd.f32 %v2996_v12, %v2887_v7  ;;  %v2998_v49 = vpop.f32.mrf.mxu1 }
 0x642   :  { %v3057_v35 = vadd.f32 %v2997_v40, %v2673_v43 }
 0x644   :  { %3097 = vst.msk [vmem:[%s6917_s10 + $0xd0] sm:$0xff] %vm116_vm0, %v3057_v35  ;;  %v2580_v31 = vpop.f32.mrf.mxu0 }
 0x645   :  { %v2581_v12 = vadd.f32 %v2580_v31, %v7364_v41 }
 0x647   :  { %v2889_v57 = vpop.f32.mrf.mxu3  ;;  %v2690_v28 = vadd.f32 %v2689_v54, %v2581_v12 }
 0x648   :  { %v2999_v32 = vadd.f32 %v2998_v49, %v2889_v57  ;;  %v3001_v63 = vpop.f32.mrf.mxu1  ;;  %v2694_v49 = vpop.f32.mrf.mxu2 }
 0x64a   :  { %v3058_v25 = vadd.f32 %v2999_v32, %v2675_v17 }
 0x64c   :  { %3098 = vst.msk [vmem:[%s6917_s10 + $0xd8] sm:$0xff] %vm116_vm0, %v3058_v25  ;;  %v2583_v52 = vpop.f32.mrf.mxu0  ;;  %v7366_v25 = vld [vmem:[#allocation42_spill] sm:$0xff] }
 0x64d   :  { %v2584_v35 = vadd.f32 %v2583_v52, %v7365_v16 }
 0x64f   :  { %v2892_v33 = vpop.f32.mrf.mxu3  ;;  %v2693_v11 = vadd.f32 %v2692_v55, %v2584_v35 }
 0x650   :  { %v3002_v30 = vadd.f32 %v3001_v63, %v2892_v33  ;;  %v3003_v4 = vpop.f32.mrf.mxu1  ;;  %v2697_v26 = vpop.f32.mrf.mxu2 }
 0x652   :  { %v3059_v34 = vadd.f32 %v3002_v30, %v2678_v1 }
 0x654   :  { %3099 = vst.msk [vmem:[%s6917_s10 + $0xe0] sm:$0xff] %vm116_vm0, %v3059_v34  ;;  %v2585_v7 = vpop.f32.mrf.mxu0 }
 0x655   :  { %v2586_v63 = vadd.f32 %v2585_v7, %v7366_v25 }
 0x657   :  { %v2894_v3 = vpop.f32.mrf.mxu3  ;;  %v2695_v58 = vadd.f32 %v2694_v49, %v2586_v63 }
 0x658   :  { %v3004_v21 = vadd.f32 %v3003_v4, %v2894_v3  ;;  %v3006_v18 = vpop.f32.mrf.mxu1  ;;  %v2699_v3 = vpop.f32.mrf.mxu2 }
 0x65a   :  { %v3060_v38 = vadd.f32 %v3004_v21, %v2680_v6 }
 0x65c   :  { %3100 = vst.msk [vmem:[%s6917_s10 + $0xe8] sm:$0xff] %vm116_vm0, %v3060_v38  ;;  %v2588_v17 = vpop.f32.mrf.mxu0  ;;  %v7368_v38 = vld [vmem:[#allocation44_spill] sm:$0xff] }
 0x65d   :  { %v2589_v34 = vadd.f32 %v2588_v17, %v7367_v48 }
 0x65f   :  { %v2897_v9 = vpop.f32.mrf.mxu3  ;;  %v2698_v61 = vadd.f32 %v2697_v26, %v2589_v34 }
 0x660   :  { %v3007_v46 = vadd.f32 %v3006_v18, %v2897_v9  ;;  %v3008_v51 = vpop.f32.mrf.mxu1 }
 0x662   :  { %v3061_v20 = vadd.f32 %v3007_v46, %v2683_v42  ;;  %v2702_v42 = vpop.f32.mrf.mxu2  ;;  %v7369_v46 = vld [vmem:[#allocation46_spill] sm:$0xff] }
 0x664   :  { %3101 = vst.msk [vmem:[%s6917_s10 + $0xf0] sm:$0xff] %vm116_vm0, %v3061_v20  ;;  %v2590_v4 = vpop.f32.mrf.mxu0 }
 0x665   :  { %v2591_v50 = vadd.f32 %v2590_v4, %v7368_v38 }
 0x667   :  { %v2899_v19 = vpop.f32.mrf.mxu3  ;;  %v2700_v53 = vadd.f32 %v2699_v3, %v2591_v50 }
 0x668   :  { %v3009_v13 = vadd.f32 %v3008_v51, %v2899_v19  ;;  %v3011_v8 = vpop.f32.mrf.mxu1 }
 0x66a   :  { %v3062_v60 = vadd.f32 %v3009_v13, %v2685_v37  ;;  %v2704_v54 = vpop.f32.mrf.mxu2 }
 0x66c   :  { %3102 = vst.msk [vmem:[%s6917_s10 + $0xf8] sm:$0xff] %vm116_vm0, %v3062_v60  ;;  %v2593_v18 = vpop.f32.mrf.mxu0 }
 0x66d   :  { %v2594_v20 = vadd.f32 %v2593_v18, %v7369_v46 }
 0x66f   :  { %v2902_v36 = vpop.f32.mrf.mxu3  ;;  %v2703_v45 = vadd.f32 %v2702_v42, %v2594_v20 }
 0x670   :  { %v3012_v0 = vadd.f32 %v3011_v8, %v2902_v36  ;;  %v3013_v56 = vpop.f32.mrf.mxu1 }
 0x672   :  { %v3063_v62 = vadd.f32 %v3012_v0, %v2688_v29 }
 0x674   :  { %3103 = vst.msk [vmem:[%s6917_s10 + $0x100] sm:$0xff] %vm116_vm0, %v3063_v62  ;;  %v2595_v19 = vpop.f32.mrf.mxu0 }
 0x675   :  { %v2596_v13 = vadd.f32 %v2595_v19, %v6602_v39 }
 0x677   :  { %v2904_v10 = vpop.f32.mrf.mxu3  ;;  %v2705_v14 = vadd.f32 %v2704_v54, %v2596_v13 }
 0x678   :  { %v3014_v24 = vadd.f32 %v3013_v56, %v2904_v10  ;;  %v3016_v40 = vpop.f32.mrf.mxu1 }
 0x67a   :  { %v3064_v43 = vadd.f32 %v3014_v24, %v2690_v28 }
 0x67c   :  { %3104 = vst.msk [vmem:[%s6917_s10 + $0x108] sm:$0xff] %vm116_vm0, %v3064_v43 }
 0x67f   :  { %v2907_v2 = vpop.f32.mrf.mxu3 }
 0x680   :  { %v3017_v5 = vadd.f32 %v3016_v40, %v2907_v2  ;;  %v3018_v32 = vpop.f32.mrf.mxu1 }
 0x682   :  { %v3065_v57 = vadd.f32 %v3017_v5, %v2693_v11 }
 0x684   :  { %3105 = vst.msk [vmem:[%s6917_s10 + $0x110] sm:$0xff] %vm116_vm0, %v3065_v57 }
 0x687   :  { %v2909_v22 = vpop.f32.mrf.mxu3 }
 0x688   :  { %v3019_v33 = vadd.f32 %v3018_v32, %v2909_v22  ;;  %v3021_v30 = vpop.f32.mrf.mxu1 }
 0x68a   :  { %v3066_v1 = vadd.f32 %v3019_v33, %v2695_v58 }
 0x68c   :  { %3106 = vst.msk [vmem:[%s6917_s10 + $0x118] sm:$0xff] %vm116_vm0, %v3066_v1 }
 0x68f   :  { %v2912_v27 = vpop.f32.mrf.mxu3 }
 0x690   :  { %v3022_v59 = vadd.f32 %v3021_v30, %v2912_v27  ;;  %v3023_v21 = vpop.f32.mrf.mxu1 }
 0x692   :  { %v3067_v6 = vadd.f32 %v3022_v59, %v2698_v61 }
 0x694   :  { %3107 = vst.msk [vmem:[%s6917_s10 + $0x120] sm:$0xff] %vm116_vm0, %v3067_v6 }
 0x697   :  { %v2914_v15 = vpop.f32.mrf.mxu3 }
 0x698   :  { %v3024_v9 = vadd.f32 %v3023_v21, %v2914_v15  ;;  %v3026_v51 = vpop.f32.mrf.mxu1 }
 0x69a   :  { %v3068_v44 = vadd.f32 %v3024_v9, %v2700_v53 }
 0x69c   :  { %3108 = vst.msk [vmem:[%s6917_s10 + $0x128] sm:$0xff] %vm116_vm0, %v3068_v44 }
 0x69f   :  { %v2917_v23 = vpop.f32.mrf.mxu3 }
 0x6a0   :  { %v3027_v31 = vadd.f32 %v3026_v51, %v2917_v23  ;;  %v3028_v60 = vpop.f32.mrf.mxu1 }
 0x6a2   :  { %v3069_v37 = vadd.f32 %v3027_v31, %v2703_v45 }
 0x6a4   :  { %3109 = vst.msk [vmem:[%s6917_s10 + $0x130] sm:$0xff] %vm116_vm0, %v3069_v37 }
 0x6a7   :  { %v2919_v8 = vpop.f32.mrf.mxu3 }
 0x6a8   :  { %v3029_v47 = vadd.f32 %v3028_v60, %v2919_v8 }
 0x6aa   :  { %v3070_v52 = vadd.f32 %v3029_v47, %v2705_v14 }
 0x6ac   :  { %3110 = vst.msk [vmem:[%s6917_s10 + $0x138] sm:$0xff] %vm116_vm0, %v3070_v52 }

</bundles_post_ra>
